<compile_context>
chip_gen: v7x
topology: tpu7x:2x2x1
jax: 0.10.0
libtpu: 0.0.40
codegen_flags: <defaults>
</compile_context>

<pallas_src>
import functools

import jax
import jax.numpy as jnp
from jax.experimental import pallas as pl
from jax.experimental.pallas import tpu as pltpu

BN_EPS = 1e-5


# ------------------------------ VMEM budget ------------------------------------


def _vmem_budget_bytes():
    """Generation-aware VMEM budget (v5e/v6e: 128 MiB, v7x: 64 MiB per TensorCore)."""
    cap = 64 * 1024 * 1024
    try:
        info = pltpu.get_tpu_info()
        cap = int(getattr(info, "vmem_capacity_bytes", cap))
    except Exception:
        pass
    # Leave headroom for compiler-internal scratch / double buffers:
    # 128 MiB -> 80 MiB, 64 MiB -> 40 MiB.
    return min(int(cap * 0.625), 96 * 1024 * 1024)


VMEM_BUDGET = _vmem_budget_bytes()


def _pick_batch_tile(n, row_bytes, budget, cap_rows=4096):
    """Largest multiple-of-8 divisor of n fitting the per-tile VMEM budget (or n)."""
    cap = max(budget // max(row_bytes, 1), 8)
    cap = int(min(cap, cap_rows, n))
    if n <= cap:
        return n
    t = (cap // 8) * 8
    while t >= 8:
        if n % t == 0:
            return t
        t -= 8
    # TODO(synk): ragged batch sizes with no multiple-of-8 divisor fall back to a
    # single whole-batch tile, which may exceed the VMEM budget for very large odd N.
    return n


# ------------------------------ shared helpers ----------------------------------


def _fold_bn_into(ss_ref, stats, gb, n_batch):
    """Write [scale; shift] into ss_ref from one-pass stats (training-mode BN)."""
    inv_n = 1.0 / n_batch                       # static python float
    mean = stats[0:1, :] * inv_n
    var = stats[1:2, :] * inv_n - mean * mean   # biased variance (PyTorch training fwd)
    scale = gb[0:1, :] * jax.lax.rsqrt(var + BN_EPS)
    ss_ref[0:1, :] = scale
    ss_ref[1:2, :] = gb[1:2, :] - mean * scale


def _accumulate_stats(stats_ref, h_f32):
    """Accumulate per-feature sum / sum-of-squares with two row-slice adds."""
    stats_ref[0:1, :] += jnp.sum(h_f32, axis=0, keepdims=True)
    stats_ref[1:2, :] += jnp.sum(h_f32 * h_f32, axis=0, keepdims=True)


# ------------------------------ fused kernel ------------------------------------


def _fused_kernel(n_batch, x_ref, w1_ref, gb1_ref, w2_ref, gb2_ref, o_ref,
                  h1_scr, h2_scr, st1, st2, ss1, ss2):
    p = pl.program_id(0)   # phase: 0 = x@W1, 1 = BN1+ReLU -> @W2, 2 = BN2+ReLU
    i = pl.program_id(1)   # batch tile

    @pl.when(p == 0)
    def _phase0():
        @pl.when(i == 0)
        def _init():
            st1[...] = jnp.zeros_like(st1)
            st2[...] = jnp.zeros_like(st2)

        # bias dropped: per-feature constants cancel under training-mode BatchNorm.
        h1 = jnp.dot(x_ref[...].astype(jnp.bfloat16),
                     w1_ref[...].astype(jnp.bfloat16),
                     preferred_element_type=jnp.float32)
        h1_scr[i] = h1.astype(h1_scr.dtype)
        _accumulate_stats(st1, h1)

    @pl.when(p == 1)
    def _phase1():
        @pl.when(i == 0)
        def _fold1():
            _fold_bn_into(ss1, st1[...], gb1_ref[...], n_batch)

        a1 = jnp.maximum(
            h1_scr[i].astype(jnp.float32) * ss1[0:1, :] + ss1[1:2, :], 0.0)
        h2 = jnp.dot(a1.astype(jnp.bfloat16),
                     w2_ref[...].astype(jnp.bfloat16),
                     preferred_element_type=jnp.float32)
        h2_scr[i] = h2.astype(h2_scr.dtype)
        _accumulate_stats(st2, h2)

    @pl.when(p == 2)
    def _phase2():
        @pl.when(i == 0)
        def _fold2():
            _fold_bn_into(ss2, st2[...], gb2_ref[...], n_batch)

        o_ref[...] = jnp.maximum(
            h2_scr[i].astype(jnp.float32) * ss2[0:1, :] + ss2[1:2, :],
            0.0).astype(o_ref.dtype)


def _forward_fused(x, w1, gb1, w2, gb2, tn):
    n, k = x.shape
    h1 = w1.shape[1]
    h2 = w2.shape[1]
    nt = n // tn

    # x is only consumed in phase 0 (pin to the last tile afterwards -> no re-fetch);
    # the output is only produced in phase 2 (pin to block 0 before that, so the
    # resident buffer is first flushed after phase-2/tile-0 has written it).
    x_spec = pl.BlockSpec((tn, k), lambda p, i: (jnp.where(p == 0, i, nt - 1), 0))
    out_spec = pl.BlockSpec((tn, h2), lambda p, i: (jnp.where(p == 2, i, 0), 0))
    res = lambda shape: pl.BlockSpec(shape, lambda p, i: (0, 0))

    return pl.pallas_call(
        functools.partial(_fused_kernel, float(n)),
        out_shape=jax.ShapeDtypeStruct((n, h2), jnp.float32),
        grid=(3, nt),
        in_specs=[x_spec, res((k, h1)), res((2, h1)), res((h1, h2)), res((2, h2))],
        out_specs=out_spec,
        scratch_shapes=[
            pltpu.VMEM((nt, tn, h1), jnp.bfloat16),   # h1 intermediate (VMEM resident)
            pltpu.VMEM((nt, tn, h2), jnp.bfloat16),   # h2 intermediate (VMEM resident)
            pltpu.VMEM((2, h1), jnp.float32),         # [sum; sumsq] layer 1
            pltpu.VMEM((2, h2), jnp.float32),         # [sum; sumsq] layer 2
            pltpu.VMEM((2, h1), jnp.float32),         # [scale; shift] layer 1
            pltpu.VMEM((2, h2), jnp.float32),         # [scale; shift] layer 2
        ],
        compiler_params=pltpu.CompilerParams(
            dimension_semantics=("arbitrary", "arbitrary"),
            vmem_limit_bytes=VMEM_BUDGET),
    )(x, w1, gb1, w2, gb2)


# --------------------------- multi-pass fallback kernels -------------------------


def _linear_stats_kernel(x_ref, w_ref, h_ref, stats_ref):
    @pl.when(pl.program_id(0) == 0)
    def _zero():
        stats_ref[...] = jnp.zeros_like(stats_ref)

    h = jnp.dot(x_ref[...].astype(jnp.bfloat16), w_ref[...].astype(jnp.bfloat16),
                preferred_element_type=jnp.float32)
    h_ref[...] = h.astype(h_ref.dtype)          # bf16 intermediate to HBM
    _accumulate_stats(stats_ref, h)


def _bn_relu_linear_stats_kernel(h1_ref, ss_ref, w_ref, h2_ref, stats_ref):
    @pl.when(pl.program_id(0) == 0)
    def _zero():
        stats_ref[...] = jnp.zeros_like(stats_ref)

    a1 = jnp.maximum(
        h1_ref[...].astype(jnp.float32) * ss_ref[0:1, :] + ss_ref[1:2, :], 0.0)
    h2 = jnp.dot(a1.astype(jnp.bfloat16), w_ref[...].astype(jnp.bfloat16),
                 preferred_element_type=jnp.float32)
    h2_ref[...] = h2.astype(h2_ref.dtype)
    _accumulate_stats(stats_ref, h2)


def _bn_relu_kernel(h_ref, ss_ref, o_ref):
    o_ref[...] = jnp.maximum(
        h_ref[...].astype(jnp.float32) * ss_ref[0:1, :] + ss_ref[1:2, :],
        0.0).astype(o_ref.dtype)


def _fold_bn(stats, gb, n_batch):
    """Tiny O(H) XLA op between passes: fold BN stats into [scale; shift]."""
    mean = stats[0:1, :] / n_batch
    var = stats[1:2, :] / n_batch - mean * mean
    scale = gb[0:1, :] * jax.lax.rsqrt(var + BN_EPS)
    shift = gb[1:2, :] - mean * scale
    return jnp.concatenate([scale, shift], axis=0)


def _forward_multipass(x, w1, gb1, w2, gb2, tn):
    n, k = x.shape
    h1 = w1.shape[1]
    h2 = w2.shape[1]
    grid = (n // tn,)

    tile = lambda d: pl.BlockSpec((tn, d), lambda i: (i, 0))
    res = lambda shape: pl.BlockSpec(shape, lambda i: (0, 0))
    cp = lambda sem: pltpu.CompilerParams(dimension_semantics=(sem,),
                                          vmem_limit_bytes=VMEM_BUDGET)

    # pass A: h1 = x @ W1 (+ layer-1 stats)
    h1_act, stats1 = pl.pallas_call(
        _linear_stats_kernel,
        out_shape=(jax.ShapeDtypeStruct((n, h1), jnp.bfloat16),
                   jax.ShapeDtypeStruct((2, h1), jnp.float32)),
        grid=grid,
        in_specs=[tile(k), res((k, h1))],
        out_specs=(tile(h1), res((2, h1))),
        compiler_params=cp("arbitrary"),
    )(x, w1)
    ss1 = _fold_bn(stats1, gb1, float(n))

    # pass B: a1 = BN1+ReLU(h1); h2 = a1 @ W2 (+ layer-2 stats)
    h2_act, stats2 = pl.pallas_call(
        _bn_relu_linear_stats_kernel,
        out_shape=(jax.ShapeDtypeStruct((n, h2), jnp.bfloat16),
                   jax.ShapeDtypeStruct((2, h2), jnp.float32)),
        grid=grid,
        in_specs=[tile(h1), res((2, h1)), res((h1, h2))],
        out_specs=(tile(h2), res((2, h2))),
        compiler_params=cp("arbitrary"),
    )(h1_act, ss1, w2)
    ss2 = _fold_bn(stats2, gb2, float(n))

    # pass C: out = BN2+ReLU(h2)  (fully parallel over batch tiles)
    return pl.pallas_call(
        _bn_relu_kernel,
        out_shape=jax.ShapeDtypeStruct((n, h2), jnp.float32),
        grid=grid,
        in_specs=[tile(h2), res((2, h2))],
        out_specs=tile(h2),
        compiler_params=cp("parallel"),
    )(h2_act, ss2)


# ---------------------------------- wrapper --------------------------------------


@functools.partial(jax.jit, static_argnames=("force_multipass",))
def mlp2_forward(x, params, force_multipass=False):
    w1, b1, gb1, w2, b2, gb2 = params  # biases kept for API parity, unused in kernels
    del b1, b2                          # cancel under training-mode BatchNorm
    n, k = x.shape
    h1 = w1.shape[1]
    h2 = w2.shape[1]

    budget = int(VMEM_BUDGET * 0.9)
    resident = 4 * (k * h1 + h1 * h2) + 4 * 8 * (h1 + h2)   # f32 weights + BN/stats/ss

    # Fused path: bf16 intermediates live entirely in VMEM scratch.
    fused_scratch = 2 * n * (h1 + h2)
    fused_row = 2 * (4 * k + 4 * h2)          # double-buffered streamed x(f32)+out(f32)
    fused_fits = fused_scratch + resident + 8 * fused_row <= budget

    if fused_fits and not force_multipass:
        tn = _pick_batch_tile(n, fused_row, budget - fused_scratch - resident)
        return _forward_fused(x, w1, gb1, w2, gb2, tn)

    # Multi-pass fallback: (N,H) intermediates round-trip HBM in bf16.
    stream_row = 2 * max(4 * k + 2 * h1, 2 * h1 + 2 * h2, 2 * h2 + 4 * h2)
    tn = _pick_batch_tile(n, stream_row, budget - resident)
    return _forward_multipass(x, w1, gb1, w2, gb2, tn)


# ---------------------------- params & reference ---------------------------------


def init_params(key, input_dim, hidden_dims):
    """Mimics nn.Linear default init; BN packed as (2, H) rows [gamma; beta]."""
    h1, h2 = hidden_dims
    k1, k2, k3, k4 = jax.random.split(key, 4)

    def linear_init(kw, kb, fan_in, fan_out):
        bound = 1.0 / float(fan_in) ** 0.5
        w = jax.random.uniform(kw, (fan_in, fan_out), jnp.float32, -bound, bound)  # = W.T
        b = jax.random.uniform(kb, (1, fan_out), jnp.float32, -bound, bound)
        return w, b

    w1, b1 = linear_init(k1, k2, input_dim, h1)
    w2, b2 = linear_init(k3, k4, h1, h2)
    gb1 = jnp.concatenate([jnp.ones((1, h1)), jnp.zeros((1, h1))], 0).astype(jnp.float32)
    gb2 = jnp.concatenate([jnp.ones((1, h2)), jnp.zeros((1, h2))], 0).astype(jnp.float32)
    return (w1, b1, gb1, w2, b2, gb2)


def mlp2_reference(x, params):
    """Pure-JAX f32 reference with biases (they cancel under training-mode BN)."""
    w1, b1, gb1, w2, b2, gb2 = params

    def layer(h, w, b, gb):
        h = h @ w + b
        m = h.mean(0, keepdims=True)
        v = ((h - m) ** 2).mean(0, keepdims=True)  # biased variance (PyTorch training fwd)
        return jnp.maximum((h - m) / jnp.sqrt(v + BN_EPS) * gb[0:1] + gb[1:2], 0.0)

    return layer(layer(x, w1, b1, gb1), w2, b2, gb2)


if __name__ == "__main__":
    # MXU-friendly small shapes: batch multiple of 8, 128-multiple feature dims.
    batch, input_dim = 512, 128
    hidden_dims = [256, 256]

    key = jax.random.PRNGKey(0)
    kx, kp = jax.random.split(key)
    x = jax.random.normal(kx, (batch, input_dim), jnp.float32)
    params = init_params(kp, input_dim, hidden_dims)

    ref = mlp2_reference(x, params)

    # Default dispatch -> fused single-kernel path (everything VMEM-resident here).
    out = jax.block_until_ready(mlp2_forward(x, params))
    assert out.shape == (batch, hidden_dims[1])
    assert jnp.allclose(out, ref, atol=5e-2, rtol=5e-2), "fused path mismatch"

    # Also exercise the multi-pass fallback path so both code paths stay validated.
    out_mp = jax.block_until_ready(mlp2_forward(x, params, force_multipass=True))
    assert jnp.allclose(out_mp, ref, atol=5e-2, rtol=5e-2), "multi-pass path mismatch"

    print("KERNEL_OK")
</pallas_src>

<mosaic_0001>
module attributes {stable_mosaic.version = 11 : i64} {
  func.func @_fused_kernel(%arg0: i32, %arg1: i32, %arg2: memref<512x128xf32, #tpu.memory_space<vmem>>, %arg3: memref<128x256xf32, #tpu.memory_space<vmem>>, %arg4: memref<2x256xf32, #tpu.memory_space<vmem>>, %arg5: memref<256x256xf32, #tpu.memory_space<vmem>>, %arg6: memref<2x256xf32, #tpu.memory_space<vmem>>, %arg7: memref<512x256xf32, #tpu.memory_space<vmem>>, %arg8: memref<1x512x256xbf16, #tpu.memory_space<vmem>>, %arg9: memref<1x512x256xbf16, #tpu.memory_space<vmem>>, %arg10: memref<2x256xf32, #tpu.memory_space<vmem>>, %arg11: memref<2x256xf32, #tpu.memory_space<vmem>>, %arg12: memref<2x256xf32, #tpu.memory_space<vmem>>, %arg13: memref<2x256xf32, #tpu.memory_space<vmem>>) attributes {dimension_semantics = [#tpu.dimension_semantics<arbitrary>, #tpu.dimension_semantics<arbitrary>], iteration_bounds = array<i64: 3, 1>, scalar_prefetch = 0 : i64, scratch_operands = 6 : i64, tpu.core_type = #tpu.core_type<tc>, window_params = [{transform_indices = @transform_0, window_bounds = array<i64: 512, 128>}, {pipeline_mode = #tpu.pipeline_mode<synchronous>, transform_indices = @transform_1, window_bounds = array<i64: 128, 256>}, {pipeline_mode = #tpu.pipeline_mode<synchronous>, transform_indices = @transform_2, window_bounds = array<i64: 2, 256>}, {pipeline_mode = #tpu.pipeline_mode<synchronous>, transform_indices = @transform_3, window_bounds = array<i64: 256, 256>}, {pipeline_mode = #tpu.pipeline_mode<synchronous>, transform_indices = @transform_4, window_bounds = array<i64: 2, 256>}, {transform_indices = @transform_5, window_bounds = array<i64: 512, 256>}]} {
    %c0_i32 = arith.constant 0 : i32
    %0 = arith.cmpi eq, %arg0, %c0_i32 : i32
    %1 = arith.extui %0 : i1 to i32
    %c0_i32_0 = arith.constant 0 : i32
    %2 = arith.cmpi ne, %1, %c0_i32_0 : i32
    scf.if %2 {
      %c0_i32_3 = arith.constant 0 : i32
      %9 = arith.cmpi eq, %arg1, %c0_i32_3 : i32
      %10 = arith.extui %9 : i1 to i32
      %c0_i32_4 = arith.constant 0 : i32
      %11 = arith.cmpi ne, %10, %c0_i32_4 : i32
      scf.if %11 {
        %cst_19 = arith.constant 0.000000e+00 : f32
        %33 = vector.broadcast %cst_19 : f32 to vector<2x256xf32>
        %c0_20 = arith.constant 0 : index
        %c0_21 = arith.constant 0 : index
        %34 = vector.load %arg10[%c0_20, %c0_21] : memref<2x256xf32, #tpu.memory_space<vmem>>, vector<2x256xf32>
        tpu.vector_store %arg10[%c0_20, %c0_21], %33 {strides = array<i32>} : memref<2x256xf32, #tpu.memory_space<vmem>>, vector<2x256xf32>,
        %cst_22 = arith.constant 0.000000e+00 : f32
        %35 = vector.broadcast %cst_22 : f32 to vector<2x256xf32>
        %c0_23 = arith.constant 0 : index
        %c0_24 = arith.constant 0 : index
        %36 = vector.load %arg11[%c0_23, %c0_24] : memref<2x256xf32, #tpu.memory_space<vmem>>, vector<2x256xf32>
        tpu.vector_store %arg11[%c0_23, %c0_24], %35 {strides = array<i32>} : memref<2x256xf32, #tpu.memory_space<vmem>>, vector<2x256xf32>,
      } else {
      }
      %c0 = arith.constant 0 : index
      %c0_5 = arith.constant 0 : index
      %12 = vector.load %arg2[%c0, %c0_5] : memref<512x128xf32, #tpu.memory_space<vmem>>, vector<512x128xf32>
      %13 = arith.truncf %12 : vector<512x128xf32> to vector<512x128xbf16>
      %c0_6 = arith.constant 0 : index
      %c0_7 = arith.constant 0 : index
      %14 = vector.load %arg3[%c0_6, %c0_7] : memref<128x256xf32, #tpu.memory_space<vmem>>, vector<128x256xf32>
      %15 = arith.truncf %14 : vector<128x256xf32> to vector<128x256xbf16>
      %cst = arith.constant dense<0.000000e+00> : vector<512x256xf32>
      %16 = tpu.matmul %13, %15, %cst {dimension_numbers = #tpu.dot_dimension_numbers<[1], [0], [0], [1], [0, 0, 1, 1], [], []>} : vector<512x128xbf16>, vector<128x256xbf16>, vector<512x256xf32> -> vector<512x256xf32>
      %17 = arith.truncf %16 : vector<512x256xf32> to vector<512x256xbf16>
      %18 = arith.index_cast %arg1 : i32 to index
      %c0_8 = arith.constant 0 : index
      %c0_9 = arith.constant 0 : index
      %19 = vector.load %arg8[%18, %c0_8, %c0_9] : memref<1x512x256xbf16, #tpu.memory_space<vmem>>, vector<1x512x256xbf16>
      %20 = vector.shape_cast %19 : vector<1x512x256xbf16> to vector<512x256xbf16>
      %21 = vector.shape_cast %17 : vector<512x256xbf16> to vector<1x512x256xbf16>
      tpu.vector_store %arg8[%18, %c0_8, %c0_9], %21 {strides = array<i32>} : memref<1x512x256xbf16, #tpu.memory_space<vmem>>, vector<1x512x256xbf16>,
      %c0_10 = arith.constant 0 : index
      %c0_11 = arith.constant 0 : index
      %22 = vector.load %arg10[%c0_10, %c0_11] : memref<2x256xf32, #tpu.memory_space<vmem>>, vector<1x256xf32>
      %cst_12 = arith.constant dense<0.000000e+00> : vector<256xf32>
      %23 = vector.multi_reduction <add>, %16, %cst_12 [0] : vector<512x256xf32> to vector<256xf32>
      %24 = vector.shape_cast %23 : vector<256xf32> to vector<1x256xf32>
      %25 = arith.addf %22, %24 : vector<1x256xf32>
      %c0_13 = arith.constant 0 : index
      %c0_14 = arith.constant 0 : index
      %26 = vector.load %arg10[%c0_13, %c0_14] : memref<2x256xf32, #tpu.memory_space<vmem>>, vector<1x256xf32>
      tpu.vector_store %arg10[%c0_13, %c0_14], %25 {strides = array<i32>} : memref<2x256xf32, #tpu.memory_space<vmem>>, vector<1x256xf32>,
      %c1 = arith.constant 1 : index
      %c0_15 = arith.constant 0 : index
      %27 = vector.load %arg10[%c1, %c0_15] : memref<2x256xf32, #tpu.memory_space<vmem>>, vector<1x256xf32>
      %28 = arith.mulf %16, %16 : vector<512x256xf32>
      %cst_16 = arith.constant dense<0.000000e+00> : vector<256xf32>
      %29 = vector.multi_reduction <add>, %28, %cst_16 [0] : vector<512x256xf32> to vector<256xf32>
      %30 = vector.shape_cast %29 : vector<256xf32> to vector<1x256xf32>
      %31 = arith.addf %27, %30 : vector<1x256xf32>
      %c1_17 = arith.constant 1 : index
      %c0_18 = arith.constant 0 : index
      %32 = vector.load %arg10[%c1_17, %c0_18] : memref<2x256xf32, #tpu.memory_space<vmem>>, vector<1x256xf32>
      tpu.vector_store %arg10[%c1_17, %c0_18], %31 {strides = array<i32>} : memref<2x256xf32, #tpu.memory_space<vmem>>, vector<1x256xf32>,
    } else {
    }
    %c1_i32 = arith.constant 1 : i32
    %3 = arith.cmpi eq, %arg0, %c1_i32 : i32
    %4 = arith.extui %3 : i1 to i32
    %c0_i32_1 = arith.constant 0 : i32
    %5 = arith.cmpi ne, %4, %c0_i32_1 : i32
    scf.if %5 {
      %c0_i32_3 = arith.constant 0 : i32
      %9 = arith.cmpi eq, %arg1, %c0_i32_3 : i32
      %10 = arith.extui %9 : i1 to i32
      %c0_i32_4 = arith.constant 0 : i32
      %11 = arith.cmpi ne, %10, %c0_i32_4 : i32
      scf.if %11 {
        %c0_24 = arith.constant 0 : index
        %c0_25 = arith.constant 0 : index
        %44 = vector.load %arg10[%c0_24, %c0_25] : memref<2x256xf32, #tpu.memory_space<vmem>>, vector<2x256xf32>
        %c0_26 = arith.constant 0 : index
        %c0_27 = arith.constant 0 : index
        %45 = vector.load %arg4[%c0_26, %c0_27] : memref<2x256xf32, #tpu.memory_space<vmem>>, vector<2x256xf32>
        %46 = vector.extract_strided_slice %44 {offsets = [0, 0], sizes = [1, 256], strides = [1, 1]} : vector<2x256xf32> to vector<1x256xf32>
        %cst_28 = arith.constant 0.001953125 : f32
        %47 = vector.broadcast %cst_28 : f32 to vector<1x256xf32>
        %48 = arith.mulf %46, %47 : vector<1x256xf32>
        %49 = vector.extract_strided_slice %44 {offsets = [1, 0], sizes = [1, 256], strides = [1, 1]} : vector<2x256xf32> to vector<1x256xf32>
        %cst_29 = arith.constant 0.001953125 : f32
        %50 = vector.broadcast %cst_29 : f32 to vector<1x256xf32>
        %51 = arith.mulf %49, %50 : vector<1x256xf32>
        %52 = arith.mulf %48, %48 : vector<1x256xf32>
        %53 = arith.subf %51, %52 : vector<1x256xf32>
        %54 = vector.extract_strided_slice %45 {offsets = [0, 0], sizes = [1, 256], strides = [1, 1]} : vector<2x256xf32> to vector<1x256xf32>
        %cst_30 = arith.constant 9.99999974E-6 : f32
        %55 = vector.broadcast %cst_30 : f32 to vector<1x256xf32>
        %56 = arith.addf %53, %55 : vector<1x256xf32>
        %57 = math.rsqrt %56 : vector<1x256xf32>
        %58 = arith.mulf %54, %57 : vector<1x256xf32>
        %c0_31 = arith.constant 0 : index
        %c0_32 = arith.constant 0 : index
        %59 = vector.load %arg12[%c0_31, %c0_32] : memref<2x256xf32, #tpu.memory_space<vmem>>, vector<1x256xf32>
        tpu.vector_store %arg12[%c0_31, %c0_32], %58 {strides = array<i32>} : memref<2x256xf32, #tpu.memory_space<vmem>>, vector<1x256xf32>,
        %60 = vector.extract_strided_slice %45 {offsets = [1, 0], sizes = [1, 256], strides = [1, 1]} : vector<2x256xf32> to vector<1x256xf32>
        %61 = arith.mulf %48, %58 : vector<1x256xf32>
        %62 = arith.subf %60, %61 : vector<1x256xf32>
        %c1_33 = arith.constant 1 : index
        %c0_34 = arith.constant 0 : index
        %63 = vector.load %arg12[%c1_33, %c0_34] : memref<2x256xf32, #tpu.memory_space<vmem>>, vector<1x256xf32>
        tpu.vector_store %arg12[%c1_33, %c0_34], %62 {strides = array<i32>} : memref<2x256xf32, #tpu.memory_space<vmem>>, vector<1x256xf32>,
      } else {
      }
      %12 = arith.index_cast %arg1 : i32 to index
      %c0 = arith.constant 0 : index
      %c0_5 = arith.constant 0 : index
      %13 = vector.load %arg8[%12, %c0, %c0_5] : memref<1x512x256xbf16, #tpu.memory_space<vmem>>, vector<1x512x256xbf16>
      %14 = vector.shape_cast %13 : vector<1x512x256xbf16> to vector<512x256xbf16>
      %15 = arith.extf %14 : vector<512x256xbf16> to vector<512x256xf32>
      %c0_6 = arith.constant 0 : index
      %c0_7 = arith.constant 0 : index
      %16 = vector.load %arg12[%c0_6, %c0_7] : memref<2x256xf32, #tpu.memory_space<vmem>>, vector<1x256xf32>
      %17 = vector.broadcast %16 : vector<1x256xf32> to vector<512x256xf32>
      %18 = arith.mulf %15, %17 : vector<512x256xf32>
      %c1 = arith.constant 1 : index
      %c0_8 = arith.constant 0 : index
      %19 = vector.load %arg12[%c1, %c0_8] : memref<2x256xf32, #tpu.memory_space<vmem>>, vector<1x256xf32>
      %20 = vector.broadcast %19 : vector<1x256xf32> to vector<512x256xf32>
      %21 = arith.addf %18, %20 : vector<512x256xf32>
      %cst = arith.constant 0.000000e+00 : f32
      %22 = vector.broadcast %cst : f32 to vector<512x256xf32>
      %23 = arith.maximumf %21, %22 : vector<512x256xf32>
      %24 = arith.truncf %23 : vector<512x256xf32> to vector<512x256xbf16>
      %c0_9 = arith.constant 0 : index
      %c0_10 = arith.constant 0 : index
      %25 = vector.load %arg5[%c0_9, %c0_10] : memref<256x256xf32, #tpu.memory_space<vmem>>, vector<256x256xf32>
      %26 = arith.truncf %25 : vector<256x256xf32> to vector<256x256xbf16>
      %cst_11 = arith.constant dense<0.000000e+00> : vector<512x256xf32>
      %27 = tpu.matmul %24, %26, %cst_11 {dimension_numbers = #tpu.dot_dimension_numbers<[1], [0], [0], [1], [0, 0, 1, 1], [], []>} : vector<512x256xbf16>, vector<256x256xbf16>, vector<512x256xf32> -> vector<512x256xf32>
      %28 = arith.truncf %27 : vector<512x256xf32> to vector<512x256xbf16>
      %29 = arith.index_cast %arg1 : i32 to index
      %c0_12 = arith.constant 0 : index
      %c0_13 = arith.constant 0 : index
      %30 = vector.load %arg9[%29, %c0_12, %c0_13] : memref<1x512x256xbf16, #tpu.memory_space<vmem>>, vector<1x512x256xbf16>
      %31 = vector.shape_cast %30 : vector<1x512x256xbf16> to vector<512x256xbf16>
      %32 = vector.shape_cast %28 : vector<512x256xbf16> to vector<1x512x256xbf16>
      tpu.vector_store %arg9[%29, %c0_12, %c0_13], %32 {strides = array<i32>} : memref<1x512x256xbf16, #tpu.memory_space<vmem>>, vector<1x512x256xbf16>,
      %c0_14 = arith.constant 0 : index
      %c0_15 = arith.constant 0 : index
      %33 = vector.load %arg11[%c0_14, %c0_15] : memref<2x256xf32, #tpu.memory_space<vmem>>, vector<1x256xf32>
      %cst_16 = arith.constant dense<0.000000e+00> : vector<256xf32>
      %34 = vector.multi_reduction <add>, %27, %cst_16 [0] : vector<512x256xf32> to vector<256xf32>
      %35 = vector.shape_cast %34 : vector<256xf32> to vector<1x256xf32>
      %36 = arith.addf %33, %35 : vector<1x256xf32>
      %c0_17 = arith.constant 0 : index
      %c0_18 = arith.constant 0 : index
      %37 = vector.load %arg11[%c0_17, %c0_18] : memref<2x256xf32, #tpu.memory_space<vmem>>, vector<1x256xf32>
      tpu.vector_store %arg11[%c0_17, %c0_18], %36 {strides = array<i32>} : memref<2x256xf32, #tpu.memory_space<vmem>>, vector<1x256xf32>,
      %c1_19 = arith.constant 1 : index
      %c0_20 = arith.constant 0 : index
      %38 = vector.load %arg11[%c1_19, %c0_20] : memref<2x256xf32, #tpu.memory_space<vmem>>, vector<1x256xf32>
      %39 = arith.mulf %27, %27 : vector<512x256xf32>
      %cst_21 = arith.constant dense<0.000000e+00> : vector<256xf32>
      %40 = vector.multi_reduction <add>, %39, %cst_21 [0] : vector<512x256xf32> to vector<256xf32>
      %41 = vector.shape_cast %40 : vector<256xf32> to vector<1x256xf32>
      %42 = arith.addf %38, %41 : vector<1x256xf32>
      %c1_22 = arith.constant 1 : index
      %c0_23 = arith.constant 0 : index
      %43 = vector.load %arg11[%c1_22, %c0_23] : memref<2x256xf32, #tpu.memory_space<vmem>>, vector<1x256xf32>
      tpu.vector_store %arg11[%c1_22, %c0_23], %42 {strides = array<i32>} : memref<2x256xf32, #tpu.memory_space<vmem>>, vector<1x256xf32>,
    } else {
    }
    %c2_i32 = arith.constant 2 : i32
    %6 = arith.cmpi eq, %arg0, %c2_i32 : i32
    %7 = arith.extui %6 : i1 to i32
    %c0_i32_2 = arith.constant 0 : i32
    %8 = arith.cmpi ne, %7, %c0_i32_2 : i32
    scf.if %8 {
      %c0_i32_3 = arith.constant 0 : i32
      %9 = arith.cmpi eq, %arg1, %c0_i32_3 : i32
      %10 = arith.extui %9 : i1 to i32
      %c0_i32_4 = arith.constant 0 : i32
      %11 = arith.cmpi ne, %10, %c0_i32_4 : i32
      scf.if %11 {
        %c0_11 = arith.constant 0 : index
        %c0_12 = arith.constant 0 : index
        %25 = vector.load %arg11[%c0_11, %c0_12] : memref<2x256xf32, #tpu.memory_space<vmem>>, vector<2x256xf32>
        %c0_13 = arith.constant 0 : index
        %c0_14 = arith.constant 0 : index
        %26 = vector.load %arg6[%c0_13, %c0_14] : memref<2x256xf32, #tpu.memory_space<vmem>>, vector<2x256xf32>
        %27 = vector.extract_strided_slice %25 {offsets = [0, 0], sizes = [1, 256], strides = [1, 1]} : vector<2x256xf32> to vector<1x256xf32>
        %cst_15 = arith.constant 0.001953125 : f32
        %28 = vector.broadcast %cst_15 : f32 to vector<1x256xf32>
        %29 = arith.mulf %27, %28 : vector<1x256xf32>
        %30 = vector.extract_strided_slice %25 {offsets = [1, 0], sizes = [1, 256], strides = [1, 1]} : vector<2x256xf32> to vector<1x256xf32>
        %cst_16 = arith.constant 0.001953125 : f32
        %31 = vector.broadcast %cst_16 : f32 to vector<1x256xf32>
        %32 = arith.mulf %30, %31 : vector<1x256xf32>
        %33 = arith.mulf %29, %29 : vector<1x256xf32>
        %34 = arith.subf %32, %33 : vector<1x256xf32>
        %35 = vector.extract_strided_slice %26 {offsets = [0, 0], sizes = [1, 256], strides = [1, 1]} : vector<2x256xf32> to vector<1x256xf32>
        %cst_17 = arith.constant 9.99999974E-6 : f32
        %36 = vector.broadcast %cst_17 : f32 to vector<1x256xf32>
        %37 = arith.addf %34, %36 : vector<1x256xf32>
        %38 = math.rsqrt %37 : vector<1x256xf32>
        %39 = arith.mulf %35, %38 : vector<1x256xf32>
        %c0_18 = arith.constant 0 : index
        %c0_19 = arith.constant 0 : index
        %40 = vector.load %arg13[%c0_18, %c0_19] : memref<2x256xf32, #tpu.memory_space<vmem>>, vector<1x256xf32>
        tpu.vector_store %arg13[%c0_18, %c0_19], %39 {strides = array<i32>} : memref<2x256xf32, #tpu.memory_space<vmem>>, vector<1x256xf32>,
        %41 = vector.extract_strided_slice %26 {offsets = [1, 0], sizes = [1, 256], strides = [1, 1]} : vector<2x256xf32> to vector<1x256xf32>
        %42 = arith.mulf %29, %39 : vector<1x256xf32>
        %43 = arith.subf %41, %42 : vector<1x256xf32>
        %c1_20 = arith.constant 1 : index
        %c0_21 = arith.constant 0 : index
        %44 = vector.load %arg13[%c1_20, %c0_21] : memref<2x256xf32, #tpu.memory_space<vmem>>, vector<1x256xf32>
        tpu.vector_store %arg13[%c1_20, %c0_21], %43 {strides = array<i32>} : memref<2x256xf32, #tpu.memory_space<vmem>>, vector<1x256xf32>,
      } else {
      }
      %12 = arith.index_cast %arg1 : i32 to index
      %c0 = arith.constant 0 : index
      %c0_5 = arith.constant 0 : index
      %13 = vector.load %arg9[%12, %c0, %c0_5] : memref<1x512x256xbf16, #tpu.memory_space<vmem>>, vector<1x512x256xbf16>
      %14 = vector.shape_cast %13 : vector<1x512x256xbf16> to vector<512x256xbf16>
      %15 = arith.extf %14 : vector<512x256xbf16> to vector<512x256xf32>
      %c0_6 = arith.constant 0 : index
      %c0_7 = arith.constant 0 : index
      %16 = vector.load %arg13[%c0_6, %c0_7] : memref<2x256xf32, #tpu.memory_space<vmem>>, vector<1x256xf32>
      %17 = vector.broadcast %16 : vector<1x256xf32> to vector<512x256xf32>
      %18 = arith.mulf %15, %17 : vector<512x256xf32>
      %c1 = arith.constant 1 : index
      %c0_8 = arith.constant 0 : index
      %19 = vector.load %arg13[%c1, %c0_8] : memref<2x256xf32, #tpu.memory_space<vmem>>, vector<1x256xf32>
      %20 = vector.broadcast %19 : vector<1x256xf32> to vector<512x256xf32>
      %21 = arith.addf %18, %20 : vector<512x256xf32>
      %cst = arith.constant 0.000000e+00 : f32
      %22 = vector.broadcast %cst : f32 to vector<512x256xf32>
      %23 = arith.maximumf %21, %22 : vector<512x256xf32>
      %c0_9 = arith.constant 0 : index
      %c0_10 = arith.constant 0 : index
      %24 = vector.load %arg7[%c0_9, %c0_10] : memref<512x256xf32, #tpu.memory_space<vmem>>, vector<512x256xf32>
      tpu.vector_store %arg7[%c0_9, %c0_10], %23 {strides = array<i32>} : memref<512x256xf32, #tpu.memory_space<vmem>>, vector<512x256xf32>,
    } else {
    }
    return
  }
  func.func @transform_0(%arg0: i32, %arg1: i32) -> (i32, i32) {
    %c0_i32 = arith.constant 0 : i32
    %0 = arith.cmpi eq, %arg0, %c0_i32 : i32
    %c0_i32_0 = arith.constant 0 : i32
    %1 = arith.select %0, %arg1, %c0_i32_0 : i32
    %c0_i32_1 = arith.constant 0 : i32
    %c0_i32_2 = arith.constant 0 : i32
    return %1, %c0_i32_1 : i32, i32
  }
  func.func @transform_1(%arg0: i32, %arg1: i32) -> (i32, i32) {
    %c0_i32 = arith.constant 0 : i32
    %c0_i32_0 = arith.constant 0 : i32
    %c0_i32_1 = arith.constant 0 : i32
    return %c0_i32, %c0_i32_0 : i32, i32
  }
  func.func @transform_2(%arg0: i32, %arg1: i32) -> (i32, i32) {
    %c0_i32 = arith.constant 0 : i32
    %c0_i32_0 = arith.constant 0 : i32
    %c0_i32_1 = arith.constant 0 : i32
    return %c0_i32, %c0_i32_0 : i32, i32
  }
  func.func @transform_3(%arg0: i32, %arg1: i32) -> (i32, i32) {
    %c0_i32 = arith.constant 0 : i32
    %c0_i32_0 = arith.constant 0 : i32
    %c0_i32_1 = arith.constant 0 : i32
    return %c0_i32, %c0_i32_0 : i32, i32
  }
  func.func @transform_4(%arg0: i32, %arg1: i32) -> (i32, i32) {
    %c0_i32 = arith.constant 0 : i32
    %c0_i32_0 = arith.constant 0 : i32
    %c0_i32_1 = arith.constant 0 : i32
    return %c0_i32, %c0_i32_0 : i32, i32
  }
  func.func @transform_5(%arg0: i32, %arg1: i32) -> (i32, i32) {
    %c2_i32 = arith.constant 2 : i32
    %0 = arith.cmpi eq, %arg0, %c2_i32 : i32
    %c0_i32 = arith.constant 0 : i32
    %1 = arith.select %0, %arg1, %c0_i32 : i32
    %c0_i32_0 = arith.constant 0 : i32
    %c0_i32_1 = arith.constant 0 : i32
    return %1, %c0_i32_0 : i32, i32
  }
}

</mosaic_0001>

<bundles_post_ra>
// kernel: mlp2_forward.1
= control target key start
LH: loop header
LB: loop body
LE: loop exit
PB: predicated region body
PF: predicated region fallthrough
CT: control target
= control target key end

     0   :  { %10 = vsyncpa [#allocation9], 0  ;;  %s6896_s0 = inlined_call_operand.hbm [shape: f32[512,128], index: 0, kind: input, shape index: {}]   ;;  %s6897_s1 = inlined_call_operand.hbm [shape: f32[128,256], index: 1, kind: input, shape index: {}]   ;;  %s6898_s2 = inlined_call_operand.vmem [shape: f32[2,256], index: 2, kind: input, shape index: {}]   ;;  %s6899_s3 = inlined_call_operand.hbm [shape: f32[256,256], index: 3, kind: input, shape index: {}]   ;;  %s6900_s4 = inlined_call_operand.vmem [shape: f32[2,256], index: 4, kind: input, shape index: {}]   ;;  %s6901_s5 = inlined_call_operand.hbm [shape: f32[512,256], index: 5, kind: output, shape index: {}]  }
   0x1   :  { %12 = vsyncpa [#allocation9 + $0x1], 0 }
   0x2   :  { %13 = vsyncpa [#allocation12], 0 }
   0x3   :  { %14 = vsyncpa [#allocation10], 0 }
   0x4   :  { %16 = vsyncpa [#allocation10 + $0x1], 0  ;;  %s4396_s18 = smov 0   ;;  %s4398_s19 = smov 0  }
   0x5   :  { %s4400_s20 = smov 0  }
   0x6 LB: > { %s4053_s21 = sadd.s32 4294967295, %s4349_s20   ;;  %s4054_s22 = sadd.s32 4294967294, %s4349_s20   ;;  %s4349_s20 = sphi %s4400_s20, %s22_s20   ;;  %s4345_s19 = sphi %s4398_s19, %s7385_s19   ;;  %s4341_s18 = sphi %s4396_s18, %s7384_s18  }
   0x7   : > { %s34_s23 = sadd.s32 1, %s4345_s19  ;;  %p4055_p0 = scmp.ge.s32.totalorder %s4349_s20, 1 }
   0x8   : > { %p36_p1 = scmp.ge.s32.totalorder %s34_s23, 3  ;;  %p183_p2 = scmp.lt.s32.totalorder %s4349_s20, 4 }
   0x9   : > { %p4418_p3 = scmp.eq.s32.totalorder %s4053_s21, 0  ;;  %s4351_s26 = smov [#allocation11]  }
   0xa   : > { %s7387_s23 = smov (%p36_p1, %s34_s23), 0  ;;  %p4424_p4 = pnand %p4055_p0, %p183_p2 }
   0xb   : > { %s7039_s24 = scalar_select %p4418_p3, 1, 0 }
   0xc   : > { %s7040_s25 = scalar_select %p4424_p4, 1, 0 }
   0xd   : > { %s195_s27 = sshll.u32 %s4351_s26, 4  ;;  %p4137_p5 = pneg %p4424_p4  ;;  %s196_s27 = int_to_ptr.vmem [resolvable:$true] %s195_s27 }
   0xe   : > { %s4352_s29 = smov [#allocation13]   ;;  %s4205_s8 = scalar_lea.hbm %s6897_s1, 4096 }
   0xf   : > { %p4432_p6 = pnand %p4418_p3, %p4137_p5  ;;  %s211_s30 = sshll.u32 %s4352_s29, 4  ;;  %s212_s30 = int_to_ptr.vmem [resolvable:$true] %s211_s30 }
  0x10   : > { %p4206_p8 = scmp.ne.s32.totalorder %s6897_s1, %s4205_s8  ;;  %p4212_p12 = scmp.lt.u32.totalorder %s4205_s8, %s6897_s1 }
  0x11   : > { %p4207_p9 = pneg %p4432_p6 }
  0x13   : > { %p4208_p10 = pnand %p4207_p9, %p4206_p8 }
  0x15   : > { %p4209_p11 = pneg %p4208_p10 }
  0x17   : > { %p4214_p13 = pnand %p4212_p12, %p4209_p11 }
  0x19   : > { %4217 = shalt.err (!%p4214_p13)
}
  0x1a   : > { %s4218_s13 = scalar_lea.vmem %s196_s27, 4096  ;;  %p4226_p5 = scmp.lt.s32.totalorder %s196_s27, %s196_s27 }
  0x1b   : > { %p4219_p0 = scmp.ne.s32.totalorder %s196_s27, %s4218_s13  ;;  %p4227_p7 = scmp.lt.s32.totalorder %s4218_s13, %s4218_s13 }
  0x1d   : > { %p4221_p1 = pnand %p4219_p0, %p4207_p9  ;;  %p4228_p3 = por %p4227_p7, %p4226_p5 }
  0x1f   : > { %p4222_p2 = pneg %p4221_p1 }
  0x21   : > { %p4229_p4 = pnand %p4228_p3, %p4222_p2 }
  0x23   : > { %4232 = shalt.err (!%p4229_p4)
}
  0x24   : > { %s4353_s14 = smov 256   ;;  %s4354_s15 = smov 16  }
  0x25   : > { %4140 = dma.hbm_to_vmem [thread:$0]  (!%p4432_p6), %s6897_s1, 4096, %s196_s27, [#allocation12], %s4353_s14, %s4353_s14, %s4354_s15  }
  0x26   : > { %s4233_s6 = scalar_lea.hbm %s6899_s3, 8192 }
  0x27   : > { %p4234_p3 = scmp.ne.s32.totalorder %s6899_s3, %s4233_s6  ;;  %p4240_p10 = scmp.lt.u32.totalorder %s4233_s6, %s6899_s3 }
  0x29   : > { %p4236_p4 = pnand %p4234_p3, %p4207_p9 }
  0x2b   : > { %p4237_p7 = pneg %p4236_p4 }
  0x2d   : > { %p4242_p11 = pnand %p4240_p10, %p4237_p7 }
  0x2f   : > { %4245 = shalt.err (!%p4242_p11)
}
  0x30   : > { %s4246_s27 = scalar_lea.vmem %s212_s30, 8192  ;;  %p4254_p1 = scmp.lt.s32.totalorder %s212_s30, %s212_s30 }
  0x31   : > { %p4247_p12 = scmp.ne.s32.totalorder %s212_s30, %s4246_s27  ;;  %p4255_p2 = scmp.lt.s32.totalorder %s4246_s27, %s4246_s27 }
  0x33   : > { %p4249_p13 = pnand %p4247_p12, %p4207_p9  ;;  %p4256_p5 = por %p4255_p2, %p4254_p1 }
  0x35   : > { %p4250_p0 = pneg %p4249_p13 }
  0x37   : > { %p4257_p8 = pnand %p4256_p5, %p4250_p0 }
  0x39   : > { %4260 = shalt.err (!%p4257_p8)
}
  0x3a   : > { %4143 = dma.hbm_to_vmem [thread:$0]  (!%p4432_p6), %s6899_s3, 8192, %s212_s30, [#allocation12], %s4353_s14, %s4353_s14, %s4354_s15  }
  0x3b   : > { %p7042_p3 = scmp.lt.s32.totalorder %s4349_s20, 3  ;;  %p7043_p4 = scmp.eq.s32.totalorder %s4349_s20, 0 }
  0x3c   : > { %s4355_s16 = smov [#allocation8]   ;;  %s4261_s28 = scalar_lea.hbm %s6896_s0, 8192 }
  0x3d   : > { %p4484_p7 = pnand %p7043_p4, %p7042_p3  ;;  %s241_s17 = sshll.u32 %s4355_s16, 4  ;;  %s242_s17 = int_to_ptr.vmem [resolvable:$true] %s241_s17 }
  0x3e   : > { %p4262_p9 = scmp.ne.s32.totalorder %s6896_s0, %s4261_s28  ;;  %p4268_p11 = scmp.lt.u32.totalorder %s4261_s28, %s6896_s0 }
  0x3f   : > { %p4263_p6 = pneg %p4484_p7 }
  0x41   : > { %p4264_p8 = pnand %p4263_p6, %p4262_p9 }
  0x43   : > { %p4265_p10 = pneg %p4264_p8 }
  0x45   : > { %p4270_p12 = pnand %p4268_p11, %p4265_p10 }
  0x47   : > { %4273 = shalt.err (!%p4270_p12)
}
  0x48   : > { %s4274_s15 = scalar_lea.vmem %s242_s17, 8192  ;;  %s4281_s8 = scalar_lea.vmem %s242_s17, 16384 }
  0x49   : > { %p4275_p13 = scmp.ne.s32.totalorder %s242_s17, %s4274_s15  ;;  %p4282_p2 = scmp.lt.s32.totalorder %s242_s17, %s242_s17 }
  0x4a   : > { %p4283_p5 = scmp.lt.s32.totalorder %s4281_s8, %s4274_s15 }
  0x4b   : > { %p4277_p0 = pnand %p4275_p13, %p4263_p6 }
  0x4c   : > { %p4284_p3 = por %p4283_p5, %p4282_p2 }
  0x4d   : > { %p4278_p1 = pneg %p4277_p0 }
  0x4f   : > { %p4285_p4 = pnand %p4284_p3, %p4278_p1 }
  0x51   : > { %4288 = shalt.err (!%p4285_p4)
}
  0x52   : > { %s4356_s9 = smov 128   ;;  %s4357_s10 = smov 8  }
  0x53   : > { %4147 = dma.hbm_to_vmem [thread:$0]  (!%p4484_p7), %s6896_s0, 8192, %s242_s17, [#allocation9], %s4356_s9, %s4356_s9, %s4357_s10  }
  0x54   : > { %p7045_p9 = scmp.ne.s32.totalorder %s7040_s25, 0 }
  0x55   : > { %p7046_p6 = scmp.ne.s32.totalorder (!%p7045_p9), %s7039_s24, 0 }
  0x56   : > { %253 = sbr.rel (%p7045_p9) target bundleno = 1274 (0x4fa), region = 40 }
  0x5d   : > { %4328 = dma.done.wait (%p7046_p6), [#allocation9], 8192  }
  0x5e   : > { %4330 = vsyncadd (%p7046_p6), [#allocation9], 4294959104 }
  0x5f   : > { %4332 = dma.done.wait (%p7046_p6), [#allocation12], 12288  }
  0x60   : > { %4334 = vsyncadd (%p7046_p6), [#allocation12], 4294955008  ;;  %p4064_p8 = scmp.ne.s32.totalorder %s4341_s18, 0 }
  0x62   : > { %304 = sbr.rel (%p4064_p8) target bundleno = 564 (0x234), region = 56 }
  0x69   : > { %v408_v0 = vld [vmem:[#allocation11 + $0x8] sm:$0xff]  ;;  %v410_v1 = vld [vmem:[#allocation11 + $0x18] sm:$0xff]  ;;  %v407_v2 = vld [vmem:[#allocation11] sm:$0xff]  ;;  %v4358_v7 = vmov 0  }
  0x6a   : > { %v440_v3 = vpack.c.bf16 %v410_v1, %v408_v0  ;;  %v409_v4 = vld [vmem:[#allocation11 + $0x10] sm:$0xff]  ;;  %v412_v5 = vld [vmem:[#allocation11 + $0x28] sm:$0xff]  ;;  %v414_v6 = vld [vmem:[#allocation11 + $0x38] sm:$0xff]  ;;  %487 = vmatprep.mubr.bf16.mxu0 %v4358_v7  ;;  %647 = vmatprep.mubr.bf16.mxu1 %v4358_v7 }
  0x6b   : > { %v439_v8 = vpack.c.bf16 %v409_v4, %v407_v2  ;;  %v442_v9 = vpack.c.bf16 %v414_v6, %v412_v5  ;;  %v411_v10 = vld [vmem:[#allocation11 + $0x20] sm:$0xff]  ;;  %v413_v11 = vld [vmem:[#allocation11 + $0x30] sm:$0xff]  ;;  %v416_v12 = vld [vmem:[#allocation11 + $0x48] sm:$0xff] }
  0x6c   : > { %455 = vmatprep.subr.bf16.mxu0 %v440_v3  ;;  %v418_v13 = vld [vmem:[#allocation11 + $0x58] sm:$0xff]  ;;  %4073 = vmatprep.subr.bf16.mxu1 %v440_v3  ;;  %v441_v14 = vpack.c.bf16 %v413_v11, %v411_v10  ;;  %v415_v16 = vld [vmem:[#allocation11 + $0x40] sm:$0xff]  ;;  %v417_v17 = vld [vmem:[#allocation11 + $0x50] sm:$0xff] }
  0x6d   : > { %456 = vmatpush1.bf16.msra.mxu0 %v439_v8  ;;  %4081 = vmatpush1.bf16.msra.mxu1 %v439_v8  ;;  %v444_v15 = vpack.c.bf16 %v418_v13, %v416_v12  ;;  %v420_v18 = vld [vmem:[#allocation11 + $0x68] sm:$0xff]  ;;  %v422_v19 = vld [vmem:[#allocation11 + $0x78] sm:$0xff]  ;;  %v443_v20 = vpack.c.bf16 %v417_v17, %v415_v16  ;;  %v419_v22 = vld [vmem:[#allocation11 + $0x60] sm:$0xff] }
  0x6e   : > { %457 = vmatprep.subr.bf16.mxu0 %v442_v9  ;;  %4074 = vmatprep.subr.bf16.mxu1 %v442_v9  ;;  %v446_v21 = vpack.c.bf16 %v422_v19, %v420_v18  ;;  %v421_v23 = vld [vmem:[#allocation11 + $0x70] sm:$0xff]  ;;  %v424_v24 = vld [vmem:[#allocation11 + $0x88] sm:$0xff]  ;;  %v426_v25 = vld [vmem:[#allocation11 + $0x98] sm:$0xff] }
  0x6f   : > { %v445_v26 = vpack.c.bf16 %v421_v23, %v419_v22  ;;  %v448_v27 = vpack.c.bf16 %v426_v25, %v424_v24  ;;  %v423_v28 = vld [vmem:[#allocation11 + $0x80] sm:$0xff]  ;;  %v425_v29 = vld [vmem:[#allocation11 + $0x90] sm:$0xff]  ;;  %v428_v30 = vld [vmem:[#allocation11 + $0xa8] sm:$0xff] }
  0x70   : > { %v430_v31 = vld [vmem:[#allocation11 + $0xb8] sm:$0xff]  ;;  %v447_v32 = vpack.c.bf16 %v425_v29, %v423_v28  ;;  %v427_v34 = vld [vmem:[#allocation11 + $0xa0] sm:$0xff]  ;;  %v429_v35 = vld [vmem:[#allocation11 + $0xb0] sm:$0xff] }
  0x71   : > { %458 = vmatpush1.bf16.msra.mxu0 %v441_v14  ;;  %4082 = vmatpush1.bf16.msra.mxu1 %v441_v14  ;;  %v450_v33 = vpack.c.bf16 %v430_v31, %v428_v30  ;;  %v432_v36 = vld [vmem:[#allocation11 + $0xc8] sm:$0xff]  ;;  %v434_v37 = vld [vmem:[#allocation11 + $0xd8] sm:$0xff]  ;;  %v449_v38 = vpack.c.bf16 %v429_v35, %v427_v34  ;;  %v431_v40 = vld [vmem:[#allocation11 + $0xc0] sm:$0xff] }
  0x72   : > { %459 = vmatprep.subr.bf16.mxu0 %v444_v15  ;;  %4075 = vmatprep.subr.bf16.mxu1 %v444_v15  ;;  %v452_v39 = vpack.c.bf16 %v434_v37, %v432_v36  ;;  %v433_v41 = vld [vmem:[#allocation11 + $0xd0] sm:$0xff]  ;;  %v436_v42 = vld [vmem:[#allocation11 + $0xe8] sm:$0xff]  ;;  %v438_v43 = vld [vmem:[#allocation11 + $0xf8] sm:$0xff] }
  0x73   : > { %v451_v44 = vpack.c.bf16 %v433_v41, %v431_v40  ;;  %v454_v45 = vpack.c.bf16 %v438_v43, %v436_v42  ;;  %v435_v46 = vld [vmem:[#allocation11 + $0xe0] sm:$0xff]  ;;  %v437_v47 = vld [vmem:[#allocation11 + $0xf0] sm:$0xff]  ;;  %v312_v50 = vld [vmem:[#allocation8 + $0x8] sm:$0xff] }
  0x74   : > { %v311_v48 = vld [vmem:[#allocation8] sm:$0xff]  ;;  %v453_v49 = vpack.c.bf16 %v437_v47, %v435_v46  ;;  %v344_v52 = vld [vmem:[#allocation8 + $0x108] sm:$0xff]  ;;  %v313_v55 = vld [vmem:[#allocation8 + $0x10] sm:$0xff] }
  0x75   : > { %460 = vmatpush1.bf16.msra.mxu0 %v443_v20  ;;  %4083 = vmatpush1.bf16.msra.mxu1 %v443_v20  ;;  %v343_v51 = vld [vmem:[#allocation8 + $0x100] sm:$0xff]  ;;  %v375_v53 = vpack.c.bf16 %v312_v50, %v311_v48  ;;  %v314_v56 = vld [vmem:[#allocation8 + $0x18] sm:$0xff]  ;;  %v345_v57 = vld [vmem:[#allocation8 + $0x110] sm:$0xff] }
  0x76   : > { %461 = vmatprep.subr.bf16.mxu0 %v446_v21  ;;  %4076 = vmatprep.subr.bf16.mxu1 %v446_v21  ;;  %v391_v54 = vpack.c.bf16 %v344_v52, %v343_v51  ;;  %v346_v58 = vld [vmem:[#allocation8 + $0x118] sm:$0xff]  ;;  %v376_v59 = vpack.c.bf16 %v314_v56, %v313_v55  ;;  %v315_v61 = vld [vmem:[#allocation8 + $0x20] sm:$0xff]  ;;  %v316_v62 = vld [vmem:[#allocation8 + $0x28] sm:$0xff] }
  0x77   : > { %v392_v60 = vpack.c.bf16 %v346_v58, %v345_v57  ;;  %v347_v63 = vld [vmem:[#allocation8 + $0x120] sm:$0xff]  ;;  %v348_v0 = vld [vmem:[#allocation8 + $0x128] sm:$0xff]  ;;  %v377_v1 = vpack.c.bf16 %v316_v62, %v315_v61  ;;  %v317_v3 = vld [vmem:[#allocation8 + $0x30] sm:$0xff] }
  0x78   : > { %v393_v2 = vpack.c.bf16 %v348_v0, %v347_v63  ;;  %v318_v4 = vld [vmem:[#allocation8 + $0x38] sm:$0xff]  ;;  %v349_v5 = vld [vmem:[#allocation8 + $0x130] sm:$0xff]  ;;  %v319_v10 = vld [vmem:[#allocation8 + $0x40] sm:$0xff] }
  0x79   : > { %462 = vmatpush1.bf16.msra.mxu0 %v445_v26  ;;  %4084 = vmatpush1.bf16.msra.mxu1 %v445_v26  ;;  %v350_v6 = vld [vmem:[#allocation8 + $0x138] sm:$0xff]  ;;  %v378_v8 = vpack.c.bf16 %v318_v4, %v317_v3  ;;  %v320_v11 = vld [vmem:[#allocation8 + $0x48] sm:$0xff]  ;;  %v351_v12 = vld [vmem:[#allocation8 + $0x140] sm:$0xff] }
  0x7a   : > { %463 = vmatprep.subr.bf16.mxu0 %v448_v27  ;;  %4077 = vmatprep.subr.bf16.mxu1 %v448_v27  ;;  %v394_v9 = vpack.c.bf16 %v350_v6, %v349_v5  ;;  %v352_v13 = vld [vmem:[#allocation8 + $0x148] sm:$0xff]  ;;  %v379_v14 = vpack.c.bf16 %v320_v11, %v319_v10  ;;  %v321_v16 = vld [vmem:[#allocation8 + $0x50] sm:$0xff]  ;;  %v322_v17 = vld [vmem:[#allocation8 + $0x58] sm:$0xff] }
  0x7b   : > { %v395_v15 = vpack.c.bf16 %v352_v13, %v351_v12  ;;  %v353_v18 = vld [vmem:[#allocation8 + $0x150] sm:$0xff]  ;;  %v354_v19 = vld [vmem:[#allocation8 + $0x158] sm:$0xff]  ;;  %v380_v20 = vpack.c.bf16 %v322_v17, %v321_v16  ;;  %v323_v22 = vld [vmem:[#allocation8 + $0x60] sm:$0xff] }
  0x7c   : > { %v396_v21 = vpack.c.bf16 %v354_v19, %v353_v18  ;;  %v324_v23 = vld [vmem:[#allocation8 + $0x68] sm:$0xff]  ;;  %v355_v24 = vld [vmem:[#allocation8 + $0x160] sm:$0xff]  ;;  %v325_v28 = vld [vmem:[#allocation8 + $0x70] sm:$0xff] }
  0x7d   : > { %464 = vmatpush1.bf16.msra.mxu0 %v447_v32  ;;  %4085 = vmatpush1.bf16.msra.mxu1 %v447_v32  ;;  %v356_v25 = vld [vmem:[#allocation8 + $0x168] sm:$0xff]  ;;  %v381_v26 = vpack.c.bf16 %v324_v23, %v323_v22  ;;  %v326_v29 = vld [vmem:[#allocation8 + $0x78] sm:$0xff]  ;;  %v357_v30 = vld [vmem:[#allocation8 + $0x170] sm:$0xff] }
  0x7e   : > { %465 = vmatprep.subr.bf16.mxu0 %v450_v33  ;;  %4078 = vmatprep.subr.bf16.mxu1 %v450_v33  ;;  %v397_v27 = vpack.c.bf16 %v356_v25, %v355_v24  ;;  %v358_v31 = vld [vmem:[#allocation8 + $0x178] sm:$0xff]  ;;  %v382_v32 = vpack.c.bf16 %v326_v29, %v325_v28  ;;  %v327_v34 = vld [vmem:[#allocation8 + $0x80] sm:$0xff]  ;;  %v328_v35 = vld [vmem:[#allocation8 + $0x88] sm:$0xff] }
  0x7f   : > { %v398_v33 = vpack.c.bf16 %v358_v31, %v357_v30  ;;  %v359_v36 = vld [vmem:[#allocation8 + $0x180] sm:$0xff]  ;;  %v360_v37 = vld [vmem:[#allocation8 + $0x188] sm:$0xff]  ;;  %v329_v40 = vld [vmem:[#allocation8 + $0x90] sm:$0xff] }
  0x80   : > { %v330_v41 = vld [vmem:[#allocation8 + $0x98] sm:$0xff]  ;;  %v361_v42 = vld [vmem:[#allocation8 + $0x190] sm:$0xff]  ;;  %v331_v46 = vld [vmem:[#allocation8 + $0xa0] sm:$0xff] }
  0x81   : > { %466 = vmatpush1.bf16.msra.mxu0 %v449_v38  ;;  %4086 = vmatpush1.bf16.msra.mxu1 %v449_v38  ;;  %v383_v38 = vpack.c.bf16 %v328_v35, %v327_v34  ;;  %v362_v43 = vld [vmem:[#allocation8 + $0x198] sm:$0xff]  ;;  %v332_v47 = vld [vmem:[#allocation8 + $0xa8] sm:$0xff]  ;;  %v363_v48 = vld [vmem:[#allocation8 + $0x1a0] sm:$0xff] }
  0x82   : > { %467 = vmatprep.subr.bf16.mxu0 %v452_v39  ;;  %4079 = vmatprep.subr.bf16.mxu1 %v452_v39  ;;  %v399_v39 = vpack.c.bf16 %v360_v37, %v359_v36  ;;  %v385_v50 = vpack.c.bf16 %v332_v47, %v331_v46  ;;  %v333_v52 = vld [vmem:[#allocation8 + $0xb0] sm:$0xff]  ;;  %v366_v55 = vld [vmem:[#allocation8 + $0x1b8] sm:$0xff]  ;;  %v335_v58 = vld [vmem:[#allocation8 + $0xc0] sm:$0xff] }
  0x83   : > { %v368_v61 = vld [vmem:[#allocation8 + $0x1c8] sm:$0xff]  ;;  %v337_v0 = vld [vmem:[#allocation8 + $0xd0] sm:$0xff]  ;;  %v370_v3 = vld [vmem:[#allocation8 + $0x1d8] sm:$0xff] }
  0x84   : > { %v339_v6 = vld [vmem:[#allocation8 + $0xe0] sm:$0xff]  ;;  %v372_v10 = vld [vmem:[#allocation8 + $0x1e8] sm:$0xff]  ;;  %v341_v13 = vld [vmem:[#allocation8 + $0xf0] sm:$0xff] }
  0x85   : > { %468 = vmatpush1.bf16.msra.mxu0 %v451_v44  ;;  %4087 = vmatpush1.bf16.msra.mxu1 %v451_v44  ;;  %v384_v44 = vpack.c.bf16 %v330_v41, %v329_v40  ;;  %v374_v16 = vld [vmem:[#allocation8 + $0x1f8] sm:$0xff] }
  0x86   : > { %469 = vmatprep.subr.bf16.mxu0 %v454_v45  ;;  %4080 = vmatprep.subr.bf16.mxu1 %v454_v45  ;;  %v400_v45 = vpack.c.bf16 %v362_v43, %v361_v42 }
  0x89   : > { %470 = vmatpush1.bf16.msra.mxu0 %v453_v49  ;;  %4088 = vmatpush1.bf16.msra.mxu1 %v453_v49  ;;  %v364_v49 = vld [vmem:[#allocation8 + $0x1a8] sm:$0xff] }
  0x8a   : > { %v401_v51 = vpack.c.bf16 %v364_v49, %v363_v48 }
  0x8c   : > { %488 = vmatmul.mubr.bf16.vlgmr.msra.gmra.mrb[0].mxu0 %v375_v53  ;;  %648 = vmatmul.mubr.bf16.vlgmr.msra.gmra.mrb[0].mxu1 %v391_v54  ;;  %v334_v53 = vld [vmem:[#allocation8 + $0xb8] sm:$0xff]  ;;  %v365_v54 = vld [vmem:[#allocation8 + $0x1b0] sm:$0xff] }
  0x8d   : > { %497 = vmatprep.mubr.bf16.mxu0 %v4358_v7  ;;  %657 = vmatprep.mubr.bf16.mxu1 %v4358_v7  ;;  %v386_v56 = vpack.c.bf16 %v334_v53, %v333_v52  ;;  %v402_v57 = vpack.c.bf16 %v366_v55, %v365_v54 }
  0x94   : > { %498 = vmatmul.mubr.bf16.gmra.mrb[4].mxu0 %v376_v59  ;;  %658 = vmatmul.mubr.bf16.gmra.mrb[4].mxu1 %v392_v60  ;;  %v336_v59 = vld [vmem:[#allocation8 + $0xc8] sm:$0xff]  ;;  %v367_v60 = vld [vmem:[#allocation8 + $0x1c0] sm:$0xff] }
  0x95   : > { %507 = vmatprep.mubr.bf16.mxu0 %v4358_v7  ;;  %667 = vmatprep.mubr.bf16.mxu1 %v4358_v7  ;;  %v387_v62 = vpack.c.bf16 %v336_v59, %v335_v58  ;;  %v403_v63 = vpack.c.bf16 %v368_v61, %v367_v60 }
  0x9c   : > { %508 = vmatmul.mubr.bf16.gmra.mrb[8].mxu0 %v377_v1  ;;  %668 = vmatmul.mubr.bf16.gmra.mrb[8].mxu1 %v393_v2  ;;  %v338_v1 = vld [vmem:[#allocation8 + $0xd8] sm:$0xff]  ;;  %v369_v2 = vld [vmem:[#allocation8 + $0x1d0] sm:$0xff] }
  0x9d   : > { %517 = vmatprep.mubr.bf16.mxu0 %v4358_v7  ;;  %677 = vmatprep.mubr.bf16.mxu1 %v4358_v7  ;;  %v388_v4 = vpack.c.bf16 %v338_v1, %v337_v0  ;;  %v404_v5 = vpack.c.bf16 %v370_v3, %v369_v2 }
  0xa4   : > { %518 = vmatmul.mubr.bf16.gmra.mrb[12].mxu0 %v378_v8  ;;  %678 = vmatmul.mubr.bf16.gmra.mrb[12].mxu1 %v394_v9  ;;  %v340_v8 = vld [vmem:[#allocation8 + $0xe8] sm:$0xff]  ;;  %v371_v9 = vld [vmem:[#allocation8 + $0x1e0] sm:$0xff] }
  0xa5   : > { %527 = vmatprep.mubr.bf16.mxu0 %v4358_v7  ;;  %687 = vmatprep.mubr.bf16.mxu1 %v4358_v7  ;;  %v389_v11 = vpack.c.bf16 %v340_v8, %v339_v6  ;;  %v405_v12 = vpack.c.bf16 %v372_v10, %v371_v9 }
  0xac   : > { %528 = vmatmul.mubr.bf16.gmra.mrb[16].mxu0 %v379_v14  ;;  %688 = vmatmul.mubr.bf16.gmra.mrb[16].mxu1 %v395_v15  ;;  %v342_v14 = vld [vmem:[#allocation8 + $0xf8] sm:$0xff]  ;;  %v373_v15 = vld [vmem:[#allocation8 + $0x1f0] sm:$0xff] }
  0xad   : > { %537 = vmatprep.mubr.bf16.mxu0 %v4358_v7  ;;  %697 = vmatprep.mubr.bf16.mxu1 %v4358_v7  ;;  %v390_v17 = vpack.c.bf16 %v342_v14, %v341_v13  ;;  %v406_v18 = vpack.c.bf16 %v374_v16, %v373_v15 }
  0xb4   : > { %538 = vmatmul.mubr.bf16.gmra.mrb[20].mxu0 %v380_v20  ;;  %698 = vmatmul.mubr.bf16.gmra.mrb[20].mxu1 %v396_v21 }
  0xb5   : > { %547 = vmatprep.mubr.bf16.mxu0 %v4358_v7  ;;  %707 = vmatprep.mubr.bf16.mxu1 %v4358_v7 }
  0xbc   : > { %548 = vmatmul.mubr.bf16.gmra.mrb[24].mxu0 %v381_v26  ;;  %708 = vmatmul.mubr.bf16.gmra.mrb[24].mxu1 %v397_v27 }
  0xbd   : > { %557 = vmatprep.mubr.bf16.mxu0 %v4358_v7  ;;  %717 = vmatprep.mubr.bf16.mxu1 %v4358_v7 }
  0xc4   : > { %558 = vmatmul.mubr.bf16.gmra.mrb[28].mxu0 %v382_v32  ;;  %718 = vmatmul.mubr.bf16.gmra.mrb[28].mxu1 %v398_v33 }
  0xc5   : > { %567 = vmatprep.mubr.bf16.mxu0 %v4358_v7  ;;  %727 = vmatprep.mubr.bf16.mxu1 %v4358_v7 }
  0xcc   : > { %568 = vmatmul.mubr.bf16.gmra.mrb[32].mxu0 %v383_v38  ;;  %728 = vmatmul.mubr.bf16.gmra.mrb[32].mxu1 %v399_v39 }
  0xcd   : > { %577 = vmatprep.mubr.bf16.mxu0 %v4358_v7  ;;  %737 = vmatprep.mubr.bf16.mxu1 %v4358_v7 }
  0xd4   : > { %578 = vmatmul.mubr.bf16.gmra.mrb[36].mxu0 %v384_v44  ;;  %738 = vmatmul.mubr.bf16.gmra.mrb[36].mxu1 %v400_v45 }
  0xd5   : > { %587 = vmatprep.mubr.bf16.mxu0 %v4358_v7  ;;  %747 = vmatprep.mubr.bf16.mxu1 %v4358_v7 }
  0xdc   : > { %588 = vmatmul.mubr.bf16.gmra.mrb[40].mxu0 %v385_v50  ;;  %748 = vmatmul.mubr.bf16.gmra.mrb[40].mxu1 %v401_v51 }
  0xdd   : > { %597 = vmatprep.mubr.bf16.mxu0 %v4358_v7  ;;  %757 = vmatprep.mubr.bf16.mxu1 %v4358_v7 }
  0xe4   : > { %598 = vmatmul.mubr.bf16.gmra.mrb[44].mxu0 %v386_v56  ;;  %758 = vmatmul.mubr.bf16.gmra.mrb[44].mxu1 %v402_v57 }
  0xe5   : > { %607 = vmatprep.mubr.bf16.mxu0 %v4358_v7  ;;  %767 = vmatprep.mubr.bf16.mxu1 %v4358_v7 }
  0xec   : > { %608 = vmatmul.mubr.bf16.gmra.mrb[48].mxu0 %v387_v62  ;;  %768 = vmatmul.mubr.bf16.gmra.mrb[48].mxu1 %v403_v63 }
  0xed   : > { %617 = vmatprep.mubr.bf16.mxu0 %v4358_v7  ;;  %777 = vmatprep.mubr.bf16.mxu1 %v4358_v7 }
  0xf4   : > { %618 = vmatmul.mubr.bf16.gmra.mrb[52].mxu0 %v388_v4  ;;  %778 = vmatmul.mubr.bf16.gmra.mrb[52].mxu1 %v404_v5 }
  0xf5   : > { %627 = vmatprep.mubr.bf16.mxu0 %v4358_v7  ;;  %787 = vmatprep.mubr.bf16.mxu1 %v4358_v7 }
  0xfc   : > { %628 = vmatmul.mubr.bf16.gmra.mrb[56].mxu0 %v389_v11  ;;  %788 = vmatmul.mubr.bf16.gmra.mrb[56].mxu1 %v405_v12 }
  0xfd   : > { %637 = vmatprep.mubr.bf16.mxu0 %v4358_v7  ;;  %797 = vmatprep.mubr.bf16.mxu1 %v4358_v7 }
 0x104   : > { %638 = vmatmul.mubr.bf16.gmra.mrb[60].mxu0 %v390_v17  ;;  %798 = vmatmul.mubr.bf16.gmra.mrb[60].mxu1 %v406_v18 }
 0x15f   : > { %v489_v19 = vpop.f32.mrb[0].mxu0  ;;  %v4547_v20 = vpop.f32.mrb[0].mxu1 }
 0x160   : > { %v491_v21 = vpop.f32.mrb[1].mxu0  ;;  %v4549_v22 = vpop.f32.mrb[1].mxu1  ;;  %v1104_v23 = vmul.f32 %v489_v19, %v489_v19 }
 0x161   : > { %v493_v24 = vpop.f32.mrb[2].mxu0  ;;  %v4551_v25 = vpop.f32.mrb[2].mxu1  ;;  %v1105_v31 = vmul.f32 %v491_v21, %v491_v21 }
 0x162   : > { %v808_v26 = vpack.c.bf16 %v493_v24, %v489_v19  ;;  %v940_v27 = vadd.f32 %v493_v24, %v489_v19  ;;  %v1106_v28 = vmul.f32 %v493_v24, %v493_v24  ;;  %v495_v7 = vpop.f32.mrb[3].mxu0  ;;  %v840_v29 = vpack.c.bf16 %v4551_v25, %v4547_v20  ;;  %v4555_v30 = vpop.f32.mrb[3].mxu1 }
 0x163   : > { %v809_v32 = vpack.c.bf16 %v495_v7, %v491_v21  ;;  %v1009_v33 = vadd.f32 %v495_v7, %v491_v21  ;;  %v1107_v34 = vmul.f32 %v495_v7, %v495_v7  ;;  %v841_v36 = vpack.c.bf16 %v4555_v30, %v4549_v22 }
 0x164   : > { %875 = vst [vmem:[#allocation2] sm:$0xff] %v808_v26  ;;  %v1232_v35 = vadd.f32 %v1106_v28, %v1104_v23  ;;  %907 = vst [vmem:[#allocation2 + $0x100] sm:$0xff] %v840_v29 }
 0x165   : > { %876 = vst [vmem:[#allocation2 + $0x8] sm:$0xff] %v809_v32  ;;  %v1301_v37 = vadd.f32 %v1107_v34, %v1105_v31  ;;  %908 = vst [vmem:[#allocation2 + $0x108] sm:$0xff] %v841_v36 }
 0x167   : > { %v499_v38 = vpop.f32.mrb[4].mxu0  ;;  %v4559_v39 = vpop.f32.mrb[4].mxu1 }
 0x168   : > { %v941_v40 = vadd.f32 %v940_v27, %v499_v38  ;;  %v1108_v41 = vmul.f32 %v499_v38, %v499_v38  ;;  %v501_v42 = vpop.f32.mrb[5].mxu0  ;;  %v4561_v43 = vpop.f32.mrb[5].mxu1 }
 0x169   : > { %v1010_v44 = vadd.f32 %v1009_v33, %v501_v42  ;;  %v1109_v45 = vmul.f32 %v501_v42, %v501_v42  ;;  %v503_v46 = vpop.f32.mrb[6].mxu0  ;;  %v4563_v47 = vpop.f32.mrb[6].mxu1 }
 0x16a   : > { %v1233_v48 = vadd.f32 %v1232_v35, %v1108_v41  ;;  %v810_v49 = vpack.c.bf16 %v503_v46, %v499_v38  ;;  %v942_v50 = vadd.f32 %v941_v40, %v503_v46  ;;  %v1110_v51 = vmul.f32 %v503_v46, %v503_v46  ;;  %v505_v52 = vpop.f32.mrb[7].mxu0  ;;  %v4565_v53 = vpop.f32.mrb[7].mxu1 }
 0x16b   : > { %v1302_v54 = vadd.f32 %v1301_v37, %v1109_v45  ;;  %v811_v55 = vpack.c.bf16 %v505_v52, %v501_v42  ;;  %v1011_v56 = vadd.f32 %v1010_v44, %v505_v52  ;;  %v1111_v57 = vmul.f32 %v505_v52, %v505_v52 }
 0x16c   : > { %877 = vst [vmem:[#allocation2 + $0x10] sm:$0xff] %v810_v49  ;;  %v1234_v58 = vadd.f32 %v1233_v48, %v1110_v51  ;;  %v842_v59 = vpack.c.bf16 %v4563_v47, %v4559_v39  ;;  %v843_v60 = vpack.c.bf16 %v4565_v53, %v4561_v43 }
 0x16d   : > { %878 = vst [vmem:[#allocation2 + $0x18] sm:$0xff] %v811_v55  ;;  %v1303_v61 = vadd.f32 %v1302_v54, %v1111_v57 }
 0x16e   : > { %909 = vst [vmem:[#allocation2 + $0x110] sm:$0xff] %v842_v59  ;;  %910 = vst [vmem:[#allocation2 + $0x118] sm:$0xff] %v843_v60 }
 0x16f   : > { %v509_v62 = vpop.f32.mrb[8].mxu0  ;;  %v4571_v63 = vpop.f32.mrb[8].mxu1 }
 0x170   : > { %v943_v0 = vadd.f32 %v942_v50, %v509_v62  ;;  %v1112_v1 = vmul.f32 %v509_v62, %v509_v62  ;;  %v511_v2 = vpop.f32.mrb[9].mxu0  ;;  %v4573_v3 = vpop.f32.mrb[9].mxu1 }
 0x171   : > { %v1012_v4 = vadd.f32 %v1011_v56, %v511_v2  ;;  %v1113_v5 = vmul.f32 %v511_v2, %v511_v2  ;;  %v513_v6 = vpop.f32.mrb[10].mxu0  ;;  %v4575_v8 = vpop.f32.mrb[10].mxu1 }
 0x172   : > { %v1235_v9 = vadd.f32 %v1234_v58, %v1112_v1  ;;  %v812_v10 = vpack.c.bf16 %v513_v6, %v509_v62  ;;  %v944_v11 = vadd.f32 %v943_v0, %v513_v6  ;;  %v1114_v12 = vmul.f32 %v513_v6, %v513_v6  ;;  %v515_v13 = vpop.f32.mrb[11].mxu0  ;;  %v4577_v14 = vpop.f32.mrb[11].mxu1 }
 0x173   : > { %v1304_v15 = vadd.f32 %v1303_v61, %v1113_v5  ;;  %v813_v16 = vpack.c.bf16 %v515_v13, %v511_v2  ;;  %v1013_v17 = vadd.f32 %v1012_v4, %v515_v13  ;;  %v1115_v18 = vmul.f32 %v515_v13, %v515_v13 }
 0x174   : > { %879 = vst [vmem:[#allocation2 + $0x20] sm:$0xff] %v812_v10  ;;  %v1236_v19 = vadd.f32 %v1235_v9, %v1114_v12  ;;  %v844_v21 = vpack.c.bf16 %v4575_v8, %v4571_v63  ;;  %v845_v23 = vpack.c.bf16 %v4577_v14, %v4573_v3 }
 0x175   : > { %880 = vst [vmem:[#allocation2 + $0x28] sm:$0xff] %v813_v16  ;;  %v1305_v24 = vadd.f32 %v1304_v15, %v1115_v18 }
 0x176   : > { %911 = vst [vmem:[#allocation2 + $0x120] sm:$0xff] %v844_v21  ;;  %912 = vst [vmem:[#allocation2 + $0x128] sm:$0xff] %v845_v23 }
 0x177   : > { %v519_v26 = vpop.f32.mrb[12].mxu0  ;;  %v4583_v27 = vpop.f32.mrb[12].mxu1 }
 0x178   : > { %v945_v28 = vadd.f32 %v944_v11, %v519_v26  ;;  %v1116_v7 = vmul.f32 %v519_v26, %v519_v26  ;;  %v521_v29 = vpop.f32.mrb[13].mxu0  ;;  %v4585_v31 = vpop.f32.mrb[13].mxu1 }
 0x179   : > { %v1014_v32 = vadd.f32 %v1013_v17, %v521_v29  ;;  %v1117_v33 = vmul.f32 %v521_v29, %v521_v29  ;;  %v523_v34 = vpop.f32.mrb[14].mxu0  ;;  %v4587_v35 = vpop.f32.mrb[14].mxu1 }
 0x17a   : > { %v1237_v36 = vadd.f32 %v1236_v19, %v1116_v7  ;;  %v814_v37 = vpack.c.bf16 %v523_v34, %v519_v26  ;;  %v946_v38 = vadd.f32 %v945_v28, %v523_v34  ;;  %v1118_v40 = vmul.f32 %v523_v34, %v523_v34  ;;  %v525_v41 = vpop.f32.mrb[15].mxu0  ;;  %v4589_v42 = vpop.f32.mrb[15].mxu1 }
 0x17b   : > { %v1306_v44 = vadd.f32 %v1305_v24, %v1117_v33  ;;  %v815_v45 = vpack.c.bf16 %v525_v41, %v521_v29  ;;  %v1015_v46 = vadd.f32 %v1014_v32, %v525_v41  ;;  %v1119_v48 = vmul.f32 %v525_v41, %v525_v41 }
 0x17c   : > { %881 = vst [vmem:[#allocation2 + $0x30] sm:$0xff] %v814_v37  ;;  %v1238_v49 = vadd.f32 %v1237_v36, %v1118_v40  ;;  %v846_v50 = vpack.c.bf16 %v4587_v35, %v4583_v27  ;;  %v847_v51 = vpack.c.bf16 %v4589_v42, %v4585_v31 }
 0x17d   : > { %882 = vst [vmem:[#allocation2 + $0x38] sm:$0xff] %v815_v45  ;;  %v1307_v52 = vadd.f32 %v1306_v44, %v1119_v48 }
 0x17e   : > { %913 = vst [vmem:[#allocation2 + $0x130] sm:$0xff] %v846_v50  ;;  %914 = vst [vmem:[#allocation2 + $0x138] sm:$0xff] %v847_v51 }
 0x17f   : > { %v529_v54 = vpop.f32.mrb[16].mxu0  ;;  %v4595_v55 = vpop.f32.mrb[16].mxu1 }
 0x180   : > { %v947_v56 = vadd.f32 %v946_v38, %v529_v54  ;;  %v1120_v57 = vmul.f32 %v529_v54, %v529_v54  ;;  %v531_v58 = vpop.f32.mrb[17].mxu0  ;;  %v4597_v59 = vpop.f32.mrb[17].mxu1 }
 0x181   : > { %v1016_v60 = vadd.f32 %v1015_v46, %v531_v58  ;;  %v1121_v61 = vmul.f32 %v531_v58, %v531_v58  ;;  %v533_v62 = vpop.f32.mrb[18].mxu0  ;;  %v4599_v0 = vpop.f32.mrb[18].mxu1 }
 0x182   : > { %v1239_v1 = vadd.f32 %v1238_v49, %v1120_v57  ;;  %v816_v2 = vpack.c.bf16 %v533_v62, %v529_v54  ;;  %v948_v4 = vadd.f32 %v947_v56, %v533_v62  ;;  %v1122_v5 = vmul.f32 %v533_v62, %v533_v62  ;;  %v535_v6 = vpop.f32.mrb[19].mxu0  ;;  %v4601_v9 = vpop.f32.mrb[19].mxu1 }
 0x183   : > { %v1308_v10 = vadd.f32 %v1307_v52, %v1121_v61  ;;  %v817_v11 = vpack.c.bf16 %v535_v6, %v531_v58  ;;  %v1017_v12 = vadd.f32 %v1016_v60, %v535_v6  ;;  %v1123_v13 = vmul.f32 %v535_v6, %v535_v6 }
 0x184   : > { %883 = vst [vmem:[#allocation2 + $0x40] sm:$0xff] %v816_v2  ;;  %v1240_v15 = vadd.f32 %v1239_v1, %v1122_v5  ;;  %v848_v16 = vpack.c.bf16 %v4599_v0, %v4595_v55  ;;  %v849_v17 = vpack.c.bf16 %v4601_v9, %v4597_v59 }
 0x185   : > { %884 = vst [vmem:[#allocation2 + $0x48] sm:$0xff] %v817_v11  ;;  %v1309_v18 = vadd.f32 %v1308_v10, %v1123_v13 }
 0x186   : > { %915 = vst [vmem:[#allocation2 + $0x140] sm:$0xff] %v848_v16  ;;  %916 = vst [vmem:[#allocation2 + $0x148] sm:$0xff] %v849_v17 }
 0x187   : > { %v539_v19 = vpop.f32.mrb[20].mxu0  ;;  %v4607_v21 = vpop.f32.mrb[20].mxu1 }
 0x188   : > { %v949_v23 = vadd.f32 %v948_v4, %v539_v19  ;;  %v1124_v24 = vmul.f32 %v539_v19, %v539_v19  ;;  %v541_v26 = vpop.f32.mrb[21].mxu0  ;;  %v4609_v28 = vpop.f32.mrb[21].mxu1 }
 0x189   : > { %v1018_v7 = vadd.f32 %v1017_v12, %v541_v26  ;;  %v1125_v29 = vmul.f32 %v541_v26, %v541_v26  ;;  %v543_v32 = vpop.f32.mrb[22].mxu0  ;;  %v4611_v33 = vpop.f32.mrb[22].mxu1 }
 0x18a   : > { %v1241_v34 = vadd.f32 %v1240_v15, %v1124_v24  ;;  %v818_v36 = vpack.c.bf16 %v543_v32, %v539_v19  ;;  %v950_v37 = vadd.f32 %v949_v23, %v543_v32  ;;  %v1126_v38 = vmul.f32 %v543_v32, %v543_v32  ;;  %v545_v40 = vpop.f32.mrb[23].mxu0  ;;  %v4613_v41 = vpop.f32.mrb[23].mxu1 }
 0x18b   : > { %v1310_v44 = vadd.f32 %v1309_v18, %v1125_v29  ;;  %v819_v45 = vpack.c.bf16 %v545_v40, %v541_v26  ;;  %v1019_v46 = vadd.f32 %v1018_v7, %v545_v40  ;;  %v1127_v48 = vmul.f32 %v545_v40, %v545_v40 }
 0x18c   : > { %885 = vst [vmem:[#allocation2 + $0x50] sm:$0xff] %v818_v36  ;;  %v1242_v49 = vadd.f32 %v1241_v34, %v1126_v38  ;;  %v850_v50 = vpack.c.bf16 %v4611_v33, %v4607_v21  ;;  %v851_v51 = vpack.c.bf16 %v4613_v41, %v4609_v28 }
 0x18d   : > { %886 = vst [vmem:[#allocation2 + $0x58] sm:$0xff] %v819_v45  ;;  %v1311_v52 = vadd.f32 %v1310_v44, %v1127_v48 }
 0x18e   : > { %917 = vst [vmem:[#allocation2 + $0x150] sm:$0xff] %v850_v50  ;;  %918 = vst [vmem:[#allocation2 + $0x158] sm:$0xff] %v851_v51 }
 0x18f   : > { %v549_v54 = vpop.f32.mrb[24].mxu0  ;;  %v4619_v56 = vpop.f32.mrb[24].mxu1 }
 0x190   : > { %v951_v57 = vadd.f32 %v950_v37, %v549_v54  ;;  %v1128_v58 = vmul.f32 %v549_v54, %v549_v54  ;;  %v551_v60 = vpop.f32.mrb[25].mxu0  ;;  %v4621_v61 = vpop.f32.mrb[25].mxu1 }
 0x191   : > { %v1020_v62 = vadd.f32 %v1019_v46, %v551_v60  ;;  %v1129_v1 = vmul.f32 %v551_v60, %v551_v60  ;;  %v553_v2 = vpop.f32.mrb[26].mxu0  ;;  %v4623_v4 = vpop.f32.mrb[26].mxu1 }
 0x192   : > { %v1243_v5 = vadd.f32 %v1242_v49, %v1128_v58  ;;  %v820_v6 = vpack.c.bf16 %v553_v2, %v549_v54  ;;  %v952_v10 = vadd.f32 %v951_v57, %v553_v2  ;;  %v1130_v11 = vmul.f32 %v553_v2, %v553_v2  ;;  %v555_v12 = vpop.f32.mrb[27].mxu0  ;;  %v4625_v13 = vpop.f32.mrb[27].mxu1 }
 0x193   : > { %v1312_v15 = vadd.f32 %v1311_v52, %v1129_v1  ;;  %v821_v16 = vpack.c.bf16 %v555_v12, %v551_v60  ;;  %v1021_v17 = vadd.f32 %v1020_v62, %v555_v12  ;;  %v1131_v18 = vmul.f32 %v555_v12, %v555_v12 }
 0x194   : > { %887 = vst [vmem:[#allocation2 + $0x60] sm:$0xff] %v820_v6  ;;  %v1244_v19 = vadd.f32 %v1243_v5, %v1130_v11  ;;  %v852_v23 = vpack.c.bf16 %v4623_v4, %v4619_v56  ;;  %v853_v24 = vpack.c.bf16 %v4625_v13, %v4621_v61 }
 0x195   : > { %888 = vst [vmem:[#allocation2 + $0x68] sm:$0xff] %v821_v16  ;;  %v1313_v26 = vadd.f32 %v1312_v15, %v1131_v18 }
 0x196   : > { %919 = vst [vmem:[#allocation2 + $0x160] sm:$0xff] %v852_v23  ;;  %920 = vst [vmem:[#allocation2 + $0x168] sm:$0xff] %v853_v24 }
 0x197   : > { %v559_v7 = vpop.f32.mrb[28].mxu0  ;;  %v4631_v29 = vpop.f32.mrb[28].mxu1 }
 0x198   : > { %v953_v32 = vadd.f32 %v952_v10, %v559_v7  ;;  %v1132_v34 = vmul.f32 %v559_v7, %v559_v7  ;;  %v561_v36 = vpop.f32.mrb[29].mxu0  ;;  %v4633_v37 = vpop.f32.mrb[29].mxu1 }
 0x199   : > { %v1022_v38 = vadd.f32 %v1021_v17, %v561_v36  ;;  %v1133_v40 = vmul.f32 %v561_v36, %v561_v36  ;;  %v563_v44 = vpop.f32.mrb[30].mxu0  ;;  %v4635_v45 = vpop.f32.mrb[30].mxu1 }
 0x19a   : > { %v1245_v46 = vadd.f32 %v1244_v19, %v1132_v34  ;;  %v822_v48 = vpack.c.bf16 %v563_v44, %v559_v7  ;;  %v954_v49 = vadd.f32 %v953_v32, %v563_v44  ;;  %v1134_v50 = vmul.f32 %v563_v44, %v563_v44  ;;  %v565_v51 = vpop.f32.mrb[31].mxu0  ;;  %v4637_v52 = vpop.f32.mrb[31].mxu1 }
 0x19b   : > { %v1314_v54 = vadd.f32 %v1313_v26, %v1133_v40  ;;  %v823_v57 = vpack.c.bf16 %v565_v51, %v561_v36  ;;  %v1023_v58 = vadd.f32 %v1022_v38, %v565_v51  ;;  %v1135_v60 = vmul.f32 %v565_v51, %v565_v51 }
 0x19c   : > { %889 = vst [vmem:[#allocation2 + $0x70] sm:$0xff] %v822_v48  ;;  %v1246_v62 = vadd.f32 %v1245_v46, %v1134_v50  ;;  %v854_v1 = vpack.c.bf16 %v4635_v45, %v4631_v29  ;;  %v855_v2 = vpack.c.bf16 %v4637_v52, %v4633_v37 }
 0x19d   : > { %890 = vst [vmem:[#allocation2 + $0x78] sm:$0xff] %v823_v57  ;;  %v1315_v5 = vadd.f32 %v1314_v54, %v1135_v60 }
 0x19e   : > { %921 = vst [vmem:[#allocation2 + $0x170] sm:$0xff] %v854_v1  ;;  %922 = vst [vmem:[#allocation2 + $0x178] sm:$0xff] %v855_v2 }
 0x19f   : > { %v569_v6 = vpop.f32.mrb[32].mxu0  ;;  %v4643_v10 = vpop.f32.mrb[32].mxu1 }
 0x1a0   : > { %v955_v11 = vadd.f32 %v954_v49, %v569_v6  ;;  %v1136_v12 = vmul.f32 %v569_v6, %v569_v6  ;;  %v571_v15 = vpop.f32.mrb[33].mxu0  ;;  %v4645_v16 = vpop.f32.mrb[33].mxu1 }
 0x1a1   : > { %v1024_v17 = vadd.f32 %v1023_v58, %v571_v15  ;;  %v1137_v18 = vmul.f32 %v571_v15, %v571_v15  ;;  %v573_v19 = vpop.f32.mrb[34].mxu0  ;;  %v4647_v23 = vpop.f32.mrb[34].mxu1  ;;  %v4359_v58 = vmov 0.0  }
 0x1a2   : > { %v1247_v24 = vadd.f32 %v1246_v62, %v1136_v12  ;;  %v824_v26 = vpack.c.bf16 %v573_v19, %v569_v6  ;;  %v956_v7 = vadd.f32 %v955_v11, %v573_v19  ;;  %v1138_v32 = vmul.f32 %v573_v19, %v573_v19  ;;  %v575_v34 = vpop.f32.mrb[35].mxu0  ;;  %v4649_v36 = vpop.f32.mrb[35].mxu1  ;;  %309 = vst [vmem:[#allocation4] sm:$0xf] %v4359_v58 }
 0x1a3   : > { %v1316_v38 = vadd.f32 %v1315_v5, %v1137_v18  ;;  %v825_v40 = vpack.c.bf16 %v575_v34, %v571_v15  ;;  %v1025_v44 = vadd.f32 %v1024_v17, %v575_v34  ;;  %v1139_v46 = vmul.f32 %v575_v34, %v575_v34  ;;  %310 = vst [vmem:[#allocation5] sm:$0xf] %v4359_v58 }
 0x1a4   : > { %891 = vst [vmem:[#allocation2 + $0x80] sm:$0xff] %v824_v26  ;;  %v1248_v48 = vadd.f32 %v1247_v24, %v1138_v32  ;;  %v856_v49 = vpack.c.bf16 %v4647_v23, %v4643_v10  ;;  %v857_v50 = vpack.c.bf16 %v4649_v36, %v4645_v16 }
 0x1a5   : > { %892 = vst [vmem:[#allocation2 + $0x88] sm:$0xff] %v825_v40  ;;  %v1317_v51 = vadd.f32 %v1316_v38, %v1139_v46 }
 0x1a6   : > { %923 = vst [vmem:[#allocation2 + $0x180] sm:$0xff] %v856_v49  ;;  %924 = vst [vmem:[#allocation2 + $0x188] sm:$0xff] %v857_v50 }
 0x1a7   : > { %v579_v54 = vpop.f32.mrb[36].mxu0  ;;  %v4655_v57 = vpop.f32.mrb[36].mxu1 }
 0x1a8   : > { %v957_v60 = vadd.f32 %v956_v7, %v579_v54  ;;  %v1140_v62 = vmul.f32 %v579_v54, %v579_v54  ;;  %v581_v1 = vpop.f32.mrb[37].mxu0  ;;  %v4657_v2 = vpop.f32.mrb[37].mxu1 }
 0x1a9   : > { %v1026_v5 = vadd.f32 %v1025_v44, %v581_v1  ;;  %v1141_v6 = vmul.f32 %v581_v1, %v581_v1  ;;  %v583_v11 = vpop.f32.mrb[38].mxu0  ;;  %v4659_v12 = vpop.f32.mrb[38].mxu1 }
 0x1aa   : > { %v1249_v15 = vadd.f32 %v1248_v48, %v1140_v62  ;;  %v826_v17 = vpack.c.bf16 %v583_v11, %v579_v54  ;;  %v958_v18 = vadd.f32 %v957_v60, %v583_v11  ;;  %v1142_v19 = vmul.f32 %v583_v11, %v583_v11  ;;  %v585_v24 = vpop.f32.mrb[39].mxu0  ;;  %v4661_v26 = vpop.f32.mrb[39].mxu1 }
 0x1ab   : > { %7047 = vst [vmem:[#allocation18_spill] sm:$0xff] %v4661_v26  ;;  %v1318_v32 = vadd.f32 %v1317_v51, %v1141_v6  ;;  %v827_v34 = vpack.c.bf16 %v585_v24, %v581_v1  ;;  %v1027_v38 = vadd.f32 %v1026_v5, %v585_v24  ;;  %v1143_v7 = vmul.f32 %v585_v24, %v585_v24 }
 0x1ac   : > { %893 = vst [vmem:[#allocation2 + $0x90] sm:$0xff] %v826_v17  ;;  %v1250_v40 = vadd.f32 %v1249_v15, %v1142_v19  ;;  %v858_v44 = vpack.c.bf16 %v4659_v12, %v4655_v57  ;;  %v859_v46 = vpack.c.bf16 %v4661_v26, %v4657_v2 }
 0x1ad   : > { %894 = vst [vmem:[#allocation2 + $0x98] sm:$0xff] %v827_v34  ;;  %v1319_v48 = vadd.f32 %v1318_v32, %v1143_v7 }
 0x1ae   : > { %925 = vst [vmem:[#allocation2 + $0x190] sm:$0xff] %v858_v44  ;;  %926 = vst [vmem:[#allocation2 + $0x198] sm:$0xff] %v859_v46 }
 0x1af   : > { %v589_v49 = vpop.f32.mrb[40].mxu0  ;;  %v4667_v50 = vpop.f32.mrb[40].mxu1 }
 0x1b0   : > { %7048 = vst [vmem:[#allocation19_spill] sm:$0xff] %v4667_v50  ;;  %v959_v54 = vadd.f32 %v958_v18, %v589_v49  ;;  %v1144_v51 = vmul.f32 %v589_v49, %v589_v49  ;;  %v591_v58 = vpop.f32.mrb[41].mxu0  ;;  %v4669_v60 = vpop.f32.mrb[41].mxu1 }
 0x1b1   : > { %7049 = vst [vmem:[#allocation20_spill] sm:$0xff] %v4669_v60  ;;  %v1028_v62 = vadd.f32 %v1027_v38, %v591_v58  ;;  %v1145_v1 = vmul.f32 %v591_v58, %v591_v58  ;;  %v593_v5 = vpop.f32.mrb[42].mxu0  ;;  %v4671_v6 = vpop.f32.mrb[42].mxu1 }
 0x1b2   : > { %7050 = vst [vmem:[#allocation21_spill] sm:$0xff] %v4671_v6  ;;  %v1251_v11 = vadd.f32 %v1250_v40, %v1144_v51  ;;  %v828_v15 = vpack.c.bf16 %v593_v5, %v589_v49  ;;  %v960_v17 = vadd.f32 %v959_v54, %v593_v5  ;;  %v1146_v19 = vmul.f32 %v593_v5, %v593_v5  ;;  %v595_v24 = vpop.f32.mrb[43].mxu0  ;;  %v4673_v32 = vpop.f32.mrb[43].mxu1 }
 0x1b3   : > { %7051 = vst [vmem:[#allocation22_spill] sm:$0xff] %v4673_v32  ;;  %v1320_v34 = vadd.f32 %v1319_v48, %v1145_v1  ;;  %v829_v7 = vpack.c.bf16 %v595_v24, %v591_v58  ;;  %v1029_v44 = vadd.f32 %v1028_v62, %v595_v24  ;;  %v1147_v18 = vmul.f32 %v595_v24, %v595_v24 }
 0x1b4   : > { %895 = vst [vmem:[#allocation2 + $0xa0] sm:$0xff] %v828_v15  ;;  %v1252_v46 = vadd.f32 %v1251_v11, %v1146_v19  ;;  %v860_v38 = vpack.c.bf16 %v4671_v6, %v4667_v50  ;;  %v861_v26 = vpack.c.bf16 %v4673_v32, %v4669_v60 }
 0x1b5   : > { %896 = vst [vmem:[#allocation2 + $0xa8] sm:$0xff] %v829_v7  ;;  %v1321_v40 = vadd.f32 %v1320_v34, %v1147_v18 }
 0x1b6   : > { %927 = vst [vmem:[#allocation2 + $0x1a0] sm:$0xff] %v860_v38  ;;  %928 = vst [vmem:[#allocation2 + $0x1a8] sm:$0xff] %v861_v26 }
 0x1b7   : > { %v599_v49 = vpop.f32.mrb[44].mxu0  ;;  %v4679_v54 = vpop.f32.mrb[44].mxu1 }
 0x1b8   : > { %7052 = vst [vmem:[#allocation23_spill] sm:$0xff] %v4679_v54  ;;  %v961_v51 = vadd.f32 %v960_v17, %v599_v49  ;;  %v1148_v48 = vmul.f32 %v599_v49, %v599_v49  ;;  %v601_v58 = vpop.f32.mrb[45].mxu0  ;;  %v4681_v62 = vpop.f32.mrb[45].mxu1 }
 0x1b9   : > { %7053 = vst [vmem:[#allocation24_spill] sm:$0xff] %v4681_v62  ;;  %v1030_v1 = vadd.f32 %v1029_v44, %v601_v58  ;;  %v1149_v5 = vmul.f32 %v601_v58, %v601_v58  ;;  %v603_v11 = vpop.f32.mrb[46].mxu0  ;;  %v4683_v15 = vpop.f32.mrb[46].mxu1 }
 0x1ba   : > { %7054 = vst [vmem:[#allocation25_spill] sm:$0xff] %v4683_v15  ;;  %v1253_v19 = vadd.f32 %v1252_v46, %v1148_v48  ;;  %v830_v24 = vpack.c.bf16 %v603_v11, %v599_v49  ;;  %v962_v32 = vadd.f32 %v961_v51, %v603_v11  ;;  %v1150_v7 = vmul.f32 %v603_v11, %v603_v11  ;;  %v605_v34 = vpop.f32.mrb[47].mxu0  ;;  %v4685_v18 = vpop.f32.mrb[47].mxu1 }
 0x1bb   : > { %7055 = vst [vmem:[#allocation26_spill] sm:$0xff] %v4685_v18  ;;  %v1322_v26 = vadd.f32 %v1321_v40, %v1149_v5  ;;  %v831_v38 = vpack.c.bf16 %v605_v34, %v601_v58  ;;  %v1031_v6 = vadd.f32 %v1030_v1, %v605_v34  ;;  %v1151_v17 = vmul.f32 %v605_v34, %v605_v34 }
 0x1bc   : > { %897 = vst [vmem:[#allocation2 + $0xb0] sm:$0xff] %v830_v24  ;;  %v1254_v60 = vadd.f32 %v1253_v19, %v1150_v7  ;;  %v862_v44 = vpack.c.bf16 %v4683_v15, %v4679_v54  ;;  %v863_v50 = vpack.c.bf16 %v4685_v18, %v4681_v62 }
 0x1bd   : > { %898 = vst [vmem:[#allocation2 + $0xb8] sm:$0xff] %v831_v38  ;;  %v1323_v46 = vadd.f32 %v1322_v26, %v1151_v17 }
 0x1be   : > { %929 = vst [vmem:[#allocation2 + $0x1b0] sm:$0xff] %v862_v44  ;;  %930 = vst [vmem:[#allocation2 + $0x1b8] sm:$0xff] %v863_v50 }
 0x1bf   : > { %v609_v49 = vpop.f32.mrb[48].mxu0  ;;  %v4691_v51 = vpop.f32.mrb[48].mxu1 }
 0x1c0   : > { %7056 = vst [vmem:[#allocation27_spill] sm:$0xff] %v4691_v51  ;;  %v963_v48 = vadd.f32 %v962_v32, %v609_v49  ;;  %v1152_v40 = vmul.f32 %v609_v49, %v609_v49  ;;  %v611_v58 = vpop.f32.mrb[49].mxu0  ;;  %v4693_v1 = vpop.f32.mrb[49].mxu1 }
 0x1c1   : > { %7057 = vst [vmem:[#allocation28_spill] sm:$0xff] %v4693_v1  ;;  %v1032_v5 = vadd.f32 %v1031_v6, %v611_v58  ;;  %v1153_v11 = vmul.f32 %v611_v58, %v611_v58  ;;  %v613_v19 = vpop.f32.mrb[50].mxu0  ;;  %v4695_v24 = vpop.f32.mrb[50].mxu1 }
 0x1c2   : > { %7058 = vst [vmem:[#allocation29_spill] sm:$0xff] %v4695_v24  ;;  %v1255_v7 = vadd.f32 %v1254_v60, %v1152_v40  ;;  %v832_v34 = vpack.c.bf16 %v613_v19, %v609_v49  ;;  %v964_v18 = vadd.f32 %v963_v48, %v613_v19  ;;  %v1154_v38 = vmul.f32 %v613_v19, %v613_v19  ;;  %v615_v26 = vpop.f32.mrb[51].mxu0  ;;  %v4697_v17 = vpop.f32.mrb[51].mxu1 }
 0x1c3   : > { %7059 = vst [vmem:[#allocation30_spill] sm:$0xff] %v4697_v17  ;;  %v1324_v50 = vadd.f32 %v1323_v46, %v1153_v11  ;;  %v833_v44 = vpack.c.bf16 %v615_v26, %v611_v58  ;;  %v1033_v15 = vadd.f32 %v1032_v5, %v615_v26  ;;  %v1155_v32 = vmul.f32 %v615_v26, %v615_v26 }
 0x1c4   : > { %899 = vst [vmem:[#allocation2 + $0xc0] sm:$0xff] %v832_v34  ;;  %v1256_v62 = vadd.f32 %v1255_v7, %v1154_v38  ;;  %v864_v6 = vpack.c.bf16 %v4695_v24, %v4691_v51  ;;  %v865_v54 = vpack.c.bf16 %v4697_v17, %v4693_v1 }
 0x1c5   : > { %900 = vst [vmem:[#allocation2 + $0xc8] sm:$0xff] %v833_v44  ;;  %v1325_v60 = vadd.f32 %v1324_v50, %v1155_v32 }
 0x1c6   : > { %931 = vst [vmem:[#allocation2 + $0x1c0] sm:$0xff] %v864_v6  ;;  %932 = vst [vmem:[#allocation2 + $0x1c8] sm:$0xff] %v865_v54 }
 0x1c7   : > { %v619_v49 = vpop.f32.mrb[52].mxu0  ;;  %v4703_v48 = vpop.f32.mrb[52].mxu1 }
 0x1c8   : > { %7060 = vst [vmem:[#allocation31_spill] sm:$0xff] %v4703_v48  ;;  %v965_v40 = vadd.f32 %v964_v18, %v619_v49  ;;  %v1156_v46 = vmul.f32 %v619_v49, %v619_v49  ;;  %v621_v58 = vpop.f32.mrb[53].mxu0  ;;  %v4705_v5 = vpop.f32.mrb[53].mxu1 }
 0x1c9   : > { %7061 = vst [vmem:[#allocation32_spill] sm:$0xff] %v4705_v5  ;;  %v1034_v11 = vadd.f32 %v1033_v15, %v621_v58  ;;  %v1157_v19 = vmul.f32 %v621_v58, %v621_v58  ;;  %v623_v7 = vpop.f32.mrb[54].mxu0  ;;  %v4707_v34 = vpop.f32.mrb[54].mxu1 }
 0x1ca   : > { %7062 = vst [vmem:[#allocation33_spill] sm:$0xff] %v4707_v34  ;;  %v1257_v38 = vadd.f32 %v1256_v62, %v1156_v46  ;;  %v834_v26 = vpack.c.bf16 %v623_v7, %v619_v49  ;;  %v966_v17 = vadd.f32 %v965_v40, %v623_v7  ;;  %v1158_v44 = vmul.f32 %v623_v7, %v623_v7  ;;  %v625_v50 = vpop.f32.mrb[55].mxu0  ;;  %v4709_v32 = vpop.f32.mrb[55].mxu1 }
 0x1cb   : > { %7063 = vst [vmem:[#allocation34_spill] sm:$0xff] %v4709_v32  ;;  %v1326_v54 = vadd.f32 %v1325_v60, %v1157_v19  ;;  %v835_v6 = vpack.c.bf16 %v625_v50, %v621_v58  ;;  %v1035_v24 = vadd.f32 %v1034_v11, %v625_v50  ;;  %v1159_v18 = vmul.f32 %v625_v50, %v625_v50 }
 0x1cc   : > { %901 = vst [vmem:[#allocation2 + $0xd0] sm:$0xff] %v834_v26  ;;  %v1258_v1 = vadd.f32 %v1257_v38, %v1158_v44  ;;  %v866_v15 = vpack.c.bf16 %v4707_v34, %v4703_v48  ;;  %v867_v51 = vpack.c.bf16 %v4709_v32, %v4705_v5 }
 0x1cd   : > { %902 = vst [vmem:[#allocation2 + $0xd8] sm:$0xff] %v835_v6  ;;  %v1327_v62 = vadd.f32 %v1326_v54, %v1159_v18 }
 0x1ce   : > { %933 = vst [vmem:[#allocation2 + $0x1d0] sm:$0xff] %v866_v15  ;;  %934 = vst [vmem:[#allocation2 + $0x1d8] sm:$0xff] %v867_v51 }
 0x1cf   : > { %v629_v49 = vpop.f32.mrb[56].mxu0  ;;  %v4715_v40 = vpop.f32.mrb[56].mxu1 }
 0x1d0   : > { %7064 = vst [vmem:[#allocation35_spill] sm:$0xff] %v4715_v40  ;;  %v967_v46 = vadd.f32 %v966_v17, %v629_v49  ;;  %v1160_v60 = vmul.f32 %v629_v49, %v629_v49  ;;  %v631_v58 = vpop.f32.mrb[57].mxu0  ;;  %v4717_v11 = vpop.f32.mrb[57].mxu1 }
 0x1d1   : > { %7065 = vst [vmem:[#allocation36_spill] sm:$0xff] %v4717_v11  ;;  %v1036_v19 = vadd.f32 %v1035_v24, %v631_v58  ;;  %v1161_v7 = vmul.f32 %v631_v58, %v631_v58  ;;  %v633_v38 = vpop.f32.mrb[58].mxu0  ;;  %v4719_v26 = vpop.f32.mrb[58].mxu1 }
 0x1d2   : > { %7066 = vst [vmem:[#allocation37_spill] sm:$0xff] %v4719_v26  ;;  %v1259_v44 = vadd.f32 %v1258_v1, %v1160_v60  ;;  %v836_v50 = vpack.c.bf16 %v633_v38, %v629_v49  ;;  %v968_v32 = vadd.f32 %v967_v46, %v633_v38  ;;  %v1162_v6 = vmul.f32 %v633_v38, %v633_v38  ;;  %v635_v54 = vpop.f32.mrb[59].mxu0  ;;  %v4721_v18 = vpop.f32.mrb[59].mxu1 }
 0x1d3   : > { %7067 = vst [vmem:[#allocation38_spill] sm:$0xff] %v4721_v18  ;;  %v1328_v51 = vadd.f32 %v1327_v62, %v1161_v7  ;;  %v837_v15 = vpack.c.bf16 %v635_v54, %v631_v58  ;;  %v1037_v34 = vadd.f32 %v1036_v19, %v635_v54  ;;  %v1163_v17 = vmul.f32 %v635_v54, %v635_v54 }
 0x1d4   : > { %903 = vst [vmem:[#allocation2 + $0xe0] sm:$0xff] %v836_v50  ;;  %v1260_v5 = vadd.f32 %v1259_v44, %v1162_v6  ;;  %v868_v24 = vpack.c.bf16 %v4719_v26, %v4715_v40  ;;  %v869_v48 = vpack.c.bf16 %v4721_v18, %v4717_v11  ;;  %v1168_v11 = vmul.f32 %v4547_v20, %v4547_v20 }
 0x1d5   : > { %904 = vst [vmem:[#allocation2 + $0xe8] sm:$0xff] %v837_v15  ;;  %v1329_v1 = vadd.f32 %v1328_v51, %v1163_v17 }
 0x1d6   : > { %935 = vst [vmem:[#allocation2 + $0x1e0] sm:$0xff] %v868_v24  ;;  %936 = vst [vmem:[#allocation2 + $0x1e8] sm:$0xff] %v869_v48 }
 0x1d7   : > { %v639_v49 = vpop.f32.mrb[60].mxu0  ;;  %v4727_v46 = vpop.f32.mrb[60].mxu1 }
 0x1d8   : > { %v969_v60 = vadd.f32 %v968_v32, %v639_v49  ;;  %v1164_v62 = vmul.f32 %v639_v49, %v639_v49  ;;  %v641_v58 = vpop.f32.mrb[61].mxu0  ;;  %v4729_v19 = vpop.f32.mrb[61].mxu1 }
 0x1d9   : > { %v1038_v7 = vadd.f32 %v1037_v34, %v641_v58  ;;  %v1165_v38 = vmul.f32 %v641_v58, %v641_v58  ;;  %v643_v44 = vpop.f32.mrb[62].mxu0  ;;  %v4731_v50 = vpop.f32.mrb[62].mxu1 }
 0x1da   : > { %v1261_v6 = vadd.f32 %v1260_v5, %v1164_v62  ;;  %v838_v54 = vpack.c.bf16 %v643_v44, %v639_v49  ;;  %v970_v18 = vadd.f32 %v969_v60, %v643_v44  ;;  %v1166_v15 = vmul.f32 %v643_v44, %v643_v44  ;;  %v645_v51 = vpop.f32.mrb[63].mxu0  ;;  %v4733_v17 = vpop.f32.mrb[63].mxu1 }
 0x1db   : > { %v1330_v48 = vadd.f32 %v1329_v1, %v1165_v38  ;;  %v839_v24 = vpack.c.bf16 %v645_v51, %v641_v58  ;;  %v1039_v26 = vadd.f32 %v1038_v7, %v645_v51  ;;  %v1167_v32 = vmul.f32 %v645_v51, %v645_v51 }
 0x1dc   : > { %905 = vst [vmem:[#allocation2 + $0xf0] sm:$0xff] %v838_v54  ;;  %v971_v34 = vadd.f32 %v970_v18, %v4547_v20  ;;  %v1262_v40 = vadd.f32 %v1261_v6, %v1166_v15  ;;  %v870_v5 = vpack.c.bf16 %v4731_v50, %v4727_v46  ;;  %v1169_v49 = vmul.f32 %v4549_v22, %v4549_v22 }
 0x1dd   : > { %906 = vst [vmem:[#allocation2 + $0xf8] sm:$0xff] %v839_v24  ;;  %v1040_v60 = vadd.f32 %v1039_v26, %v4549_v22  ;;  %v1331_v1 = vadd.f32 %v1330_v48, %v1167_v32  ;;  %v871_v62 = vpack.c.bf16 %v4733_v17, %v4729_v19  ;;  %v1170_v58 = vmul.f32 %v4551_v25, %v4551_v25 }
 0x1de   : > { %v972_v7 = vadd.f32 %v971_v34, %v4551_v25  ;;  %v1263_v20 = vadd.f32 %v1262_v40, %v1168_v11  ;;  %937 = vst [vmem:[#allocation2 + $0x1f0] sm:$0xff] %v870_v5  ;;  %v1171_v18 = vmul.f32 %v4555_v30, %v4555_v30  ;;  %v1172_v22 = vmul.f32 %v4559_v39, %v4559_v39 }
 0x1df   : > { %v1041_v38 = vadd.f32 %v1040_v60, %v4555_v30  ;;  %v1332_v44 = vadd.f32 %v1331_v1, %v1169_v49  ;;  %938 = vst [vmem:[#allocation2 + $0x1f8] sm:$0xff] %v871_v62  ;;  %v1173_v54 = vmul.f32 %v4561_v43, %v4561_v43  ;;  %v1174_v11 = vmul.f32 %v4563_v47, %v4563_v47 }
 0x1e0   : > { %v973_v26 = vadd.f32 %v972_v7, %v4559_v39  ;;  %v1264_v6 = vadd.f32 %v1263_v20, %v1170_v58  ;;  %v1175_v51 = vmul.f32 %v4565_v53, %v4565_v53  ;;  %v1176_v39 = vmul.f32 %v4571_v63, %v4571_v63 }
 0x1e1   : > { %v1042_v25 = vadd.f32 %v1041_v38, %v4561_v43  ;;  %v1333_v40 = vadd.f32 %v1332_v44, %v1171_v18  ;;  %v1177_v43 = vmul.f32 %v4573_v3, %v4573_v3 }
 0x1e2   : > { %v974_v15 = vadd.f32 %v973_v26, %v4563_v47  ;;  %v1265_v30 = vadd.f32 %v1264_v6, %v1172_v22  ;;  %v1178_v47 = vmul.f32 %v4575_v8, %v4575_v8 }
 0x1e3   : > { %v1043_v48 = vadd.f32 %v1042_v25, %v4565_v53  ;;  %v1334_v24 = vadd.f32 %v1333_v40, %v1173_v54  ;;  %v1179_v53 = vmul.f32 %v4577_v14, %v4577_v14 }
 0x1e4   : > { %v975_v32 = vadd.f32 %v974_v15, %v4571_v63  ;;  %v1266_v34 = vadd.f32 %v1265_v30, %v1174_v11  ;;  %v1180_v63 = vmul.f32 %v4583_v27, %v4583_v27 }
 0x1e5   : > { %v1044_v5 = vadd.f32 %v1043_v48, %v4573_v3  ;;  %v1335_v49 = vadd.f32 %v1334_v24, %v1175_v51  ;;  %v1181_v3 = vmul.f32 %v4585_v31, %v4585_v31 }
 0x1e6   : > { %v976_v60 = vadd.f32 %v975_v32, %v4575_v8  ;;  %v1267_v1 = vadd.f32 %v1266_v34, %v1176_v39  ;;  %v1182_v8 = vmul.f32 %v4587_v35, %v4587_v35 }
 0x1e7   : > { %v1045_v62 = vadd.f32 %v1044_v5, %v4577_v14  ;;  %v1336_v58 = vadd.f32 %v1335_v49, %v1177_v43  ;;  %v1183_v14 = vmul.f32 %v4589_v42, %v4589_v42 }
 0x1e8   : > { %v977_v7 = vadd.f32 %v976_v60, %v4583_v27  ;;  %v1268_v20 = vadd.f32 %v1267_v1, %v1178_v47  ;;  %v1184_v27 = vmul.f32 %v4595_v55, %v4595_v55 }
 0x1e9   : > { %v1046_v18 = vadd.f32 %v1045_v62, %v4585_v31  ;;  %v1337_v38 = vadd.f32 %v1336_v58, %v1179_v53  ;;  %v1185_v31 = vmul.f32 %v4597_v59, %v4597_v59 }
 0x1ea   : > { %v978_v44 = vadd.f32 %v977_v7, %v4587_v35  ;;  %v1269_v22 = vadd.f32 %v1268_v20, %v1180_v63  ;;  %v1186_v35 = vmul.f32 %v4599_v0, %v4599_v0 }
 0x1eb   : > { %v1047_v26 = vadd.f32 %v1046_v18, %v4589_v42  ;;  %v1338_v6 = vadd.f32 %v1337_v38, %v1181_v3  ;;  %v1187_v42 = vmul.f32 %v4601_v9, %v4601_v9 }
 0x1ec   : > { %v1270_v54 = vadd.f32 %v1269_v22, %v1182_v8  ;;  %v979_v25 = vadd.f32 %v978_v44, %v4595_v55  ;;  %v1188_v55 = vmul.f32 %v4607_v21, %v4607_v21 }
 0x1ed   : > { %v1339_v40 = vadd.f32 %v1338_v6, %v1183_v14  ;;  %v1048_v11 = vadd.f32 %v1047_v26, %v4597_v59  ;;  %v1189_v59 = vmul.f32 %v4609_v28, %v4609_v28  ;;  %v1200_v6 = vmul.f32 %v4643_v10, %v4643_v10 }
 0x1ee   : > { %v980_v15 = vadd.f32 %v979_v25, %v4599_v0  ;;  %v1271_v30 = vadd.f32 %v1270_v54, %v1184_v27  ;;  %v1190_v0 = vmul.f32 %v4611_v33, %v4611_v33  ;;  %v1201_v54 = vmul.f32 %v4645_v16, %v4645_v16 }
 0x1ef   : > { %v1049_v51 = vadd.f32 %v1048_v11, %v4601_v9  ;;  %v1340_v48 = vadd.f32 %v1339_v40, %v1185_v31  ;;  %v1191_v9 = vmul.f32 %v4613_v41, %v4613_v41  ;;  %v1202_v40 = vmul.f32 %v4647_v23, %v4647_v23 }
 0x1f0   : > { %v981_v24 = vadd.f32 %v980_v15, %v4607_v21  ;;  %v1272_v39 = vadd.f32 %v1271_v30, %v1186_v35  ;;  %v1192_v21 = vmul.f32 %v4619_v56, %v4619_v56  ;;  %v1203_v35 = vmul.f32 %v4649_v36, %v4649_v36 }
 0x1f1   : > { %v1050_v32 = vadd.f32 %v1049_v51, %v4609_v28  ;;  %v1341_v34 = vadd.f32 %v1340_v48, %v1187_v42  ;;  %v1193_v28 = vmul.f32 %v4621_v61, %v4621_v61  ;;  %v1204_v30 = vmul.f32 %v4655_v57, %v4655_v57 }
 0x1f2   : > { %v982_v43 = vadd.f32 %v981_v24, %v4611_v33  ;;  %v1273_v5 = vadd.f32 %v1272_v39, %v1188_v55  ;;  %v1194_v33 = vmul.f32 %v4623_v4, %v4623_v4  ;;  %v1205_v51 = vmul.f32 %v4657_v2, %v4657_v2 }
 0x1f3   : > { %v1051_v49 = vadd.f32 %v1050_v32, %v4613_v41  ;;  %v1342_v47 = vadd.f32 %v1341_v34, %v1189_v59  ;;  %v1195_v41 = vmul.f32 %v4625_v13, %v4625_v13  ;;  %v1206_v55 = vmul.f32 %v4659_v12, %v4659_v12 }
 0x1f4   : > { %v983_v60 = vadd.f32 %v982_v43, %v4619_v56  ;;  %v1274_v1 = vadd.f32 %v1273_v5, %v1190_v0  ;;  %v1196_v56 = vmul.f32 %v4631_v29, %v4631_v29 }
 0x1f5   : > { %v1052_v53 = vadd.f32 %v1051_v49, %v4621_v61  ;;  %v1343_v62 = vadd.f32 %v1342_v47, %v1191_v9  ;;  %v1197_v61 = vmul.f32 %v4633_v37, %v4633_v37 }
 0x1f6   : > { %v984_v58 = vadd.f32 %v983_v60, %v4623_v4  ;;  %v1275_v63 = vadd.f32 %v1274_v1, %v1192_v21  ;;  %v1198_v4 = vmul.f32 %v4635_v45, %v4635_v45  ;;  %v7072_v1 = vld [vmem:[#allocation22_spill] sm:$0xff] }
 0x1f7   : > { %v1053_v7 = vadd.f32 %v1052_v53, %v4625_v13  ;;  %v1344_v20 = vadd.f32 %v1343_v62, %v1193_v28  ;;  %v1199_v13 = vmul.f32 %v4637_v52, %v4637_v52  ;;  %v1211_v53 = vmul.f32 %v7072_v1, %v7072_v1 }
 0x1f8   : > { %v985_v3 = vadd.f32 %v984_v58, %v4631_v29  ;;  %v1276_v18 = vadd.f32 %v1275_v63, %v1194_v33  ;;  %v7073_v33 = vld [vmem:[#allocation23_spill] sm:$0xff] }
 0x1f9   : > { %v1054_v38 = vadd.f32 %v1053_v7, %v4633_v37  ;;  %v1345_v8 = vadd.f32 %v1344_v20, %v1195_v41  ;;  %v1212_v63 = vmul.f32 %v7073_v33, %v7073_v33  ;;  %v7074_v7 = vld [vmem:[#allocation24_spill] sm:$0xff] }
 0x1fa   : > { %v986_v44 = vadd.f32 %v985_v3, %v4635_v45  ;;  %v1277_v22 = vadd.f32 %v1276_v18, %v1196_v56  ;;  %v1213_v56 = vmul.f32 %v7074_v7, %v7074_v7  ;;  %v7075_v18 = vld [vmem:[#allocation25_spill] sm:$0xff] }
 0x1fb   : > { %v1055_v14 = vadd.f32 %v1054_v38, %v4637_v52  ;;  %v1346_v26 = vadd.f32 %v1345_v8, %v1197_v61  ;;  %v1214_v38 = vmul.f32 %v7075_v18, %v7075_v18 }
 0x1fc   : > { %v987_v29 = vadd.f32 %v986_v44, %v4643_v10  ;;  %v1278_v27 = vadd.f32 %v1277_v22, %v1198_v4  ;;  %v7076_v4 = vld [vmem:[#allocation26_spill] sm:$0xff] }
 0x1fd   : > { %v1056_v37 = vadd.f32 %v1055_v14, %v4645_v16  ;;  %v1347_v25 = vadd.f32 %v1346_v26, %v1199_v13  ;;  %v1215_v22 = vmul.f32 %v7076_v4, %v7076_v4  ;;  %v7077_v14 = vld [vmem:[#allocation27_spill] sm:$0xff] }
 0x1fe   : > { %v1279_v45 = vadd.f32 %v1278_v27, %v1200_v6  ;;  %v988_v31 = vadd.f32 %v987_v29, %v4647_v23  ;;  %v1216_v29 = vmul.f32 %v7077_v14, %v7077_v14  ;;  %v7078_v27 = vld [vmem:[#allocation28_spill] sm:$0xff] }
 0x1ff   : > { %v1348_v52 = vadd.f32 %v1347_v25, %v1201_v54  ;;  %v1057_v11 = vadd.f32 %v1056_v37, %v4649_v36  ;;  %v7068_v36 = vld [vmem:[#allocation18_spill] sm:$0xff]  ;;  %v1217_v54 = vmul.f32 %v7078_v27, %v7078_v27 }
 0x200   : > { %v1280_v10 = vadd.f32 %v1279_v45, %v1202_v40  ;;  %v989_v15 = vadd.f32 %v988_v31, %v4655_v57  ;;  %v1207_v59 = vmul.f32 %v7068_v36, %v7068_v36  ;;  %v7069_v57 = vld [vmem:[#allocation19_spill] sm:$0xff]  ;;  %v7079_v45 = vld [vmem:[#allocation29_spill] sm:$0xff] }
 0x201   : > { %v1349_v16 = vadd.f32 %v1348_v52, %v1203_v35  ;;  %v1058_v42 = vadd.f32 %v1057_v11, %v4657_v2  ;;  %v1208_v0 = vmul.f32 %v7069_v57, %v7069_v57  ;;  %v7070_v2 = vld [vmem:[#allocation20_spill] sm:$0xff]  ;;  %v1218_v40 = vmul.f32 %v7079_v45, %v7079_v45  ;;  %v7080_v11 = vld [vmem:[#allocation30_spill] sm:$0xff] }
 0x202   : > { %v1281_v48 = vadd.f32 %v1280_v10, %v1204_v30  ;;  %v990_v23 = vadd.f32 %v989_v15, %v4659_v12  ;;  %v1209_v9 = vmul.f32 %v7070_v2, %v7070_v2  ;;  %v7071_v12 = vld [vmem:[#allocation21_spill] sm:$0xff]  ;;  %v1219_v10 = vmul.f32 %v7080_v11, %v7080_v11  ;;  %v7081_v30 = vld [vmem:[#allocation31_spill] sm:$0xff] }
 0x203   : > { %v1350_v24 = vadd.f32 %v1349_v16, %v1205_v51  ;;  %v1059_v39 = vadd.f32 %v1058_v42, %v7068_v36  ;;  %v1210_v21 = vmul.f32 %v7071_v12, %v7071_v12  ;;  %v1220_v42 = vmul.f32 %v7081_v30, %v7081_v30  ;;  %v7083_v36 = vld [vmem:[#allocation33_spill] sm:$0xff] }
 0x204   : > { %v1282_v32 = vadd.f32 %v1281_v48, %v1206_v55  ;;  %v991_v34 = vadd.f32 %v990_v23, %v7069_v57  ;;  %v7082_v48 = vld [vmem:[#allocation32_spill] sm:$0xff]  ;;  %v7084_v57 = vld [vmem:[#allocation34_spill] sm:$0xff] }
 0x205   : > { %v1351_v43 = vadd.f32 %v1350_v24, %v1207_v59  ;;  %v1060_v5 = vadd.f32 %v1059_v39, %v7070_v2  ;;  %v1221_v55 = vmul.f32 %v7082_v48, %v7082_v48  ;;  %v1222_v59 = vmul.f32 %v7083_v36, %v7083_v36  ;;  %v7085_v2 = vld [vmem:[#allocation35_spill] sm:$0xff] }
 0x206   : > { %v1283_v49 = vadd.f32 %v1282_v32, %v1208_v0  ;;  %v992_v47 = vadd.f32 %v991_v34, %v7071_v12  ;;  %v1223_v0 = vmul.f32 %v7084_v57, %v7084_v57  ;;  %v7086_v12 = vld [vmem:[#allocation36_spill] sm:$0xff] }
 0x207   : > { %v1352_v60 = vadd.f32 %v1351_v43, %v1209_v9  ;;  %v1061_v28 = vadd.f32 %v1060_v5, %v7072_v1  ;;  %v1224_v9 = vmul.f32 %v7085_v2, %v7085_v2  ;;  %v7087_v1 = vld [vmem:[#allocation37_spill] sm:$0xff] }
 0x208   : > { %v1284_v62 = vadd.f32 %v1283_v49, %v1210_v21  ;;  %v993_v58 = vadd.f32 %v992_v47, %v7073_v33  ;;  %v1225_v21 = vmul.f32 %v7086_v12, %v7086_v12 }
 0x209   : > { %v1353_v41 = vadd.f32 %v1352_v60, %v1211_v53  ;;  %v1062_v20 = vadd.f32 %v1061_v28, %v7074_v7  ;;  %v1226_v53 = vmul.f32 %v7087_v1, %v7087_v1  ;;  %v1229_v7 = vmul.f32 %v4729_v19, %v4729_v19 }
 0x20a   : > { %v1285_v3 = vadd.f32 %v1284_v62, %v1212_v63  ;;  %v994_v61 = vadd.f32 %v993_v58, %v7075_v18  ;;  %v1228_v62 = vmul.f32 %v4727_v46, %v4727_v46  ;;  %v7088_v58 = vld [vmem:[#allocation38_spill] sm:$0xff] }
 0x20b   : > { %v1354_v8 = vadd.f32 %v1353_v41, %v1213_v56  ;;  %v1063_v44 = vadd.f32 %v1062_v20, %v7076_v4  ;;  %v1227_v41 = vmul.f32 %v7088_v58, %v7088_v58 }
 0x20c   : > { %v1286_v13 = vadd.f32 %v1285_v3, %v1214_v38  ;;  %v995_v26 = vadd.f32 %v994_v61, %v7077_v14 }
 0x20d   : > { %v1355_v6 = vadd.f32 %v1354_v8, %v1215_v22  ;;  %v1064_v37 = vadd.f32 %v1063_v44, %v7078_v27  ;;  %v1230_v8 = vmul.f32 %v4731_v50, %v4731_v50  ;;  %v1231_v22 = vmul.f32 %v4733_v17, %v4733_v17 }
 0x20e   : > { %v1287_v25 = vadd.f32 %v1286_v13, %v1216_v29  ;;  %v996_v31 = vadd.f32 %v995_v26, %v7079_v45 }
 0x20f   : > { %v1356_v52 = vadd.f32 %v1355_v6, %v1217_v54  ;;  %v1065_v35 = vadd.f32 %v1064_v37, %v7080_v11  ;;  %v1084_v54 = vlaneseq }
 0x210   : > { %v1288_v15 = vadd.f32 %v1287_v25, %v1218_v40  ;;  %v997_v16 = vadd.f32 %v996_v31, %v7081_v30 }
 0x211   : > { %v1357_v51 = vadd.f32 %v1356_v52, %v1219_v10  ;;  %v1066_v23 = vadd.f32 %v1065_v35, %v7082_v48  ;;  %vm1099_vm0 = vcmp.lt.s32.totalorder %v1084_v54, 256 }
 0x212   : > { %v1289_v24 = vadd.f32 %v1288_v15, %v1220_v42  ;;  %v998_v39 = vadd.f32 %v997_v16, %v7083_v36 }
 0x213   : > { %v1358_v32 = vadd.f32 %v1357_v51, %v1221_v55  ;;  %v1067_v34 = vadd.f32 %v1066_v23, %v7084_v57 }
 0x214   : > { %v1290_v43 = vadd.f32 %v1289_v24, %v1222_v59  ;;  %v999_v5 = vadd.f32 %v998_v39, %v7085_v2 }
 0x215   : > { %v1359_v49 = vadd.f32 %v1358_v32, %v1223_v0  ;;  %v1068_v47 = vadd.f32 %v1067_v34, %v7086_v12  ;;  %v939_v0 = vld [vmem:[#allocation4] ss:$2 sm:$0x3] }
 0x216   : > { %v1291_v60 = vadd.f32 %v1290_v43, %v1224_v9  ;;  %v1000_v28 = vadd.f32 %v999_v5, %v7087_v1  ;;  %v1103_v5 = vld [vmem:[#allocation4 + $0x1] ss:$2 sm:$0x3] }
 0x217   : > { %v1360_v33 = vadd.f32 %v1359_v49, %v1225_v21  ;;  %v1069_v63 = vadd.f32 %v1068_v47, %v7088_v58 }
 0x218   : > { %v1292_v20 = vadd.f32 %v1291_v60, %v1226_v53  ;;  %v1001_v56 = vadd.f32 %v1000_v28, %v4727_v46 }
 0x219   : > { %v1361_v3 = vadd.f32 %v1360_v33, %v1227_v41  ;;  %v1070_v18 = vadd.f32 %v1069_v63, %v4729_v19  ;;  %v4360_v19 = vmov 1966171168  }
 0x21a   : > { %v1293_v61 = vadd.f32 %v1292_v20, %v1228_v62  ;;  %v1002_v38 = vadd.f32 %v1001_v56, %v4731_v50  ;;  %v1082_v37 = vunpack.c.l.s4 %v4360_v19 }
 0x21b   : > { %v1362_v4 = vadd.f32 %v1361_v3, %v1229_v7  ;;  %v1071_v44 = vadd.f32 %v1070_v18, %v4733_v17  ;;  %v1085_v17 = vshrl.u32 %v1084_v54, 7 }
 0x21c   : > { %v1003_v13 = vrot.slane %v1002_v38, 4  ;;  %v1294_v14 = vadd.f32 %v1293_v61, %v1230_v8  ;;  %v1083_v10 = vunpack.c.0.s8 %v1082_v37 }
 0x21d   : > { %v1072_v26 = vrot.slane %v1071_v44, 4  ;;  %v1363_v29 = vadd.f32 %v1362_v4, %v1231_v22 }
 0x21e   : > { %v1004_v46 = vadd.f32 %v1003_v13, %v1002_v38  ;;  %v1295_v6 = vrot.slane %v1294_v14, 4  ;;  %v1086_v24 = vsub.s32 %v1083_v10, %v1085_v17 }
 0x21f   : > { %v1073_v27 = vadd.f32 %v1072_v26, %v1071_v44  ;;  %v1364_v25 = vrot.slane %v1363_v29, 4 }
 0x220   : > { %v1005_v45 = vrot.slane %v1004_v46, 2  ;;  %v1296_v31 = vadd.f32 %v1295_v6, %v1294_v14 }
 0x221   : > { %v1074_v50 = vrot.slane %v1073_v27, 2  ;;  %v1365_v40 = vadd.f32 %v1364_v25, %v1363_v29 }
 0x222   : > { %v1006_v52 = vadd.f32 %v1005_v45, %v1004_v46  ;;  %v1297_v11 = vrot.slane %v1296_v31, 2 }
 0x223   : > { %v1075_v35 = vadd.f32 %v1074_v50, %v1073_v27  ;;  %v1366_v15 = vrot.slane %v1365_v40, 2 }
 0x224   : > { %v1007_v30 = vrot.slane %v1006_v52, 1  ;;  %v1298_v16 = vadd.f32 %v1297_v11, %v1296_v31 }
 0x225   : > { %v1076_v42 = vrot.slane %v1075_v35, 1  ;;  %v1367_v51 = vadd.f32 %v1366_v15, %v1365_v40 }
 0x226   : > { %v1008_v48 = vadd.f32 %v1007_v30, %v1006_v52  ;;  %v1299_v23 = vrot.slane %v1298_v16, 1 }
 0x227   : > { %v1077_v55 = vadd.f32 %v1076_v42, %v1075_v35  ;;  %v1368_v36 = vrot.slane %v1367_v51, 1 }
 0x228   : > { %v1300_v39 = vadd.f32 %v1299_v23, %v1298_v16 }
 0x229   : > { %v1080_v59 = vcombine.low %v1008_v48, %v1077_v55  ;;  %v1369_v32 = vadd.f32 %v1368_v36, %v1367_v51 }
 0x22b   : > { %v1087_v57 = vrot.slane %v1080_v59, %v1086_v24  ;;  %v1372_v34 = vcombine.low %v1300_v39, %v1369_v32 }
 0x22d   : > { %v1094_v43 = vrot.slane %v1087_v57, %v1086_v24  ;;  %v1379_v2 = vrot.slane %v1372_v34, %v1086_v24 }
 0x22f   : > { %v1096_v9 = vadd.f32 %v1094_v43, %v939_v0  ;;  %v1386_v49 = vrot.slane %v1379_v2, %v1086_v24 }
 0x231   : > { %1101 = vst.msk [vmem:[#allocation4] ss:$2 sm:$0x3] %vm1099_vm0, %v1096_v9  ;;  %v1388_v12 = vadd.f32 %v1386_v49, %v1103_v5 }
 0x233   : > { %1389 = vst.msk [vmem:[#allocation4 + $0x1] ss:$2 sm:$0x3] %vm1099_vm0, %v1388_v12 }
 0x234 PF: > { %p4065_p7 = scmp.ne.s32.totalorder %s4341_s18, 1 }
 0x236   : > { %1393 = sbr.rel (%p4065_p7) target bundleno = 1073 (0x431), region = 64 }
 0x23d   : > { %v2113_v47 = vld [vmem:[#allocation13 + $0x8] sm:$0xff]  ;;  %v2115_v21 = vld [vmem:[#allocation13 + $0x18] sm:$0xff]  ;;  %v2112_v60 = vld [vmem:[#allocation13] sm:$0xff] }
 0x23e   : > { %v2177_v1 = vpack.c.bf16 %v2115_v21, %v2113_v47  ;;  %v2114_v28 = vld [vmem:[#allocation13 + $0x10] sm:$0xff]  ;;  %v2117_v53 = vld [vmem:[#allocation13 + $0x28] sm:$0xff]  ;;  %v2119_v62 = vld [vmem:[#allocation13 + $0x38] sm:$0xff] }
 0x23f   : > { %v2176_v33 = vpack.c.bf16 %v2114_v28, %v2112_v60  ;;  %v2179_v58 = vpack.c.bf16 %v2119_v62, %v2117_v53  ;;  %v2116_v63 = vld [vmem:[#allocation13 + $0x20] sm:$0xff]  ;;  %v2118_v41 = vld [vmem:[#allocation13 + $0x30] sm:$0xff]  ;;  %v2121_v7 = vld [vmem:[#allocation13 + $0x48] sm:$0xff]  ;;  %v1417_v53 = vlaneseq }
 0x240   : > { %2208 = vmatprep.subr.bf16.mxu0 %v2177_v1  ;;  %v2123_v20 = vld [vmem:[#allocation13 + $0x58] sm:$0xff]  ;;  %4089 = vmatprep.subr.bf16.mxu1 %v2177_v1  ;;  %v2178_v56 = vpack.c.bf16 %v2118_v41, %v2116_v63  ;;  %v2120_v18 = vld [vmem:[#allocation13 + $0x40] sm:$0xff]  ;;  %v2122_v61 = vld [vmem:[#allocation13 + $0x50] sm:$0xff]  ;;  %v4361_v1 = vmov 1966171168  }
 0x241   : > { %2209 = vmatpush1.bf16.msra.mxu0 %v2176_v33  ;;  %4105 = vmatpush1.bf16.msra.mxu1 %v2176_v33  ;;  %v2181_v3 = vpack.c.bf16 %v2123_v20, %v2121_v7  ;;  %v2125_v38 = vld [vmem:[#allocation13 + $0x68] sm:$0xff]  ;;  %v2127_v8 = vld [vmem:[#allocation13 + $0x78] sm:$0xff]  ;;  %v2180_v4 = vpack.c.bf16 %v2122_v61, %v2120_v18  ;;  %v2124_v22 = vld [vmem:[#allocation13 + $0x60] sm:$0xff]  ;;  %v1415_v28 = vunpack.c.l.s4 %v4361_v1  ;;  %v4937_v18 = vshrl.u32 %v1417_v53, 7 }
 0x242   : > { %2210 = vmatprep.subr.bf16.mxu0 %v2179_v58  ;;  %4090 = vmatprep.subr.bf16.mxu1 %v2179_v58  ;;  %v2183_v44 = vpack.c.bf16 %v2127_v8, %v2125_v38  ;;  %v2126_v13 = vld [vmem:[#allocation13 + $0x70] sm:$0xff]  ;;  %v2129_v14 = vld [vmem:[#allocation13 + $0x88] sm:$0xff]  ;;  %v2131_v26 = vld [vmem:[#allocation13 + $0x98] sm:$0xff]  ;;  %vm4945_vm1 = vcmp.lt.s32.totalorder %v1417_v53, 256 }
 0x243   : > { %v2182_v29 = vpack.c.bf16 %v2126_v13, %v2124_v22  ;;  %v2185_v46 = vpack.c.bf16 %v2131_v26, %v2129_v14  ;;  %v2128_v6 = vld [vmem:[#allocation13 + $0x80] sm:$0xff]  ;;  %v2130_v27 = vld [vmem:[#allocation13 + $0x90] sm:$0xff]  ;;  %v2133_v19 = vld [vmem:[#allocation13 + $0xa8] sm:$0xff] }
 0x244   : > { %v2135_v37 = vld [vmem:[#allocation13 + $0xb8] sm:$0xff]  ;;  %v2184_v54 = vpack.c.bf16 %v2130_v27, %v2128_v6  ;;  %v2132_v45 = vld [vmem:[#allocation13 + $0xa0] sm:$0xff]  ;;  %v2134_v31 = vld [vmem:[#allocation13 + $0xb0] sm:$0xff] }
 0x245   : > { %2211 = vmatpush1.bf16.msra.mxu0 %v2178_v56  ;;  %4106 = vmatpush1.bf16.msra.mxu1 %v2178_v56  ;;  %v2187_v25 = vpack.c.bf16 %v2135_v37, %v2133_v19  ;;  %v2137_v50 = vld [vmem:[#allocation13 + $0xc8] sm:$0xff]  ;;  %v2139_v40 = vld [vmem:[#allocation13 + $0xd8] sm:$0xff]  ;;  %v2186_v52 = vpack.c.bf16 %v2134_v31, %v2132_v45  ;;  %v2136_v35 = vld [vmem:[#allocation13 + $0xc0] sm:$0xff] }
 0x246   : > { %2212 = vmatprep.subr.bf16.mxu0 %v2181_v3  ;;  %4091 = vmatprep.subr.bf16.mxu1 %v2181_v3  ;;  %v2189_v11 = vpack.c.bf16 %v2139_v40, %v2137_v50  ;;  %v2138_v10 = vld [vmem:[#allocation13 + $0xd0] sm:$0xff]  ;;  %v2141_v15 = vld [vmem:[#allocation13 + $0xe8] sm:$0xff]  ;;  %v2143_v30 = vld [vmem:[#allocation13 + $0xf8] sm:$0xff]  ;;  %v1416_v3 = vunpack.c.0.s8 %v1415_v28 }
 0x247   : > { %v1398_v17 = vld [vmem:[#allocation4] sm:$0xf]  ;;  %v2188_v42 = vpack.c.bf16 %v2138_v10, %v2136_v35  ;;  %v2191_v48 = vpack.c.bf16 %v2143_v30, %v2141_v15  ;;  %v2140_v23 = vld [vmem:[#allocation13 + $0xe0] sm:$0xff]  ;;  %v2145_v24 = vld [vmem:[#allocation13 + $0x108] sm:$0xff]  ;;  %v7090_v35 = vmov 0  ;;  %v1643_v10 = vsub.s32 0, %v4937_v18 }
 0x248   : > { %v4932_v16 = vmul.f32 0.001953125, %v1398_v17  ;;  %v2142_v55 = vld [vmem:[#allocation13 + $0xf0] sm:$0xff]  ;;  %v2147_v36 = vld [vmem:[#allocation13 + $0x118] sm:$0xff]  ;;  %v2144_v34 = vld [vmem:[#allocation13 + $0x100] sm:$0xff]  ;;  %v4943_v31 = vsub.s32 %v1416_v3, %v4937_v18  ;;  %v7091_v35 = vsel %vm4945_vm1, 4294967295, %v7090_v35 }
 0x249   : > { %2213 = vmatpush1.bf16.msra.mxu0 %v2180_v4  ;;  %4107 = vmatpush1.bf16.msra.mxu1 %v2180_v4  ;;  %v2190_v59 = vpack.c.bf16 %v2142_v55, %v2140_v23  ;;  %v2193_v57 = vpack.c.bf16 %v2147_v36, %v2145_v24  ;;  %v2146_v0 = vld [vmem:[#allocation13 + $0x110] sm:$0xff]  ;;  %v2149_v43 = vld [vmem:[#allocation13 + $0x128] sm:$0xff]  ;;  %v2151_v2 = vld [vmem:[#allocation13 + $0x138] sm:$0xff]  ;;  %7092 = vst [vmem:[#allocation40_spill] sm:$0xff] %v7091_v35 }
 0x24a   : > { %2214 = vmatprep.subr.bf16.mxu0 %v2183_v44  ;;  %4092 = vmatprep.subr.bf16.mxu1 %v2183_v44  ;;  %v1401_v51 = vmul.f32 %v4932_v16, %v4932_v16  ;;  %v2192_v9 = vpack.c.bf16 %v2146_v0, %v2144_v34  ;;  %v2195_v49 = vpack.c.bf16 %v2151_v2, %v2149_v43  ;;  %v2148_v12 = vld [vmem:[#allocation13 + $0x120] sm:$0xff]  ;;  %v2150_v47 = vld [vmem:[#allocation13 + $0x130] sm:$0xff]  ;;  %v2153_v21 = vld [vmem:[#allocation13 + $0x148] sm:$0xff] }
 0x24b   : > { %v2155_v60 = vld [vmem:[#allocation13 + $0x158] sm:$0xff]  ;;  %v2194_v62 = vpack.c.bf16 %v2150_v47, %v2148_v12  ;;  %v2152_v58 = vld [vmem:[#allocation13 + $0x140] sm:$0xff]  ;;  %v2154_v63 = vld [vmem:[#allocation13 + $0x150] sm:$0xff]  ;;  %7089 = vst [vmem:[#allocation39_spill] sm:$0xff] %v4943_v31 }
 0x24c   : > { %v1403_v39 = vrot.slane %v1401_v51, 7  ;;  %v2197_v33 = vpack.c.bf16 %v2155_v60, %v2153_v21  ;;  %v2157_v41 = vld [vmem:[#allocation13 + $0x168] sm:$0xff]  ;;  %v2159_v7 = vld [vmem:[#allocation13 + $0x178] sm:$0xff]  ;;  %v2156_v20 = vld [vmem:[#allocation13 + $0x160] sm:$0xff]  ;;  %v2196_v61 = vpack.c.bf16 %v2154_v63, %v2152_v58  ;;  %v1647_v51 = vsub.s32 1, %v4937_v18 }
 0x24d   : > { %2215 = vmatpush1.bf16.msra.mxu0 %v2182_v29  ;;  %4108 = vmatpush1.bf16.msra.mxu1 %v2182_v29  ;;  %v2158_v56 = vld [vmem:[#allocation13 + $0x170] sm:$0xff]  ;;  %v2161_v38 = vld [vmem:[#allocation13 + $0x188] sm:$0xff]  ;;  %v2163_v8 = vld [vmem:[#allocation13 + $0x198] sm:$0xff]  ;;  %v2199_v22 = vpack.c.bf16 %v2159_v7, %v2157_v41 }
 0x24e   : > { %2216 = vmatprep.subr.bf16.mxu0 %v2185_v46  ;;  %4093 = vmatprep.subr.bf16.mxu1 %v2185_v46  ;;  %v1405_v32 = vsub.f32 %v4932_v16, %v1403_v39  ;;  %v2160_v4 = vld [vmem:[#allocation13 + $0x180] sm:$0xff]  ;;  %v2162_v44 = vld [vmem:[#allocation13 + $0x190] sm:$0xff]  ;;  %v2165_v13 = vld [vmem:[#allocation13 + $0x1a8] sm:$0xff]  ;;  %v2198_v50 = vpack.c.bf16 %v2158_v56, %v2156_v20  ;;  %v2201_v17 = vpack.c.bf16 %v2163_v8, %v2161_v38 }
 0x24f   : > { %v2167_v14 = vld [vmem:[#allocation13 + $0x1b8] sm:$0xff]  ;;  %v2164_v26 = vld [vmem:[#allocation13 + $0x1a0] sm:$0xff]  ;;  %v2166_v29 = vld [vmem:[#allocation13 + $0x1b0] sm:$0xff]  ;;  %v2200_v15 = vpack.c.bf16 %v2162_v44, %v2160_v4 }
 0x250   : > { %v1406_v5 = vadd.f32 1e-05, %v1405_v32  ;;  %v2169_v6 = vld [vmem:[#allocation13 + $0x1c8] sm:$0xff]  ;;  %v2171_v27 = vld [vmem:[#allocation13 + $0x1d8] sm:$0xff]  ;;  %v1399_v19 = vld [vmem:[%s6898_s2] sm:$0xf]  ;;  %v2203_v23 = vpack.c.bf16 %v2167_v14, %v2165_v13  ;;  %v4955_v55 = vpack.c.bf16 %v2166_v29, %v2164_v26 }
 0x251   : > { %2217 = vmatpush1.bf16.msra.mxu0 %v2184_v54  ;;  %4109 = vmatpush1.bf16.msra.mxu1 %v2184_v54  ;;  %v2168_v37 = vld [vmem:[#allocation13 + $0x1c0] sm:$0xff]  ;;  %v2170_v54 = vld [vmem:[#allocation13 + $0x1d0] sm:$0xff]  ;;  %v2175_v40 = vld [vmem:[#allocation13 + $0x1f8] sm:$0xff]  ;;  %v4957_v24 = vpack.c.bf16 %v2171_v27, %v2169_v6 }
 0x252   : > { %2218 = vmatprep.subr.bf16.mxu0 %v2187_v25  ;;  %4094 = vmatprep.subr.bf16.mxu1 %v2187_v25  ;;  %4201 = vrsqrt.f32 %v1406_v5  ;;  %v2173_v25 = vld [vmem:[#allocation13 + $0x1e8] sm:$0xff]  ;;  %v4959_v36 = vpack.c.bf16 %v2170_v54, %v2168_v37  ;;  %v4971_v43 = vld [vmem:[#allocation2 + $0x28] sm:$0xff]  ;;  %v4973_v2 = vld [vmem:[#allocation2 + $0x20] sm:$0xff] }
 0x253   : > { %v4961_v39 = vld [vmem:[#allocation2 + $0x18] sm:$0xff]  ;;  %v4965_v32 = vpack.c.bf16 %v2175_v40, %v2173_v25  ;;  %v4986_v28 = vld [vmem:[#allocation2 + $0x30] sm:$0xff]  ;;  %v4988_v53 = vld [vmem:[#allocation2 + $0x48] sm:$0xff]  ;;  %v1522_v58 = vunpack.c.h.bf16 %v4971_v43  ;;  %v1519_v63 = vunpack.c.l.bf16 %v4973_v2  ;;  %v1521_v56 = vunpack.c.h.bf16 %v4973_v2 }
 0x254   : > { %v4979_v47 = vld [vmem:[#allocation2 + $0x38] sm:$0xff]  ;;  %v1516_v21 = vunpack.c.l.bf16 %v4961_v39  ;;  %v1518_v60 = vunpack.c.h.bf16 %v4961_v39  ;;  %v4994_v41 = vld [vmem:[#allocation2 + $0x40] sm:$0xff]  ;;  %v5001_v38 = vld [vmem:[#allocation2 + $0x50] sm:$0xff]  ;;  %v1523_v4 = vunpack.c.l.bf16 %v4986_v28  ;;  %v1525_v44 = vunpack.c.h.bf16 %v4986_v28 }
 0x255   : > { %2219 = vmatpush1.bf16.msra.mxu0 %v2186_v52  ;;  %4110 = vmatpush1.bf16.msra.mxu1 %v2186_v52  ;;  %v2172_v52 = vld [vmem:[#allocation13 + $0x1e0] sm:$0xff]  ;;  %v4996_v7 = vld [vmem:[#allocation2 + $0x58] sm:$0xff]  ;;  %v1524_v3 = vunpack.c.l.bf16 %v4979_v47  ;;  %v5003_v8 = vld [vmem:[#allocation2 + $0x68] sm:$0xff] }
 0x256   : > { %2220 = vmatprep.subr.bf16.mxu0 %v2189_v11  ;;  %4095 = vmatprep.subr.bf16.mxu1 %v2189_v11  ;;  %v2174_v11 = vld [vmem:[#allocation13 + $0x1f0] sm:$0xff]  ;;  %v5015_v27 = vld [vmem:[#allocation2 + $0x78] sm:$0xff]  ;;  %v5058_v25 = vld [vmem:[#allocation2 + $0x90] sm:$0xff] }
 0x257   : > { %v5009_v14 = vld [vmem:[#allocation2 + $0x60] sm:$0xff]  ;;  %v5060_v54 = vld [vmem:[#allocation2 + $0x128] sm:$0xff]  ;;  %v5093_v13 = vld [vmem:[#allocation2 + $0x138] sm:$0xff] }
 0x258   : > { %v5025_v40 = vld [vmem:[#allocation2 + $0x100] sm:$0xff] }
 0x259   : > { %2221 = vmatpush1.bf16.msra.mxu0 %v2188_v42  ;;  %4111 = vmatpush1.bf16.msra.mxu1 %v2188_v42  ;;  %v4950_v42 = vld [vmem:[#allocation2 + $0x8] sm:$0xff]  ;;  %v5086_v29 = vld [vmem:[#allocation2 + $0xa0] sm:$0xff] }
 0x25a   : > { %2222 = vmatprep.subr.bf16.mxu0 %v2191_v48  ;;  %4096 = vmatprep.subr.bf16.mxu1 %v2191_v48  ;;  %v4953_v48 = vld [vmem:[#allocation2] sm:$0xff]  ;;  %v1512_v5 = vunpack.c.l.bf16 %v4950_v42 }
 0x25b   : > { %v1513_v12 = vunpack.c.h.bf16 %v4953_v48 }
 0x25c   : > { %v4202_v46 = vpop.eup %4201 }
 0x25d   : > { %2223 = vmatpush1.bf16.msra.mxu0 %v2190_v59  ;;  %4112 = vmatpush1.bf16.msra.mxu1 %v2190_v59  ;;  %v4066_v45 = vrot.slane %v4202_v46, 9  ;;  %v4963_v59 = vld [vmem:[#allocation2 + $0x10] sm:$0xff]  ;;  %v7099_v46 = vunpack.c.h.bf16 %v5025_v40 }
 0x25e   : > { %2224 = vmatprep.subr.bf16.mxu0 %v2193_v57  ;;  %4097 = vmatprep.subr.bf16.mxu1 %v2193_v57  ;;  %v4967_v57 = vpack.c.bf16 %v2174_v11, %v2172_v52  ;;  %v1515_v1 = vunpack.c.l.bf16 %v4963_v59 }
 0x25f   : > { %v1412_v30 = vmul.f32 %v4066_v45, %v1399_v19 }
 0x261   : > { %2225 = vmatpush1.bf16.msra.mxu0 %v2192_v9  ;;  %4113 = vmatpush1.bf16.msra.mxu1 %v2192_v9  ;;  %v1420_v34 = vrot.slane %v1412_v30, %v4943_v31  ;;  %v1427_v0 = vmul.f32 %v1412_v30, %v4932_v16  ;;  %v1514_v9 = vunpack.c.h.bf16 %v4950_v42  ;;  %v5030_v30 = vld [vmem:[#allocation2 + $0x88] sm:$0xff] }
 0x262   : > { %2226 = vmatprep.subr.bf16.mxu0 %v2195_v49  ;;  %4098 = vmatprep.subr.bf16.mxu1 %v2195_v49  ;;  %v1511_v49 = vunpack.c.l.bf16 %v4953_v48 }
 0x263   : > { %1426 = vst.msk [vmem:[#allocation6] ss:$2 sm:$0x3] %vm4945_vm1, %v1420_v34  ;;  %v1429_v16 = vrot.slane %v1427_v0, 7  ;;  %v5156_v0 = vld [vmem:[#allocation2 + $0x148] sm:$0xff] }
 0x265   : > { %2227 = vmatpush1.bf16.msra.mxu0 %v2194_v62  ;;  %4114 = vmatpush1.bf16.msra.mxu1 %v2194_v62  ;;  %v1517_v62 = vunpack.c.h.bf16 %v4963_v59  ;;  %v1431_v20 = vsub.f32 %v1399_v19, %v1429_v16  ;;  %v5017_v19 = vld [vmem:[#allocation2 + $0x70] sm:$0xff]  ;;  %v5072_v16 = vld [vmem:[#allocation2 + $0x120] sm:$0xff] }
 0x266   : > { %2228 = vmatprep.subr.bf16.mxu0 %v2197_v33  ;;  %4099 = vmatprep.subr.bf16.mxu1 %v2197_v33  ;;  %v1520_v33 = vunpack.c.l.bf16 %v4971_v43 }
 0x267   : > { %v1439_v26 = vrot.slane %v1431_v20, %v4943_v31  ;;  %v5050_v20 = vld [vmem:[#allocation2 + $0x110] sm:$0xff] }
 0x269   : > { %2229 = vmatpush1.bf16.msra.mxu0 %v2196_v61  ;;  %4115 = vmatpush1.bf16.msra.mxu1 %v2196_v61  ;;  %v1526_v61 = vunpack.c.h.bf16 %v4979_v47  ;;  %v1440_v52 = vcombine.high %v1439_v26, %v1439_v26  ;;  %v5052_v26 = vld [vmem:[#allocation2 + $0x98] sm:$0xff]  ;;  %v5225_v47 = vld [vmem:[#allocation2 + $0xe0] sm:$0xff] }
 0x26a   : > { %2230 = vmatprep.subr.bf16.mxu0 %v2199_v22  ;;  %4100 = vmatprep.subr.bf16.mxu1 %v2199_v22  ;;  %v1528_v22 = vunpack.c.l.bf16 %v4988_v53  ;;  %v1639_v34 = vld [vmem:[#allocation6] ss:$2 sm:$0x3] }
 0x26b   : > { %1443 = vst.msk [vmem:[#allocation6 + $0x1] ss:$2 sm:$0x3] %vm4945_vm1, %v1440_v52  ;;  %v5064_v37 = vrot.slane %v1639_v34, %v1643_v10  ;;  %v5068_v6 = vrot.slane %v1639_v34, %v1647_v51  ;;  %v5074_v52 = vld [vmem:[#allocation2 + $0xa8] sm:$0xff] }
 0x26d   : > { %2231 = vmatpush1.bf16.msra.mxu0 %v2198_v50  ;;  %4116 = vmatpush1.bf16.msra.mxu1 %v2198_v50  ;;  %v5023_v50 = vld [vmem:[#allocation2 + $0x108] sm:$0xff]  ;;  %v1652_v45 = vmul.f32 %v5068_v6, %v1512_v5  ;;  %v1654_v34 = vmul.f32 %v5068_v6, %v1514_v9  ;;  %v1656_v5 = vmul.f32 %v5068_v6, %v1516_v21 }
 0x26e   : > { %2232 = vmatprep.subr.bf16.mxu0 %v2201_v17  ;;  %4101 = vmatprep.subr.bf16.mxu1 %v2201_v17  ;;  %v5040_v17 = vld [vmem:[#allocation2 + $0x118] sm:$0xff]  ;;  %v1658_v42 = vmul.f32 %v5068_v6, %v1518_v60  ;;  %v1655_v39 = vmul.f32 %v5064_v37, %v1515_v1  ;;  %v1657_v60 = vmul.f32 %v5064_v37, %v1517_v62 }
 0x26f   : > { %v1660_v18 = vmul.f32 %v5068_v6, %v1520_v33 }
 0x271   : > { %2233 = vmatpush1.bf16.msra.mxu0 %v2200_v15  ;;  %4117 = vmatpush1.bf16.msra.mxu1 %v2200_v15  ;;  %v1653_v15 = vmul.f32 %v5064_v37, %v1513_v12  ;;  %v5150_v12 = vld [vmem:[#allocation2 + $0xb8] sm:$0xff] }
 0x272   : > { %2234 = vmatprep.subr.bf16.mxu0 %v2203_v23  ;;  %4102 = vmatprep.subr.bf16.mxu1 %v2203_v23  ;;  %v5032_v23 = vld [vmem:[#allocation2 + $0x80] sm:$0xff] }
 0x275   : > { %2235 = vmatpush1.bf16.msra.mxu0 %v4955_v55  ;;  %4118 = vmatpush1.bf16.msra.mxu1 %v4955_v55  ;;  %v5127_v55 = vld [vmem:[#allocation2 + $0x130] sm:$0xff] }
 0x276   : > { %2236 = vmatprep.subr.bf16.mxu0 %v4957_v24  ;;  %4103 = vmatprep.subr.bf16.mxu1 %v4957_v24  ;;  %v1780_v24 = vld [vmem:[#allocation6 + $0x1] ss:$2 sm:$0x3] }
 0x277   : > { %v5119_v48 = vrot.slane %v1780_v24, %v1643_v10  ;;  %v1662_v10 = vmul.f32 %v5068_v6, %v1522_v58 }
 0x279   : > { %2237 = vmatpush1.bf16.msra.mxu0 %v4959_v36  ;;  %4119 = vmatpush1.bf16.msra.mxu1 %v4959_v36  ;;  %v1651_v36 = vmul.f32 %v5064_v37, %v1511_v49  ;;  %v1794_v59 = vadd.f32 %v5119_v48, %v1653_v15  ;;  %v1796_v15 = vadd.f32 %v5119_v48, %v1655_v39 }
 0x27a   : > { %2238 = vmatprep.subr.bf16.mxu0 %v4965_v32  ;;  %4104 = vmatprep.subr.bf16.mxu1 %v4965_v32  ;;  %v5123_v32 = vrot.slane %v1780_v24, %v1647_v51 }
 0x27b   : > { %v1792_v1 = vadd.f32 %v5119_v48, %v1651_v36 }
 0x27c   : > { %v1793_v51 = vadd.f32 %v5123_v32, %v1652_v45  ;;  %v1795_v24 = vadd.f32 %v5123_v32, %v1654_v34  ;;  %v1797_v62 = vadd.f32 %v5123_v32, %v1656_v5  ;;  %v1799_v49 = vadd.f32 %v5123_v32, %v1658_v42  ;;  %v5152_v45 = vld [vmem:[#allocation2 + $0xb0] sm:$0xff]  ;;  %v5158_v42 = vld [vmem:[#allocation2 + $0x140] sm:$0xff] }
 0x27d   : > { %2239 = vmatpush1.bf16.msra.mxu0 %v4967_v57  ;;  %4120 = vmatpush1.bf16.msra.mxu1 %v4967_v57  ;;  %v1920_v21 = vmax.f32 %v1792_v1, 0.0  ;;  %v1922_v57 = vmax.f32 %v1794_v59, 0.0  ;;  %v1798_v5 = vadd.f32 %v5119_v48, %v1657_v60 }
 0x27e   : > { %v1921_v9 = vmax.f32 %v1793_v51, 0.0  ;;  %v1923_v58 = vmax.f32 %v1795_v24, 0.0  ;;  %v1925_v34 = vmax.f32 %v1797_v62, 0.0  ;;  %v1927_v36 = vmax.f32 %v1799_v49, 0.0  ;;  %v5193_v62 = vld [vmem:[#allocation2 + $0xd8] sm:$0xff] }
 0x27f   : > { %v2048_v43 = vpack.c.bf16 %v1922_v57, %v1920_v21  ;;  %v1801_v51 = vadd.f32 %v5123_v32, %v1660_v18  ;;  %v1803_v24 = vadd.f32 %v5123_v32, %v1662_v10  ;;  %v5169_v21 = vld [vmem:[#allocation2 + $0xc8] sm:$0xff]  ;;  %v5171_v18 = vld [vmem:[#allocation2 + $0xc0] sm:$0xff]  ;;  %v1924_v10 = vmax.f32 %v1796_v15, 0.0 }
 0x280   : > { %v2049_v33 = vpack.c.bf16 %v1923_v58, %v1921_v9  ;;  %v2051_v1 = vpack.c.bf16 %v1927_v36, %v1925_v34  ;;  %v1926_v58 = vmax.f32 %v1798_v5, 0.0  ;;  %v1659_v57 = vmul.f32 %v5064_v37, %v1519_v63  ;;  %v5179_v34 = vld [vmem:[#allocation2 + $0x158] sm:$0xff]  ;;  %v5181_v36 = vld [vmem:[#allocation2 + $0x150] sm:$0xff]  ;;  %v5204_v5 = vld [vmem:[#allocation2 + $0x168] sm:$0xff] }
 0x281   : > { %v1929_v39 = vmax.f32 %v1801_v51, 0.0  ;;  %v1931_v49 = vmax.f32 %v1803_v24, 0.0  ;;  %v1666_v15 = vmul.f32 %v5068_v6, %v1526_v61  ;;  %v5206_v63 = vld [vmem:[#allocation2 + $0x160] sm:$0xff] }
 0x282   : > { %2240 = vmatprep.mubr.bf16.mxu0 %v2049_v33  ;;  %v1661_v33 = vmul.f32 %v5064_v37, %v1521_v56  ;;  %v2050_v61 = vpack.c.bf16 %v1926_v58, %v1924_v10  ;;  %v1800_v59 = vadd.f32 %v5119_v48, %v1659_v57  ;;  %v1663_v10 = vmul.f32 %v5064_v37, %v1523_v4  ;;  %v5217_v56 = vld [vmem:[#allocation2 + $0xe8] sm:$0xff] }
 0x283   : > { %2241 = vmatmul.mubr.bf16.vlgmr.msra.gmra.mrb[0].mxu0 %v2048_v43  ;;  %v1664_v43 = vmul.f32 %v5068_v6, %v1524_v3  ;;  %v2053_v51 = vpack.c.bf16 %v1931_v49, %v1929_v39  ;;  %v1807_v3 = vadd.f32 %v5123_v32, %v1666_v15  ;;  %v1665_v49 = vmul.f32 %v5064_v37, %v1525_v44 }
 0x284   : > { %2250 = vmatprep.mubr.bf16.mxu0 %v2051_v1  ;;  %v5199_v1 = vld [vmem:[#allocation2 + $0xd0] sm:$0xff]  ;;  %v1802_v2 = vadd.f32 %v5119_v48, %v1661_v33  ;;  %v1928_v4 = vmax.f32 %v1800_v59, 0.0  ;;  %v1668_v33 = vmul.f32 %v5068_v6, %v1528_v22  ;;  %v7093_v57 = vunpack.c.h.bf16 %v4988_v53 }
 0x285   : > { %v1805_v24 = vadd.f32 %v5123_v32, %v1664_v43  ;;  %v1935_v39 = vmax.f32 %v1807_v3, 0.0  ;;  %v1804_v9 = vadd.f32 %v5119_v48, %v1663_v10  ;;  %v1806_v22 = vadd.f32 %v5119_v48, %v1665_v49 }
 0x286   : > { %v1930_v58 = vmax.f32 %v1802_v2, 0.0  ;;  %v1670_v28 = vmul.f32 %v5068_v6, %v7093_v57  ;;  %v7094_v53 = vunpack.c.l.bf16 %v4994_v41  ;;  %v7096_v57 = vunpack.c.l.bf16 %v5023_v50 }
 0x287   : > { %v1933_v44 = vmax.f32 %v1805_v24, 0.0  ;;  %v7095_v24 = vunpack.c.h.bf16 %v4994_v41  ;;  %v1809_v59 = vadd.f32 %v5123_v32, %v1668_v33  ;;  %v7098_v41 = vunpack.c.l.bf16 %v5025_v40 }
 0x288   : > { %v1716_v10 = vmul.f32 %v5068_v6, %v7096_v57  ;;  %v2052_v15 = vpack.c.bf16 %v1930_v58, %v1928_v4  ;;  %v1811_v2 = vadd.f32 %v5123_v32, %v1670_v28  ;;  %v1717_v57 = vmul.f32 %v5064_v37, %v7099_v46 }
 0x289   : > { %v1669_v3 = vmul.f32 %v5064_v37, %v7095_v24  ;;  %v2055_v43 = vpack.c.bf16 %v1935_v39, %v1933_v44  ;;  %v1715_v24 = vmul.f32 %v5064_v37, %v7098_v41  ;;  %v1932_v58 = vmax.f32 %v1804_v9, 0.0 }
 0x28a   : > { %v7100_v33 = vunpack.c.l.bf16 %v4996_v7  ;;  %v1934_v44 = vmax.f32 %v1806_v22, 0.0  ;;  %v1858_v41 = vadd.f32 %v5119_v48, %v1717_v57  ;;  %v7102_v46 = vunpack.c.l.bf16 %v5001_v38 }
 0x28b   : > { %2251 = vmatmul.mubr.bf16.gmra.mrb[4].mxu0 %v2050_v61  ;;  %v7097_v61 = vunpack.c.h.bf16 %v5023_v50  ;;  %v7101_v50 = vunpack.c.h.bf16 %v4996_v7  ;;  %v7103_v9 = vunpack.c.h.bf16 %v5001_v38  ;;  %v7104_v7 = vunpack.c.l.bf16 %v5003_v8 }
 0x28c   : > { %2260 = vmatprep.mubr.bf16.mxu0 %v2053_v51  ;;  %v1667_v51 = vmul.f32 %v5064_v37, %v7094_v53  ;;  %v1857_v53 = vadd.f32 %v5123_v32, %v1716_v10  ;;  %v1672_v4 = vmul.f32 %v5068_v6, %v7100_v33  ;;  %v1856_v10 = vadd.f32 %v5119_v48, %v1715_v24 }
 0x28d   : > { %v1718_v49 = vmul.f32 %v5068_v6, %v7097_v61  ;;  %v1674_v28 = vmul.f32 %v5068_v6, %v7101_v50  ;;  %v1671_v40 = vmul.f32 %v5064_v37, %v7102_v46  ;;  %v1673_v33 = vmul.f32 %v5064_v37, %v7103_v9 }
 0x28e   : > { %v1985_v61 = vmax.f32 %v1857_v53, 0.0  ;;  %v1676_v50 = vmul.f32 %v5068_v6, %v7104_v7  ;;  %v1937_v22 = vmax.f32 %v1809_v59, 0.0  ;;  %v1939_v53 = vmax.f32 %v1811_v2, 0.0 }
 0x28f   : > { %v1859_v39 = vadd.f32 %v5123_v32, %v1718_v49  ;;  %v1984_v24 = vmax.f32 %v1856_v10, 0.0  ;;  %v1986_v60 = vmax.f32 %v1858_v41, 0.0  ;;  %v1810_v57 = vadd.f32 %v5119_v48, %v1669_v3 }
 0x290   : > { %v7105_v46 = vunpack.c.l.bf16 %v5040_v17  ;;  %v2054_v9 = vpack.c.bf16 %v1934_v44, %v1932_v58  ;;  %v1813_v35 = vadd.f32 %v5123_v32, %v1672_v4  ;;  %v1815_v59 = vadd.f32 %v5123_v32, %v1674_v28 }
 0x291   : > { %v1987_v49 = vmax.f32 %v1859_v39, 0.0  ;;  %v2080_v31 = vpack.c.bf16 %v1986_v60, %v1984_v24  ;;  %v7106_v39 = vunpack.c.h.bf16 %v5040_v17  ;;  %v2057_v44 = vpack.c.bf16 %v1939_v53, %v1937_v22 }
 0x292   : > { %v1720_v38 = vmul.f32 %v5068_v6, %v7105_v46  ;;  %v7109_v60 = vunpack.c.h.bf16 %v5003_v8  ;;  %v7110_v4 = vunpack.c.l.bf16 %v5009_v14  ;;  %v7111_v10 = vunpack.c.h.bf16 %v5009_v14 }
 0x293   : > { %2261 = vmatmul.mubr.bf16.gmra.mrb[8].mxu0 %v2052_v15  ;;  %v1808_v15 = vadd.f32 %v5119_v48, %v1667_v51  ;;  %v2081_v11 = vpack.c.bf16 %v1987_v49, %v1985_v61  ;;  %v7107_v51 = vunpack.c.l.bf16 %v5050_v20  ;;  %v7108_v61 = vunpack.c.h.bf16 %v5050_v20 }
 0x294   : > { %2270 = vmatprep.mubr.bf16.mxu0 %v2055_v43  ;;  %v1722_v43 = vmul.f32 %v5068_v6, %v7106_v39  ;;  %v1861_v2 = vadd.f32 %v5123_v32, %v1720_v38  ;;  %v1678_v17 = vmul.f32 %v5068_v6, %v7109_v60  ;;  %v1675_v28 = vmul.f32 %v5064_v37, %v7110_v4 }
 0x295   : > { %2400 = vmatprep.mubr.bf16.mxu1 %v2081_v11  ;;  %v1719_v3 = vmul.f32 %v5064_v37, %v7107_v51  ;;  %v1721_v58 = vmul.f32 %v5064_v37, %v7108_v61  ;;  %v1677_v41 = vmul.f32 %v5064_v37, %v7111_v10  ;;  %v1936_v22 = vmax.f32 %v1808_v15, 0.0 }
 0x296   : > { %2401 = vmatmul.mubr.bf16.vlgmr.msra.gmra.mrb[0].mxu1 %v2080_v31  ;;  %v1863_v11 = vadd.f32 %v5123_v32, %v1722_v43  ;;  %v1989_v7 = vmax.f32 %v1861_v2, 0.0  ;;  %v1938_v8 = vmax.f32 %v1810_v57, 0.0  ;;  %v7112_v53 = vunpack.c.l.bf16 %v5015_v27 }
 0x297   : > { %v1860_v20 = vadd.f32 %v5119_v48, %v1719_v3  ;;  %v1862_v49 = vadd.f32 %v5119_v48, %v1721_v58  ;;  %v1941_v31 = vmax.f32 %v1813_v35, 0.0  ;;  %v1943_v38 = vmax.f32 %v1815_v59, 0.0 }
 0x298   : > { %v1680_v24 = vmul.f32 %v5068_v6, %v7112_v53  ;;  %v1991_v46 = vmax.f32 %v1863_v11, 0.0  ;;  %v1812_v14 = vadd.f32 %v5119_v48, %v1671_v40  ;;  %v7113_v2 = vunpack.c.h.bf16 %v5015_v27  ;;  %v5331_v11 = vld [vmem:[#allocation2 + $0x178] sm:$0xff] }
 0x299   : > { %v1988_v39 = vmax.f32 %v1860_v20, 0.0  ;;  %v1990_v43 = vmax.f32 %v1862_v49, 0.0  ;;  %v7114_v15 = vunpack.c.l.bf16 %v5060_v54  ;;  %v1814_v61 = vadd.f32 %v5119_v48, %v1673_v33 }
 0x29a   : > { %v1682_v51 = vmul.f32 %v5068_v6, %v7113_v2  ;;  %v2083_v3 = vpack.c.bf16 %v1991_v46, %v1989_v7  ;;  %v7115_v59 = vunpack.c.h.bf16 %v5060_v54  ;;  %v1819_v40 = vadd.f32 %v5123_v32, %v1678_v17 }
 0x29b   : > { %2271 = vmatmul.mubr.bf16.gmra.mrb[12].mxu0 %v2054_v9  ;;  %v1724_v57 = vmul.f32 %v5068_v6, %v7114_v15  ;;  %v1817_v9 = vadd.f32 %v5123_v32, %v1676_v50  ;;  %v2082_v35 = vpack.c.bf16 %v1990_v43, %v1988_v39  ;;  %v7117_v4 = vunpack.c.h.bf16 %v5072_v16 }
 0x29c   : > { %2280 = vmatprep.mubr.bf16.mxu0 %v2057_v44  ;;  %v1726_v58 = vmul.f32 %v5068_v6, %v7115_v59  ;;  %2410 = vmatprep.mubr.bf16.mxu1 %v2083_v3  ;;  %v7116_v44 = vunpack.c.l.bf16 %v5072_v16  ;;  %v2056_v50 = vpack.c.bf16 %v1938_v8, %v1936_v22  ;;  %v2059_v10 = vpack.c.bf16 %v1943_v38, %v1941_v31 }
 0x29d   : > { %v1865_v27 = vadd.f32 %v5123_v32, %v1724_v57  ;;  %v1725_v33 = vmul.f32 %v5064_v37, %v7117_v4  ;;  %v1816_v54 = vadd.f32 %v5119_v48, %v1675_v28  ;;  %v1818_v17 = vadd.f32 %v5119_v48, %v1677_v41 }
 0x29e   : > { %v1723_v60 = vmul.f32 %v5064_v37, %v7116_v44  ;;  %v1867_v7 = vadd.f32 %v5123_v32, %v1726_v58  ;;  %2411 = vmatmul.mubr.bf16.gmra.mrb[4].mxu1 %v2082_v35  ;;  %v1940_v46 = vmax.f32 %v1812_v14, 0.0  ;;  %v1942_v16 = vmax.f32 %v1814_v61, 0.0 }
 0x29f   : > { %v1993_v20 = vmax.f32 %v1865_v27, 0.0  ;;  %v1866_v53 = vadd.f32 %v5119_v48, %v1725_v33  ;;  %v1604_v43 = vunpack.c.l.bf16 %v5331_v11  ;;  %v1945_v2 = vmax.f32 %v1817_v9, 0.0 }
 0x2a0   : > { %v1864_v49 = vadd.f32 %v5119_v48, %v1723_v60  ;;  %v1995_v39 = vmax.f32 %v1867_v7, 0.0  ;;  %v1947_v22 = vmax.f32 %v1819_v40, 0.0  ;;  %v1821_v28 = vadd.f32 %v5123_v32, %v1680_v24 }
 0x2a1   : > { %v1994_v31 = vmax.f32 %v1866_v53, 0.0  ;;  %v1823_v41 = vadd.f32 %v5123_v32, %v1682_v51  ;;  %v7118_v3 = vunpack.c.l.bf16 %v5093_v13  ;;  %v1944_v14 = vmax.f32 %v1816_v54, 0.0 }
 0x2a2   : > { %v1992_v8 = vmax.f32 %v1864_v49, 0.0  ;;  %v2085_v38 = vpack.c.bf16 %v1995_v39, %v1993_v20  ;;  %v1946_v57 = vmax.f32 %v1818_v17, 0.0  ;;  %v7119_v35 = vunpack.c.h.bf16 %v5093_v13 }
 0x2a3   : > { %2281 = vmatmul.mubr.bf16.gmra.mrb[16].mxu0 %v2056_v50  ;;  %v1728_v15 = vmul.f32 %v5068_v6, %v7118_v3  ;;  %v7120_v59 = vunpack.c.l.bf16 %v5017_v19  ;;  %v7121_v51 = vunpack.c.l.bf16 %v5127_v55  ;;  %v7122_v27 = vunpack.c.h.bf16 %v5127_v55 }
 0x2a4   : > { %2290 = vmatprep.mubr.bf16.mxu0 %v2059_v10  ;;  %v2084_v61 = vpack.c.bf16 %v1994_v31, %v1992_v8  ;;  %v1730_v9 = vmul.f32 %v5068_v6, %v7119_v35  ;;  %2420 = vmatprep.mubr.bf16.mxu1 %v2085_v38  ;;  %v2058_v60 = vpack.c.bf16 %v1942_v16, %v1940_v46  ;;  %v7123_v13 = vunpack.c.h.bf16 %v5017_v19 }
 0x2a5   : > { %v1679_v58 = vmul.f32 %v5064_v37, %v7120_v59  ;;  %v1869_v24 = vadd.f32 %v5123_v32, %v1728_v15  ;;  %v1727_v40 = vmul.f32 %v5064_v37, %v7121_v51  ;;  %v1729_v44 = vmul.f32 %v5064_v37, %v7122_v27 }
 0x2a6   : > { %v1681_v4 = vmul.f32 %v5064_v37, %v7123_v13  ;;  %v7124_v33 = vunpack.c.l.bf16 %v5030_v30  ;;  %v1871_v10 = vadd.f32 %v5123_v32, %v1730_v9  ;;  %v7125_v54 = vunpack.c.h.bf16 %v5030_v30  ;;  %2421 = vmatmul.mubr.bf16.gmra.mrb[8].mxu1 %v2084_v61 }
 0x2a7   : > { %v1997_v17 = vmax.f32 %v1869_v24, 0.0  ;;  %v1868_v55 = vadd.f32 %v5119_v48, %v1727_v40  ;;  %v1870_v20 = vadd.f32 %v5119_v48, %v1729_v44  ;;  %v2061_v49 = vpack.c.bf16 %v1947_v22, %v1945_v2 }
 0x2a8   : > { %v1684_v50 = vmul.f32 %v5068_v6, %v7124_v33  ;;  %v1686_v7 = vmul.f32 %v5068_v6, %v7125_v54  ;;  %v1949_v53 = vmax.f32 %v1821_v28, 0.0  ;;  %v1951_v19 = vmax.f32 %v1823_v41, 0.0 }
 0x2a9   : > { %v1999_v46 = vmax.f32 %v1871_v10, 0.0  ;;  %v2060_v16 = vpack.c.bf16 %v1946_v57, %v1944_v14  ;;  %v1820_v39 = vadd.f32 %v5119_v48, %v1679_v58  ;;  %v1996_v8 = vmax.f32 %v1868_v55, 0.0 }
 0x2aa   : > { %v1998_v31 = vmax.f32 %v1870_v20, 0.0  ;;  %v1822_v38 = vadd.f32 %v5119_v48, %v1681_v4  ;;  %v1825_v30 = vadd.f32 %v5123_v32, %v1684_v50  ;;  %v7126_v15 = vunpack.c.l.bf16 %v5156_v0 }
 0x2ab   : > { %v2087_v3 = vpack.c.bf16 %v1999_v46, %v1997_v17  ;;  %2291 = vmatmul.mubr.bf16.gmra.mrb[20].mxu0 %v2058_v60  ;;  %v1827_v2 = vadd.f32 %v5123_v32, %v1686_v7  ;;  %v7127_v22 = vunpack.c.l.bf16 %v5032_v23  ;;  %v7128_v14 = vunpack.c.h.bf16 %v5156_v0 }
 0x2ac   : > { %v1732_v35 = vmul.f32 %v5068_v6, %v7126_v15  ;;  %v2086_v41 = vpack.c.bf16 %v1998_v31, %v1996_v8  ;;  %2300 = vmatprep.mubr.bf16.mxu0 %v2061_v49  ;;  %v7129_v9 = vunpack.c.l.bf16 %v5158_v42  ;;  %v7130_v58 = vunpack.c.h.bf16 %v5158_v42 }
 0x2ad   : > { %v1683_v28 = vmul.f32 %v5064_v37, %v7127_v22  ;;  %v1734_v57 = vmul.f32 %v5068_v6, %v7128_v14  ;;  %2430 = vmatprep.mubr.bf16.mxu1 %v2087_v3  ;;  %v1606_v51 = vunpack.c.h.bf16 %v5331_v11  ;;  %v2063_v40 = vpack.c.bf16 %v1951_v19, %v1949_v53  ;;  %v5403_v19 = vld [vmem:[#allocation2 + $0x170] sm:$0xff] }
 0x2ae   : > { %v1873_v61 = vadd.f32 %v5123_v32, %v1732_v35  ;;  %v1731_v59 = vmul.f32 %v5064_v37, %v7129_v9  ;;  %v1733_v24 = vmul.f32 %v5064_v37, %v7130_v58  ;;  %v7131_v27 = vunpack.c.h.bf16 %v5032_v23  ;;  %2431 = vmatmul.mubr.bf16.gmra.mrb[12].mxu1 %v2086_v41 }
 0x2af   : > { %v7132_v44 = vunpack.c.l.bf16 %v5052_v26  ;;  %v1875_v13 = vadd.f32 %v5123_v32, %v1734_v57  ;;  %v7133_v4 = vunpack.c.h.bf16 %v5052_v26  ;;  %v1948_v54 = vmax.f32 %v1820_v39, 0.0 }
 0x2b0   : > { %v1685_v0 = vmul.f32 %v5064_v37, %v7131_v27  ;;  %v2001_v42 = vmax.f32 %v1873_v61, 0.0  ;;  %v1872_v50 = vadd.f32 %v5119_v48, %v1731_v59  ;;  %v1874_v10 = vadd.f32 %v5119_v48, %v1733_v24 }
 0x2b1   : > { %v1688_v60 = vmul.f32 %v5068_v6, %v7132_v44  ;;  %v1690_v33 = vmul.f32 %v5068_v6, %v7133_v4  ;;  %v1950_v7 = vmax.f32 %v1822_v38, 0.0  ;;  %v1953_v23 = vmax.f32 %v1825_v30, 0.0 }
 0x2b2   : > { %v2003_v17 = vmax.f32 %v1875_v13, 0.0  ;;  %v1955_v55 = vmax.f32 %v1827_v2, 0.0  ;;  %v1824_v20 = vadd.f32 %v5119_v48, %v1683_v28  ;;  %v2000_v49 = vmax.f32 %v1872_v50, 0.0 }
 0x2b3   : > { %v2002_v53 = vmax.f32 %v1874_v10, 0.0  ;;  %v1826_v26 = vadd.f32 %v5119_v48, %v1685_v0  ;;  %v1829_v46 = vadd.f32 %v5123_v32, %v1688_v60  ;;  %v7134_v31 = vunpack.c.l.bf16 %v5179_v34  ;;  %2301 = vmatmul.mubr.bf16.gmra.mrb[24].mxu0 %v2060_v16 }
 0x2b4   : > { %v2089_v8 = vpack.c.bf16 %v2003_v17, %v2001_v42  ;;  %v1831_v38 = vadd.f32 %v5123_v32, %v1690_v33  ;;  %v7135_v30 = vunpack.c.l.bf16 %v5058_v25  ;;  %v7136_v15 = vunpack.c.h.bf16 %v5058_v25  ;;  %2310 = vmatprep.mubr.bf16.mxu0 %v2063_v40 }
 0x2b5   : > { %v1736_v39 = vmul.f32 %v5068_v6, %v7134_v31  ;;  %v7137_v2 = vunpack.c.h.bf16 %v5179_v34  ;;  %v7138_v41 = vunpack.c.l.bf16 %v5181_v36  ;;  %v7139_v57 = vunpack.c.h.bf16 %v5181_v36 }
 0x2b6   : > { %v1687_v3 = vmul.f32 %v5064_v37, %v7135_v30  ;;  %v1689_v35 = vmul.f32 %v5064_v37, %v7136_v15  ;;  %2440 = vmatprep.mubr.bf16.mxu1 %v2089_v8  ;;  %v1603_v25 = vunpack.c.l.bf16 %v5403_v19  ;;  %v2062_v9 = vpack.c.bf16 %v1950_v7, %v1948_v54 }
 0x2b7   : > { %v1738_v22 = vmul.f32 %v5068_v6, %v7137_v2  ;;  %v1877_v28 = vadd.f32 %v5123_v32, %v1736_v39  ;;  %v1735_v14 = vmul.f32 %v5064_v37, %v7138_v41  ;;  %v1737_v61 = vmul.f32 %v5064_v37, %v7139_v57 }
 0x2b8   : > { %v2088_v59 = vpack.c.bf16 %v2002_v53, %v2000_v49  ;;  %v1605_v16 = vunpack.c.h.bf16 %v5403_v19  ;;  %v7140_v58 = vunpack.c.l.bf16 %v5074_v52  ;;  %v2065_v44 = vpack.c.bf16 %v1955_v55, %v1953_v23 }
 0x2b9   : > { %v1879_v34 = vadd.f32 %v5123_v32, %v1738_v22  ;;  %v2005_v27 = vmax.f32 %v1877_v28, 0.0  ;;  %v1876_v0 = vadd.f32 %v5119_v48, %v1735_v14  ;;  %v1878_v36 = vadd.f32 %v5119_v48, %v1737_v61 }
 0x2ba   : > { %v1692_v24 = vmul.f32 %v5068_v6, %v7140_v58  ;;  %v1952_v60 = vmax.f32 %v1824_v20, 0.0  ;;  %v1954_v13 = vmax.f32 %v1826_v26, 0.0  ;;  %v1957_v40 = vmax.f32 %v1829_v46, 0.0  ;;  %2441 = vmatmul.mubr.bf16.gmra.mrb[16].mxu1 %v2088_v59 }
 0x2bb   : > { %v2007_v4 = vmax.f32 %v1879_v34, 0.0  ;;  %v1959_v33 = vmax.f32 %v1831_v38, 0.0  ;;  %v5436_v42 = vadd.f32 %v5119_v48, %v1687_v3  ;;  %v5439_v50 = vadd.f32 %v5119_v48, %v1689_v35  ;;  %2311 = vmatmul.mubr.bf16.gmra.mrb[28].mxu0 %v2062_v9 }
 0x2bc   : > { %v2004_v54 = vmax.f32 %v1876_v0, 0.0  ;;  %v2006_v7 = vmax.f32 %v1878_v36, 0.0  ;;  %v7141_v17 = vunpack.c.l.bf16 %v5204_v5  ;;  %v7142_v23 = vunpack.c.h.bf16 %v5074_v52  ;;  %2320 = vmatprep.mubr.bf16.mxu0 %v2065_v44 }
 0x2bd   : > { %v2091_v10 = vpack.c.bf16 %v2007_v4, %v2005_v27  ;;  %v1833_v20 = vadd.f32 %v5123_v32, %v1692_v24  ;;  %v7143_v53 = vunpack.c.l.bf16 %v5086_v29  ;;  %v7144_v26 = vunpack.c.h.bf16 %v5204_v5 }
 0x2be   : > { %v1740_v49 = vmul.f32 %v5068_v6, %v7141_v17  ;;  %v1694_v55 = vmul.f32 %v5068_v6, %v7142_v23  ;;  %v7145_v8 = vunpack.c.h.bf16 %v5086_v29  ;;  %v7146_v52 = vunpack.c.l.bf16 %v5206_v63 }
 0x2bf   : > { %v1691_v19 = vmul.f32 %v5064_v37, %v7143_v53  ;;  %v1742_v46 = vmul.f32 %v5068_v6, %v7144_v26  ;;  %2450 = vmatprep.mubr.bf16.mxu1 %v2091_v10  ;;  %v7147_v30 = vunpack.c.h.bf16 %v5206_v63  ;;  %v2064_v15 = vpack.c.bf16 %v1954_v13, %v1952_v60 }
 0x2c0   : > { %v1693_v31 = vmul.f32 %v5064_v37, %v7145_v8  ;;  %v1881_v39 = vadd.f32 %v5123_v32, %v1740_v49  ;;  %v1739_v38 = vmul.f32 %v5064_v37, %v7146_v52  ;;  %v7148_v5 = vunpack.c.l.bf16 %v5150_v12  ;;  %v1495_v52 = vld [vmem:[#allocation2 + $0x180] sm:$0xff] }
 0x2c1   : > { %v1741_v3 = vmul.f32 %v5064_v37, %v7147_v30  ;;  %v7149_v29 = vunpack.c.h.bf16 %v5150_v12  ;;  %v1883_v22 = vadd.f32 %v5123_v32, %v1742_v46  ;;  %v2090_v28 = vpack.c.bf16 %v2006_v7, %v2004_v54 }
 0x2c2   : > { %v1696_v35 = vmul.f32 %v5068_v6, %v7148_v5  ;;  %v2009_v41 = vmax.f32 %v1881_v39, 0.0  ;;  %v1880_v14 = vadd.f32 %v5119_v48, %v1739_v38  ;;  %v2067_v57 = vpack.c.bf16 %v1959_v33, %v1957_v40  ;;  %v1498_v5 = vld [vmem:[#allocation2 + $0x198] sm:$0xff] }
 0x2c3   : > { %v1698_v2 = vmul.f32 %v5068_v6, %v7149_v29  ;;  %v1882_v63 = vadd.f32 %v5119_v48, %v1741_v3  ;;  %v1956_v61 = vmax.f32 %v5436_v42, 0.0  ;;  %v1835_v9 = vadd.f32 %v5123_v32, %v1694_v55  ;;  %2451 = vmatmul.mubr.bf16.gmra.mrb[20].mxu1 %v2090_v28  ;;  %v5496_v55 = vld [vmem:[#allocation2 + $0xf8] sm:$0xff]  ;;  %2321 = vmatmul.mubr.bf16.gmra.mrb[32].mxu0 %v2064_v15 }
 0x2c4   : > { %v2011_v59 = vmax.f32 %v1883_v22, 0.0  ;;  %v1958_v34 = vmax.f32 %v5439_v50, 0.0  ;;  %v1961_v12 = vmax.f32 %v1833_v20, 0.0  ;;  %v1832_v58 = vadd.f32 %v5119_v48, %v1691_v19  ;;  %2330 = vmatprep.mubr.bf16.mxu0 %v2067_v57  ;;  %v1497_v57 = vld [vmem:[#allocation2 + $0x190] sm:$0xff] }
 0x2c5   : > { %v1834_v24 = vadd.f32 %v5119_v48, %v1693_v31  ;;  %v1837_v27 = vadd.f32 %v5123_v32, %v1696_v35  ;;  %v7150_v0 = vunpack.c.l.bf16 %v5152_v45  ;;  %v1744_v60 = vmul.f32 %v5068_v6, %v1604_v43 }
 0x2c6   : > { %v2093_v44 = vpack.c.bf16 %v2011_v59, %v2009_v41  ;;  %v1839_v13 = vadd.f32 %v5123_v32, %v1698_v2  ;;  %v2008_v4 = vmax.f32 %v1880_v14, 0.0  ;;  %v2010_v40 = vmax.f32 %v1882_v63, 0.0 }
 0x2c7   : > { %v1695_v36 = vmul.f32 %v5064_v37, %v7150_v0  ;;  %v1746_v33 = vmul.f32 %v5068_v6, %v1606_v51  ;;  %v1963_v42 = vmax.f32 %v1835_v9, 0.0  ;;  %v1885_v50 = vadd.f32 %v5123_v32, %v1744_v60 }
 0x2c8   : > { %2460 = vmatprep.mubr.bf16.mxu1 %v2093_v44  ;;  %v1743_v10 = vmul.f32 %v5064_v37, %v1603_v25  ;;  %v1745_v54 = vmul.f32 %v5064_v37, %v1605_v16  ;;  %v1960_v7 = vmax.f32 %v1832_v58, 0.0  ;;  %v1962_v17 = vmax.f32 %v1834_v24, 0.0  ;;  %v1496_v16 = vld [vmem:[#allocation2 + $0x188] sm:$0xff] }
 0x2c9   : > { %v7151_v43 = vunpack.c.h.bf16 %v5152_v45  ;;  %v1887_v23 = vadd.f32 %v5123_v32, %v1746_v33  ;;  %v5499_v11 = vadd.f32 %v5119_v48, %v1695_v36  ;;  %v2013_v51 = vmax.f32 %v1885_v50, 0.0 }
 0x2ca   : > { %v1884_v20 = vadd.f32 %v5119_v48, %v1743_v10  ;;  %v1886_v25 = vadd.f32 %v5119_v48, %v1745_v54  ;;  %v1965_v53 = vmax.f32 %v1837_v27, 0.0  ;;  %v1967_v19 = vmax.f32 %v1839_v13, 0.0 }
 0x2cb   : > { %v1697_v49 = vmul.f32 %v5064_v37, %v7151_v43  ;;  %v2092_v45 = vpack.c.bf16 %v2010_v40, %v2008_v4  ;;  %v2015_v26 = vmax.f32 %v1887_v23, 0.0  ;;  %v2066_v46 = vpack.c.bf16 %v1958_v34, %v1956_v61  ;;  %v1500_v4 = vld [vmem:[#allocation2 + $0x1a8] sm:$0xff] }
 0x2cc   : > { %v2069_v8 = vpack.c.bf16 %v1963_v42, %v1961_v12  ;;  %v1572_v31 = vunpack.c.l.bf16 %v5496_v55  ;;  %v1574_v39 = vunpack.c.h.bf16 %v5496_v55  ;;  %v5505_v38 = vpack.c.bf16 %v1962_v17, %v1960_v7 }
 0x2cd   : > { %v5508_v30 = vadd.f32 %v5119_v48, %v1697_v49  ;;  %v2095_v3 = vpack.c.bf16 %v2015_v26, %v2013_v51  ;;  %v1608_v15 = vunpack.c.l.bf16 %v1496_v16  ;;  %v1964_v35 = vmax.f32 %v5499_v11, 0.0  ;;  %2461 = vmatmul.mubr.bf16.gmra.mrb[24].mxu1 %v2092_v45  ;;  %2331 = vmatmul.mubr.bf16.gmra.mrb[36].mxu0 %v2066_v46 }
 0x2ce   : > { %v2012_v29 = vmax.f32 %v1884_v20, 0.0  ;;  %v2014_v2 = vmax.f32 %v1886_v25, 0.0  ;;  %v1610_v22 = vunpack.c.h.bf16 %v1496_v16  ;;  %v2071_v28 = vpack.c.bf16 %v1967_v19, %v1965_v53  ;;  %2340 = vmatprep.mubr.bf16.mxu0 %v2069_v8 }
 0x2cf   : > { %v1748_v41 = vmul.f32 %v5068_v6, %v1608_v15  ;;  %v1607_v14 = vunpack.c.l.bf16 %v1495_v52  ;;  %v1609_v63 = vunpack.c.h.bf16 %v1495_v52  ;;  %v7152_v61 = vunpack.c.l.bf16 %v5169_v21  ;;  %2470 = vmatprep.mubr.bf16.mxu1 %v2095_v3 }
 0x2d0   : > { %v7153_v59 = vunpack.c.h.bf16 %v5169_v21  ;;  %v1750_v12 = vmul.f32 %v5068_v6, %v1610_v22  ;;  %v1612_v58 = vunpack.c.l.bf16 %v1498_v5  ;;  %v1614_v36 = vunpack.c.h.bf16 %v1498_v5 }
 0x2d1   : > { %v1700_v9 = vmul.f32 %v5068_v6, %v7152_v61  ;;  %v1889_v24 = vadd.f32 %v5123_v32, %v1748_v41  ;;  %v1747_v27 = vmul.f32 %v5064_v37, %v1607_v14  ;;  %v1749_v0 = vmul.f32 %v5064_v37, %v1609_v63 }
 0x2d2   : > { %v1702_v34 = vmul.f32 %v5068_v6, %v7153_v59  ;;  %v2094_v44 = vpack.c.bf16 %v2014_v2, %v2012_v29  ;;  %v1891_v60 = vadd.f32 %v5123_v32, %v1750_v12  ;;  %v1752_v13 = vmul.f32 %v5068_v6, %v1612_v58  ;;  %v1502_v2 = vld [vmem:[#allocation2 + $0x1b8] sm:$0xff] }
 0x2d3   : > { %v1611_v21 = vunpack.c.l.bf16 %v1497_v57  ;;  %v2017_v40 = vmax.f32 %v1889_v24, 0.0  ;;  %v1888_v33 = vadd.f32 %v5119_v48, %v1747_v27  ;;  %v1890_v42 = vadd.f32 %v5119_v48, %v1749_v0 }
 0x2d4   : > { %v1754_v50 = vmul.f32 %v5068_v6, %v1614_v36  ;;  %v1841_v10 = vadd.f32 %v5123_v32, %v1700_v9  ;;  %v2019_v54 = vmax.f32 %v1891_v60, 0.0  ;;  %v1893_v7 = vadd.f32 %v5123_v32, %v1752_v13 }
 0x2d5   : > { %v1613_v17 = vunpack.c.h.bf16 %v1497_v57  ;;  %v1843_v43 = vadd.f32 %v5123_v32, %v1702_v34  ;;  %v7154_v49 = vunpack.c.l.bf16 %v5171_v18  ;;  %v1616_v20 = vunpack.c.l.bf16 %v1500_v4  ;;  %2471 = vmatmul.mubr.bf16.gmra.mrb[28].mxu1 %v2094_v44  ;;  %2341 = vmatmul.mubr.bf16.gmra.mrb[40].mxu0 %v5505_v38 }
 0x2d6   : > { %v1895_v51 = vadd.f32 %v5123_v32, %v1754_v50  ;;  %v7155_v25 = vunpack.c.h.bf16 %v5171_v18  ;;  %v2097_v53 = vpack.c.bf16 %v2019_v54, %v2017_v40  ;;  %v1751_v19 = vmul.f32 %v5064_v37, %v1611_v21  ;;  %v1499_v18 = vld [vmem:[#allocation2 + $0x1a0] sm:$0xff]  ;;  %2350 = vmatprep.mubr.bf16.mxu0 %v2071_v28 }
 0x2d7   : > { %v1699_v23 = vmul.f32 %v5064_v37, %v7154_v49  ;;  %v1753_v45 = vmul.f32 %v5064_v37, %v1613_v17  ;;  %v1966_v26 = vmax.f32 %v5508_v30, 0.0  ;;  %v2016_v46 = vmax.f32 %v1888_v33, 0.0 }
 0x2d8   : > { %v1701_v16 = vmul.f32 %v5064_v37, %v7155_v25  ;;  %v2018_v8 = vmax.f32 %v1890_v42, 0.0  ;;  %v1618_v52 = vunpack.c.h.bf16 %v1500_v4  ;;  %v1969_v3 = vmax.f32 %v1841_v10, 0.0  ;;  %2480 = vmatprep.mubr.bf16.mxu1 %v2097_v53 }
 0x2d9   : > { %v2021_v15 = vmax.f32 %v1893_v7, 0.0  ;;  %v2023_v5 = vmax.f32 %v1895_v51, 0.0  ;;  %v1756_v29 = vmul.f32 %v5068_v6, %v1616_v20  ;;  %v1971_v22 = vmax.f32 %v1843_v43, 0.0  ;;  %v1501_v7 = vld [vmem:[#allocation2 + $0x1b0] sm:$0xff] }
 0x2da   : > { %v1840_v41 = vadd.f32 %v5119_v48, %v1699_v23  ;;  %v7156_v14 = vunpack.c.l.bf16 %v5193_v62  ;;  %v1758_v30 = vmul.f32 %v5068_v6, %v1618_v52  ;;  %v1842_v57 = vadd.f32 %v5119_v48, %v1701_v16 }
 0x2db   : > { %v7157_v61 = vunpack.c.h.bf16 %v5193_v62  ;;  %v1892_v59 = vadd.f32 %v5119_v48, %v1751_v19  ;;  %v1894_v34 = vadd.f32 %v5119_v48, %v1753_v45  ;;  %v2096_v12 = vpack.c.bf16 %v2018_v8, %v2016_v46  ;;  %v1504_v19 = vld [vmem:[#allocation2 + $0x1c8] sm:$0xff]  ;;  %v5577_v46 = vld [vmem:[#allocation2 + $0xf0] sm:$0xff] }
 0x2dc   : > { %v1704_v63 = vmul.f32 %v5068_v6, %v7156_v14  ;;  %v1615_v58 = vunpack.c.l.bf16 %v1499_v18  ;;  %v1617_v24 = vunpack.c.h.bf16 %v1499_v18  ;;  %v1620_v27 = vunpack.c.l.bf16 %v1502_v2 }
 0x2dd   : > { %v1706_v9 = vmul.f32 %v5068_v6, %v7157_v61  ;;  %v2099_v0 = vpack.c.bf16 %v2023_v5, %v2021_v15  ;;  %v1897_v36 = vadd.f32 %v5123_v32, %v1756_v29  ;;  %v1899_v38 = vadd.f32 %v5123_v32, %v1758_v30  ;;  %2481 = vmatmul.mubr.bf16.gmra.mrb[32].mxu1 %v2096_v12 }
 0x2de   : > { %v1622_v44 = vunpack.c.h.bf16 %v1502_v2  ;;  %v2070_v62 = vpack.c.bf16 %v1966_v26, %v1964_v35  ;;  %v1968_v60 = vmax.f32 %v1840_v41, 0.0  ;;  %v1845_v13 = vadd.f32 %v5123_v32, %v1704_v63 }
 0x2df   : > { %v7158_v21 = vunpack.c.l.bf16 %v5199_v1  ;;  %v1847_v4 = vadd.f32 %v5123_v32, %v1706_v9  ;;  %v7159_v40 = vunpack.c.h.bf16 %v5199_v1  ;;  %v2020_v42 = vmax.f32 %v1892_v59, 0.0  ;;  %2490 = vmatprep.mubr.bf16.mxu1 %v2099_v0  ;;  %v1503_v0 = vld [vmem:[#allocation2 + $0x1c0] sm:$0xff] }
 0x2e0   : > { %v2022_v50 = vmax.f32 %v1894_v34, 0.0  ;;  %v2073_v10 = vpack.c.bf16 %v1971_v22, %v1969_v3  ;;  %v1755_v11 = vmul.f32 %v5064_v37, %v1615_v58  ;;  %v1757_v35 = vmul.f32 %v5064_v37, %v1617_v24  ;;  %2351 = vmatmul.mubr.bf16.gmra.mrb[44].mxu0 %v2070_v62 }
 0x2e1   : > { %v1703_v28 = vmul.f32 %v5064_v37, %v7158_v21  ;;  %v1705_v33 = vmul.f32 %v5064_v37, %v7159_v40  ;;  %v1760_v54 = vmul.f32 %v5068_v6, %v1620_v27  ;;  %v1970_v17 = vmax.f32 %v1842_v57, 0.0 }
 0x2e2   : > { %v2025_v43 = vmax.f32 %v1897_v36, 0.0  ;;  %v2027_v49 = vmax.f32 %v1899_v38, 0.0  ;;  %v1762_v23 = vmul.f32 %v5068_v6, %v1622_v44  ;;  %v1973_v1 = vmax.f32 %v1845_v13, 0.0  ;;  %2360 = vmatprep.mubr.bf16.mxu0 %v2073_v10 }
 0x2e3   : > { %v1844_v51 = vadd.f32 %v5119_v48, %v1703_v28  ;;  %v7160_v20 = vunpack.c.l.bf16 %v5217_v56  ;;  %v7161_v16 = vunpack.c.h.bf16 %v5217_v56  ;;  %v1975_v45 = vmax.f32 %v1847_v4, 0.0 }
 0x2e4   : > { %v1846_v26 = vadd.f32 %v5119_v48, %v1705_v33  ;;  %v2098_v8 = vpack.c.bf16 %v2022_v50, %v2020_v42  ;;  %v1619_v52 = vunpack.c.l.bf16 %v1501_v7  ;;  %v1896_v3 = vadd.f32 %v5119_v48, %v1755_v11 }
 0x2e5   : > { %v1708_v25 = vmul.f32 %v5068_v6, %v7160_v20  ;;  %v1710_v53 = vmul.f32 %v5068_v6, %v7161_v16  ;;  %v1898_v15 = vadd.f32 %v5119_v48, %v1757_v35  ;;  %v1901_v5 = vadd.f32 %v5123_v32, %v1760_v54 }
 0x2e6   : > { %v1621_v29 = vunpack.c.h.bf16 %v1501_v7  ;;  %v2101_v56 = vpack.c.bf16 %v2027_v49, %v2025_v43  ;;  %v1903_v18 = vadd.f32 %v5123_v32, %v1762_v23  ;;  %v1624_v2 = vunpack.c.l.bf16 %v1504_v19  ;;  %2491 = vmatmul.mubr.bf16.gmra.mrb[36].mxu1 %v2098_v8 }
 0x2e7   : > { %v1626_v22 = vunpack.c.h.bf16 %v1504_v19  ;;  %v2072_v41 = vpack.c.bf16 %v1970_v17, %v1968_v60  ;;  %v1849_v14 = vadd.f32 %v5123_v32, %v1708_v25  ;;  %v1851_v63 = vadd.f32 %v5123_v32, %v1710_v53  ;;  %v1506_v60 = vld [vmem:[#allocation2 + $0x1d8] sm:$0xff] }
 0x2e8   : > { %v1571_v30 = vunpack.c.l.bf16 %v5577_v46  ;;  %v2075_v57 = vpack.c.bf16 %v1975_v45, %v1973_v1  ;;  %v1972_v61 = vmax.f32 %v1844_v51, 0.0  ;;  %v1974_v9 = vmax.f32 %v1846_v26, 0.0  ;;  %2500 = vmatprep.mubr.bf16.mxu1 %v2101_v56  ;;  %v1505_v26 = vld [vmem:[#allocation2 + $0x1d0] sm:$0xff]  ;;  %v1508_v56 = vld [vmem:[#allocation2 + $0x1e8] sm:$0xff] }
 0x2e9   : > { %v1759_v59 = vmul.f32 %v5064_v37, %v1619_v52  ;;  %v7162_v34 = vunpack.c.l.bf16 %v5225_v47  ;;  %v2024_v58 = vmax.f32 %v1896_v3, 0.0  ;;  %v2026_v24 = vmax.f32 %v1898_v15, 0.0  ;;  %2361 = vmatmul.mubr.bf16.gmra.mrb[48].mxu0 %v2072_v41 }
 0x2ea   : > { %v1761_v27 = vmul.f32 %v5064_v37, %v1621_v29  ;;  %v2029_v36 = vmax.f32 %v1901_v5, 0.0  ;;  %v2031_v38 = vmax.f32 %v1903_v18, 0.0  ;;  %v1764_v44 = vmul.f32 %v5068_v6, %v1624_v2  ;;  %2370 = vmatprep.mubr.bf16.mxu0 %v2075_v57 }
 0x2eb   : > { %v1707_v12 = vmul.f32 %v5064_v37, %v7162_v34  ;;  %v1766_v62 = vmul.f32 %v5068_v6, %v1626_v22  ;;  %v1977_v13 = vmax.f32 %v1849_v14, 0.0  ;;  %v1979_v21 = vmax.f32 %v1851_v63, 0.0 }
 0x2ec   : > { %v7163_v28 = vunpack.c.h.bf16 %v5225_v47  ;;  %v1712_v40 = vmul.f32 %v5068_v6, %v1572_v31  ;;  %v1714_v33 = vmul.f32 %v5068_v6, %v1574_v39  ;;  %v1900_v42 = vadd.f32 %v5119_v48, %v1759_v59 }
 0x2ed   : > { %v1623_v50 = vunpack.c.l.bf16 %v1503_v0  ;;  %v1625_v10 = vunpack.c.h.bf16 %v1503_v0  ;;  %v2100_v11 = vpack.c.bf16 %v2026_v24, %v2024_v58  ;;  %v1902_v35 = vadd.f32 %v5119_v48, %v1761_v27 }
 0x2ee   : > { %v1709_v4 = vmul.f32 %v5064_v37, %v7163_v28  ;;  %v1628_v47 = vunpack.c.l.bf16 %v1506_v60  ;;  %v1630_v54 = vunpack.c.h.bf16 %v1506_v60  ;;  %v1848_v7 = vadd.f32 %v5119_v48, %v1707_v12  ;;  %v1510_v28 = vld [vmem:[#allocation2 + $0x1f8] sm:$0xff] }
 0x2ef   : > { %v2103_v17 = vpack.c.bf16 %v2031_v38, %v2029_v36  ;;  %v1905_v31 = vadd.f32 %v5123_v32, %v1764_v44  ;;  %v1907_v43 = vadd.f32 %v5123_v32, %v1766_v62  ;;  %v2074_v55 = vpack.c.bf16 %v1974_v9, %v1972_v61  ;;  %2501 = vmatmul.mubr.bf16.gmra.mrb[40].mxu1 %v2100_v11 }
 0x2f0   : > { %v1850_v39 = vadd.f32 %v5119_v48, %v1709_v4  ;;  %v1853_v49 = vadd.f32 %v5123_v32, %v1712_v40  ;;  %v1573_v23 = vunpack.c.h.bf16 %v5577_v46  ;;  %v2077_v1 = vpack.c.bf16 %v1979_v21, %v1977_v13  ;;  %v1507_v21 = vld [vmem:[#allocation2 + $0x1e0] sm:$0xff] }
 0x2f1   : > { %v1855_v51 = vadd.f32 %v5123_v32, %v1714_v33  ;;  %v1763_v20 = vmul.f32 %v5064_v37, %v1623_v50  ;;  %v1765_v25 = vmul.f32 %v5064_v37, %v1625_v10  ;;  %v2028_v16 = vmax.f32 %v1900_v42, 0.0  ;;  %2510 = vmatprep.mubr.bf16.mxu1 %v2103_v17  ;;  %2371 = vmatmul.mubr.bf16.gmra.mrb[52].mxu0 %v2074_v55 }
 0x2f2   : > { %v2030_v53 = vmax.f32 %v1902_v35, 0.0  ;;  %v1768_v19 = vmul.f32 %v5068_v6, %v1628_v47  ;;  %v1770_v45 = vmul.f32 %v5068_v6, %v1630_v54  ;;  %v1976_v8 = vmax.f32 %v1848_v7, 0.0  ;;  %2380 = vmatprep.mubr.bf16.mxu0 %v2077_v1 }
 0x2f3   : > { %v2033_v52 = vmax.f32 %v1905_v31, 0.0  ;;  %v2035_v3 = vmax.f32 %v1907_v43, 0.0  ;;  %v1978_v46 = vmax.f32 %v1850_v39, 0.0  ;;  %v1981_v15 = vmax.f32 %v1853_v49, 0.0 }
 0x2f4   : > { %v1711_v5 = vmul.f32 %v5064_v37, %v1571_v30  ;;  %v1713_v29 = vmul.f32 %v5064_v37, %v1573_v23  ;;  %v1983_v18 = vmax.f32 %v1855_v51, 0.0  ;;  %v1904_v2 = vadd.f32 %v5119_v48, %v1763_v20  ;;  %v1509_v23 = vld [vmem:[#allocation2 + $0x1f0] sm:$0xff] }
 0x2f5   : > { %v1906_v22 = vadd.f32 %v5119_v48, %v1765_v25  ;;  %v1627_v41 = vunpack.c.l.bf16 %v1505_v26  ;;  %v2102_v14 = vpack.c.bf16 %v2030_v53, %v2028_v16  ;;  %v1909_v63 = vadd.f32 %v5123_v32, %v1768_v19 }
 0x2f6   : > { %v1911_v57 = vadd.f32 %v5123_v32, %v1770_v45  ;;  %v1629_v61 = vunpack.c.h.bf16 %v1505_v26  ;;  %v2105_v9 = vpack.c.bf16 %v2035_v3, %v2033_v52  ;;  %v1632_v59 = vunpack.c.l.bf16 %v1508_v56 }
 0x2f7   : > { %v1634_v30 = vunpack.c.h.bf16 %v1508_v56  ;;  %v2076_v34 = vpack.c.bf16 %v1978_v46, %v1976_v8  ;;  %v1852_v12 = vadd.f32 %v5119_v48, %v1711_v5  ;;  %v1854_v58 = vadd.f32 %v5119_v48, %v1713_v29  ;;  %2511 = vmatmul.mubr.bf16.gmra.mrb[44].mxu1 %v2102_v14 }
 0x2f8   : > { %v2032_v24 = vmax.f32 %v1904_v2, 0.0  ;;  %v2034_v27 = vmax.f32 %v1906_v22, 0.0  ;;  %v1767_v0 = vmul.f32 %v5064_v37, %v1627_v41  ;;  %v2079_v36 = vpack.c.bf16 %v1983_v18, %v1981_v15  ;;  %2520 = vmatprep.mubr.bf16.mxu1 %v2105_v9 }
 0x2f9   : > { %v2037_v38 = vmax.f32 %v1909_v63, 0.0  ;;  %v2039_v44 = vmax.f32 %v1911_v57, 0.0  ;;  %v1769_v62 = vmul.f32 %v5064_v37, %v1629_v61  ;;  %v1772_v60 = vmul.f32 %v5068_v6, %v1632_v59  ;;  %2381 = vmatmul.mubr.bf16.gmra.mrb[56].mxu0 %v2076_v34 }
 0x2fa   : > { %v1774_v13 = vmul.f32 %v5068_v6, %v1634_v30  ;;  %v1980_v4 = vmax.f32 %v1852_v12, 0.0  ;;  %v1982_v40 = vmax.f32 %v1854_v58, 0.0  ;;  %v2104_v33 = vpack.c.bf16 %v2034_v27, %v2032_v24  ;;  %2390 = vmatprep.mubr.bf16.mxu0 %v2079_v36 }
 0x2fb   : > { %v1908_v42 = vadd.f32 %v5119_v48, %v1767_v0  ;;  %v2107_v50 = vpack.c.bf16 %v2039_v44, %v2037_v38  ;;  %v1910_v10 = vadd.f32 %v5119_v48, %v1769_v62  ;;  %v1631_v11 = vunpack.c.l.bf16 %v1507_v21 }
 0x2fc   : > { %v1633_v35 = vunpack.c.h.bf16 %v1507_v21  ;;  %v1913_v47 = vadd.f32 %v5123_v32, %v1772_v60  ;;  %v1915_v54 = vadd.f32 %v5123_v32, %v1774_v13  ;;  %v1636_v7 = vunpack.c.l.bf16 %v1510_v28 }
 0x2fd   : > { %v1638_v17 = vunpack.c.h.bf16 %v1510_v28  ;;  %v2078_v31 = vpack.c.bf16 %v1982_v40, %v1980_v4  ;;  %v2036_v43 = vmax.f32 %v1908_v42, 0.0  ;;  %v2038_v55 = vmax.f32 %v1910_v10, 0.0 }
 0x2fe   : > { %v1771_v39 = vmul.f32 %v5064_v37, %v1631_v11  ;;  %v1773_v49 = vmul.f32 %v5064_v37, %v1633_v35  ;;  %v2041_v1 = vmax.f32 %v1913_v47, 0.0  ;;  %v2043_v51 = vmax.f32 %v1915_v54, 0.0 }
 0x2ff   : > { %2521 = vmatmul.mubr.bf16.gmra.mrb[48].mxu1 %v2104_v33  ;;  %v1776_v20 = vmul.f32 %v5068_v6, %v1636_v7  ;;  %v1778_v25 = vmul.f32 %v5068_v6, %v1638_v17  ;;  %v1635_v16 = vunpack.c.l.bf16 %v1509_v23  ;;  %v2106_v53 = vpack.c.bf16 %v2038_v55, %v2036_v43 }
 0x300   : > { %2530 = vmatprep.mubr.bf16.mxu1 %v2107_v50  ;;  %v1912_v19 = vadd.f32 %v5119_v48, %v1771_v39  ;;  %v1914_v45 = vadd.f32 %v5119_v48, %v1773_v49  ;;  %v1637_v26 = vunpack.c.h.bf16 %v1509_v23  ;;  %v2109_v8 = vpack.c.bf16 %v2043_v51, %v2041_v1 }
 0x301   : > { %2391 = vmatmul.mubr.bf16.gmra.mrb[60].mxu0 %v2078_v31  ;;  %v1917_v52 = vadd.f32 %v5123_v32, %v1776_v20  ;;  %v1919_v3 = vadd.f32 %v5123_v32, %v1778_v25  ;;  %v1775_v5 = vmul.f32 %v5064_v37, %v1635_v16 }
 0x302   : > { %v2040_v46 = vmax.f32 %v1912_v19, 0.0  ;;  %v2042_v15 = vmax.f32 %v1914_v45, 0.0  ;;  %v1777_v6 = vmul.f32 %v5064_v37, %v1637_v26 }
 0x303   : > { %v2045_v29 = vmax.f32 %v1917_v52, 0.0  ;;  %v2047_v56 = vmax.f32 %v1919_v3, 0.0  ;;  %v1916_v2 = vadd.f32 %v5119_v48, %v1775_v5 }
 0x304   : > { %v2108_v18 = vpack.c.bf16 %v2042_v15, %v2040_v46  ;;  %v1918_v22 = vadd.f32 %v5119_v48, %v1777_v6 }
 0x305   : > { %v2111_v41 = vpack.c.bf16 %v2047_v56, %v2045_v29  ;;  %v2044_v14 = vmax.f32 %v1916_v2, 0.0 }
 0x306   : > { %v2046_v63 = vmax.f32 %v1918_v22, 0.0 }
 0x307   : > { %2531 = vmatmul.mubr.bf16.gmra.mrb[52].mxu1 %v2106_v53 }
 0x308   : > { %2540 = vmatprep.mubr.bf16.mxu1 %v2109_v8  ;;  %v2110_v32 = vpack.c.bf16 %v2046_v63, %v2044_v14 }
 0x30f   : > { %2541 = vmatmul.mubr.bf16.gmra.mrb[56].mxu1 %v2108_v18 }
 0x310   : > { %2550 = vmatprep.mubr.bf16.mxu1 %v2111_v41 }
 0x317   : > { %2551 = vmatmul.mubr.bf16.gmra.mrb[60].mxu1 %v2110_v32 }
 0x356   : > { %v2242_v57 = vpop.f32.mrb[0].mxu0 }
 0x357   : > { %v2244_v61 = vpop.f32.mrb[1].mxu0  ;;  %v2856_v59 = vmul.f32 %v2242_v57, %v2242_v57 }
 0x358   : > { %v2246_v9 = vpop.f32.mrb[2].mxu0  ;;  %v2857_v58 = vmul.f32 %v2244_v61, %v2244_v61 }
 0x359   : > { %v2561_v37 = vpack.c.bf16 %v2246_v9, %v2242_v57  ;;  %v2692_v30 = vadd.f32 %v2246_v9, %v2242_v57  ;;  %v2858_v34 = vmul.f32 %v2246_v9, %v2246_v9  ;;  %v2248_v12 = vpop.f32.mrb[3].mxu0 }
 0x35a   : > { %v2562_v24 = vpack.c.bf16 %v2248_v12, %v2244_v61  ;;  %v2761_v27 = vadd.f32 %v2248_v12, %v2244_v61  ;;  %v2859_v0 = vmul.f32 %v2248_v12, %v2248_v12 }
 0x35b   : > { %2627 = vst [vmem:[#allocation3] sm:$0xff] %v2561_v37  ;;  %v2984_v48 = vadd.f32 %v2858_v34, %v2856_v59 }
 0x35c   : > { %2628 = vst [vmem:[#allocation3 + $0x8] sm:$0xff] %v2562_v24  ;;  %v3053_v36 = vadd.f32 %v2859_v0, %v2857_v58 }
 0x35e   : > { %v2252_v38 = vpop.f32.mrb[4].mxu0 }
 0x35f   : > { %v2693_v44 = vadd.f32 %v2692_v30, %v2252_v38  ;;  %v2860_v62 = vmul.f32 %v2252_v38, %v2252_v38  ;;  %v2254_v60 = vpop.f32.mrb[5].mxu0 }
 0x360   : > { %v2762_v13 = vadd.f32 %v2761_v27, %v2254_v60  ;;  %v2861_v21 = vmul.f32 %v2254_v60, %v2254_v60  ;;  %v2256_v28 = vpop.f32.mrb[6].mxu0 }
 0x361   : > { %v2985_v4 = vadd.f32 %v2984_v48, %v2860_v62  ;;  %v2563_v40 = vpack.c.bf16 %v2256_v28, %v2252_v38  ;;  %v2694_v33 = vadd.f32 %v2693_v44, %v2256_v28  ;;  %v2862_v42 = vmul.f32 %v2256_v28, %v2256_v28  ;;  %v2258_v50 = vpop.f32.mrb[7].mxu0 }
 0x362   : > { %v3054_v10 = vadd.f32 %v3053_v36, %v2861_v21  ;;  %v2564_v11 = vpack.c.bf16 %v2258_v50, %v2254_v60  ;;  %v2763_v35 = vadd.f32 %v2762_v13, %v2258_v50  ;;  %v2863_v47 = vmul.f32 %v2258_v50, %v2258_v50 }
 0x363   : > { %2629 = vst [vmem:[#allocation3 + $0x10] sm:$0xff] %v2563_v40  ;;  %v2986_v54 = vadd.f32 %v2985_v4, %v2862_v42 }
 0x364   : > { %2630 = vst [vmem:[#allocation3 + $0x18] sm:$0xff] %v2564_v11  ;;  %v3055_v7 = vadd.f32 %v3054_v10, %v2863_v47 }
 0x366   : > { %v2262_v17 = vpop.f32.mrb[8].mxu0 }
 0x367   : > { %v2695_v31 = vadd.f32 %v2694_v33, %v2262_v17  ;;  %v2864_v43 = vmul.f32 %v2262_v17, %v2262_v17  ;;  %v2264_v55 = vpop.f32.mrb[9].mxu0 }
 0x368   : > { %v2764_v39 = vadd.f32 %v2763_v35, %v2264_v55  ;;  %v2865_v49 = vmul.f32 %v2264_v55, %v2264_v55  ;;  %v2266_v23 = vpop.f32.mrb[10].mxu0 }
 0x369   : > { %v2987_v1 = vadd.f32 %v2986_v54, %v2864_v43  ;;  %v2565_v51 = vpack.c.bf16 %v2266_v23, %v2262_v17  ;;  %v2696_v20 = vadd.f32 %v2695_v31, %v2266_v23  ;;  %v2866_v25 = vmul.f32 %v2266_v23, %v2266_v23  ;;  %v2268_v16 = vpop.f32.mrb[11].mxu0  ;;  %v5643_v52 = vpop.f32.mrb[0].mxu1 }
 0x36a   : > { %v3056_v53 = vadd.f32 %v3055_v7, %v2865_v49  ;;  %v2566_v19 = vpack.c.bf16 %v2268_v16, %v2264_v55  ;;  %v2765_v45 = vadd.f32 %v2764_v39, %v2268_v16  ;;  %v2867_v26 = vmul.f32 %v2268_v16, %v2268_v16  ;;  %v5645_v46 = vpop.f32.mrb[1].mxu1 }
 0x36b   : > { %2631 = vst [vmem:[#allocation3 + $0x20] sm:$0xff] %v2565_v51  ;;  %v2988_v8 = vadd.f32 %v2987_v1, %v2866_v25  ;;  %v5647_v15 = vpop.f32.mrb[2].mxu1 }
 0x36c   : > { %2632 = vst [vmem:[#allocation3 + $0x28] sm:$0xff] %v2566_v19  ;;  %v3057_v3 = vadd.f32 %v3056_v53, %v2867_v26  ;;  %v2593_v6 = vpack.c.bf16 %v5647_v15, %v5643_v52  ;;  %v5651_v29 = vpop.f32.mrb[3].mxu1 }
 0x36d   : > { %v2594_v22 = vpack.c.bf16 %v5651_v29, %v5645_v46 }
 0x36e   : > { %v2272_v5 = vpop.f32.mrb[12].mxu0  ;;  %2659 = vst [vmem:[#allocation3 + $0x100] sm:$0xff] %v2593_v6 }
 0x36f   : > { %v2697_v56 = vadd.f32 %v2696_v20, %v2272_v5  ;;  %v2868_v18 = vmul.f32 %v2272_v5, %v2272_v5  ;;  %v2274_v2 = vpop.f32.mrb[13].mxu0  ;;  %2660 = vst [vmem:[#allocation3 + $0x108] sm:$0xff] %v2594_v22 }
 0x370   : > { %v2766_v41 = vadd.f32 %v2765_v45, %v2274_v2  ;;  %v2869_v14 = vmul.f32 %v2274_v2, %v2274_v2  ;;  %v2276_v63 = vpop.f32.mrb[14].mxu0 }
 0x371   : > { %v2989_v32 = vadd.f32 %v2988_v8, %v2868_v18  ;;  %v2567_v57 = vpack.c.bf16 %v2276_v63, %v2272_v5  ;;  %v2698_v61 = vadd.f32 %v2697_v56, %v2276_v63  ;;  %v2870_v9 = vmul.f32 %v2276_v63, %v2276_v63  ;;  %v2278_v59 = vpop.f32.mrb[15].mxu0  ;;  %v5655_v24 = vpop.f32.mrb[4].mxu1 }
 0x372   : > { %v3058_v37 = vadd.f32 %v3057_v3, %v2869_v14  ;;  %v2568_v30 = vpack.c.bf16 %v2278_v59, %v2274_v2  ;;  %v2767_v34 = vadd.f32 %v2766_v41, %v2278_v59  ;;  %v2871_v12 = vmul.f32 %v2278_v59, %v2278_v59  ;;  %v5657_v0 = vpop.f32.mrb[5].mxu1 }
 0x373   : > { %2633 = vst [vmem:[#allocation3 + $0x30] sm:$0xff] %v2567_v57  ;;  %v2990_v58 = vadd.f32 %v2989_v32, %v2870_v9  ;;  %v5659_v48 = vpop.f32.mrb[6].mxu1 }
 0x374   : > { %2634 = vst [vmem:[#allocation3 + $0x38] sm:$0xff] %v2568_v30  ;;  %v3059_v27 = vadd.f32 %v3058_v37, %v2871_v12  ;;  %v2595_v38 = vpack.c.bf16 %v5659_v48, %v5655_v24  ;;  %v5663_v44 = vpop.f32.mrb[7].mxu1 }
 0x375   : > { %v2596_v21 = vpack.c.bf16 %v5663_v44, %v5657_v0 }
 0x376   : > { %v2282_v36 = vpop.f32.mrb[16].mxu0  ;;  %2661 = vst [vmem:[#allocation3 + $0x110] sm:$0xff] %v2595_v38 }
 0x377   : > { %v2699_v62 = vadd.f32 %v2698_v61, %v2282_v36  ;;  %v2872_v60 = vmul.f32 %v2282_v36, %v2282_v36  ;;  %v2284_v13 = vpop.f32.mrb[17].mxu0  ;;  %2662 = vst [vmem:[#allocation3 + $0x118] sm:$0xff] %v2596_v21 }
 0x378   : > { %v2768_v28 = vadd.f32 %v2767_v34, %v2284_v13  ;;  %v2873_v4 = vmul.f32 %v2284_v13, %v2284_v13  ;;  %v2286_v40 = vpop.f32.mrb[18].mxu0 }
 0x379   : > { %v2991_v33 = vadd.f32 %v2990_v58, %v2872_v60  ;;  %v2569_v42 = vpack.c.bf16 %v2286_v40, %v2282_v36  ;;  %v2700_v50 = vadd.f32 %v2699_v62, %v2286_v40  ;;  %v2874_v10 = vmul.f32 %v2286_v40, %v2286_v40  ;;  %v2288_v11 = vpop.f32.mrb[19].mxu0  ;;  %v5667_v31 = vpop.f32.mrb[8].mxu1 }
 0x37a   : > { %v3060_v35 = vadd.f32 %v3059_v27, %v2873_v4  ;;  %v2570_v47 = vpack.c.bf16 %v2288_v11, %v2284_v13  ;;  %v2769_v54 = vadd.f32 %v2768_v28, %v2288_v11  ;;  %v2875_v7 = vmul.f32 %v2288_v11, %v2288_v11  ;;  %v5669_v55 = vpop.f32.mrb[9].mxu1 }
 0x37b   : > { %2635 = vst [vmem:[#allocation3 + $0x40] sm:$0xff] %v2569_v42  ;;  %v2992_v17 = vadd.f32 %v2991_v33, %v2874_v10  ;;  %v5671_v39 = vpop.f32.mrb[10].mxu1 }
 0x37c   : > { %2636 = vst [vmem:[#allocation3 + $0x48] sm:$0xff] %v2570_v47  ;;  %v3061_v43 = vadd.f32 %v3060_v35, %v2875_v7  ;;  %v2597_v23 = vpack.c.bf16 %v5671_v39, %v5667_v31  ;;  %v5675_v1 = vpop.f32.mrb[11].mxu1 }
 0x37d   : > { %v2598_v16 = vpack.c.bf16 %v5675_v1, %v5669_v55 }
 0x37e   : > { %v2292_v49 = vpop.f32.mrb[20].mxu0  ;;  %2663 = vst [vmem:[#allocation3 + $0x120] sm:$0xff] %v2597_v23 }
 0x37f   : > { %v2701_v51 = vadd.f32 %v2700_v50, %v2292_v49  ;;  %v2876_v20 = vmul.f32 %v2292_v49, %v2292_v49  ;;  %v2294_v25 = vpop.f32.mrb[21].mxu0  ;;  %2664 = vst [vmem:[#allocation3 + $0x128] sm:$0xff] %v2598_v16 }
 0x380   : > { %v2770_v53 = vadd.f32 %v2769_v54, %v2294_v25  ;;  %v2877_v19 = vmul.f32 %v2294_v25, %v2294_v25  ;;  %v2296_v45 = vpop.f32.mrb[22].mxu0 }
 0x381   : > { %v2993_v26 = vadd.f32 %v2992_v17, %v2876_v20  ;;  %v2571_v8 = vpack.c.bf16 %v2296_v45, %v2292_v49  ;;  %v2702_v3 = vadd.f32 %v2701_v51, %v2296_v45  ;;  %v2878_v5 = vmul.f32 %v2296_v45, %v2296_v45  ;;  %v2298_v6 = vpop.f32.mrb[23].mxu0  ;;  %v5679_v14 = vpop.f32.mrb[12].mxu1 }
 0x382   : > { %v3062_v56 = vadd.f32 %v3061_v43, %v2877_v19  ;;  %v2572_v18 = vpack.c.bf16 %v2298_v6, %v2294_v25  ;;  %v2771_v2 = vadd.f32 %v2770_v53, %v2298_v6  ;;  %v2879_v22 = vmul.f32 %v2298_v6, %v2298_v6  ;;  %v5681_v32 = vpop.f32.mrb[13].mxu1 }
 0x383   : > { %2637 = vst [vmem:[#allocation3 + $0x50] sm:$0xff] %v2571_v8  ;;  %v2994_v41 = vadd.f32 %v2993_v26, %v2878_v5  ;;  %v5683_v57 = vpop.f32.mrb[14].mxu1 }
 0x384   : > { %2638 = vst [vmem:[#allocation3 + $0x58] sm:$0xff] %v2572_v18  ;;  %v3063_v63 = vadd.f32 %v3062_v56, %v2879_v22  ;;  %v2599_v9 = vpack.c.bf16 %v5683_v57, %v5679_v14  ;;  %v5687_v59 = vpop.f32.mrb[15].mxu1 }
 0x385   : > { %v2600_v12 = vpack.c.bf16 %v5687_v59, %v5681_v32 }
 0x386   : > { %v2302_v61 = vpop.f32.mrb[24].mxu0  ;;  %2665 = vst [vmem:[#allocation3 + $0x130] sm:$0xff] %v2599_v9 }
 0x387   : > { %v2703_v37 = vadd.f32 %v2702_v3, %v2302_v61  ;;  %v2880_v30 = vmul.f32 %v2302_v61, %v2302_v61  ;;  %v2304_v34 = vpop.f32.mrb[25].mxu0  ;;  %2666 = vst [vmem:[#allocation3 + $0x138] sm:$0xff] %v2600_v12 }
 0x388   : > { %v2772_v58 = vadd.f32 %v2771_v2, %v2304_v34  ;;  %v2881_v27 = vmul.f32 %v2304_v34, %v2304_v34  ;;  %v2306_v36 = vpop.f32.mrb[26].mxu0 }
 0x389   : > { %v2995_v38 = vadd.f32 %v2994_v41, %v2880_v30  ;;  %v2573_v62 = vpack.c.bf16 %v2306_v36, %v2302_v61  ;;  %v2704_v60 = vadd.f32 %v2703_v37, %v2306_v36  ;;  %v2882_v13 = vmul.f32 %v2306_v36, %v2306_v36  ;;  %v2308_v21 = vpop.f32.mrb[27].mxu0 }
 0x38a   : > { %v3064_v28 = vadd.f32 %v3063_v63, %v2881_v27  ;;  %v2574_v4 = vpack.c.bf16 %v2308_v21, %v2304_v34  ;;  %v2773_v40 = vadd.f32 %v2772_v58, %v2308_v21  ;;  %v2883_v33 = vmul.f32 %v2308_v21, %v2308_v21 }
 0x38b   : > { %2639 = vst [vmem:[#allocation3 + $0x60] sm:$0xff] %v2573_v62  ;;  %v2996_v42 = vadd.f32 %v2995_v38, %v2882_v13 }
 0x38c   : > { %2640 = vst [vmem:[#allocation3 + $0x68] sm:$0xff] %v2574_v4  ;;  %v3065_v10 = vadd.f32 %v3064_v28, %v2883_v33 }
 0x38d   : > { %v5691_v50 = vpop.f32.mrb[16].mxu1 }
 0x38e   : > { %v5693_v11 = vpop.f32.mrb[17].mxu1  ;;  %v2312_v47 = vpop.f32.mrb[28].mxu0 }
 0x38f   : > { %v5695_v35 = vpop.f32.mrb[18].mxu1  ;;  %v2705_v17 = vadd.f32 %v2704_v60, %v2312_v47  ;;  %v2884_v43 = vmul.f32 %v2312_v47, %v2312_v47  ;;  %v2314_v49 = vpop.f32.mrb[29].mxu0 }
 0x390   : > { %v2601_v54 = vpack.c.bf16 %v5695_v35, %v5691_v50  ;;  %v5699_v7 = vpop.f32.mrb[19].mxu1  ;;  %v2774_v51 = vadd.f32 %v2773_v40, %v2314_v49  ;;  %v2885_v20 = vmul.f32 %v2314_v49, %v2314_v49  ;;  %v2316_v25 = vpop.f32.mrb[30].mxu0 }
 0x391   : > { %v2602_v23 = vpack.c.bf16 %v5699_v7, %v5693_v11  ;;  %v2997_v16 = vadd.f32 %v2996_v42, %v2884_v43  ;;  %v2575_v53 = vpack.c.bf16 %v2316_v25, %v2312_v47  ;;  %v2706_v19 = vadd.f32 %v2705_v17, %v2316_v25  ;;  %v2318_v26 = vpop.f32.mrb[31].mxu0 }
 0x392   : > { %2667 = vst [vmem:[#allocation3 + $0x140] sm:$0xff] %v2601_v54  ;;  %v2886_v45 = vmul.f32 %v2316_v25, %v2316_v25  ;;  %v3066_v8 = vadd.f32 %v3065_v10, %v2885_v20  ;;  %v2576_v3 = vpack.c.bf16 %v2318_v26, %v2314_v49  ;;  %v2775_v5 = vadd.f32 %v2774_v51, %v2318_v26 }
 0x393   : > { %2668 = vst [vmem:[#allocation3 + $0x148] sm:$0xff] %v2602_v23  ;;  %v2887_v6 = vmul.f32 %v2318_v26, %v2318_v26  ;;  %2641 = vst [vmem:[#allocation3 + $0x70] sm:$0xff] %v2575_v53 }
 0x394   : > { %v2998_v56 = vadd.f32 %v2997_v16, %v2886_v45  ;;  %2642 = vst [vmem:[#allocation3 + $0x78] sm:$0xff] %v2576_v3 }
 0x395   : > { %v3067_v2 = vadd.f32 %v3066_v8, %v2887_v6 }
 0x396   : > { %v5703_v18 = vpop.f32.mrb[20].mxu1  ;;  %v2322_v63 = vpop.f32.mrb[32].mxu0 }
 0x397   : > { %v5705_v22 = vpop.f32.mrb[21].mxu1  ;;  %v2707_v37 = vadd.f32 %v2706_v19, %v2322_v63  ;;  %v2888_v30 = vmul.f32 %v2322_v63, %v2322_v63  ;;  %v2324_v34 = vpop.f32.mrb[33].mxu0 }
 0x398   : > { %v5707_v41 = vpop.f32.mrb[22].mxu1  ;;  %v2776_v58 = vadd.f32 %v2775_v5, %v2324_v34  ;;  %v2889_v27 = vmul.f32 %v2324_v34, %v2324_v34  ;;  %v2326_v36 = vpop.f32.mrb[34].mxu0 }
 0x399   : > { %v2603_v61 = vpack.c.bf16 %v5707_v41, %v5703_v18  ;;  %v5711_v9 = vpop.f32.mrb[23].mxu1  ;;  %v2999_v38 = vadd.f32 %v2998_v56, %v2888_v30  ;;  %v2577_v62 = vpack.c.bf16 %v2326_v36, %v2322_v63  ;;  %v2708_v60 = vadd.f32 %v2707_v37, %v2326_v36  ;;  %v2328_v21 = vpop.f32.mrb[35].mxu0 }
 0x39a   : > { %v2604_v12 = vpack.c.bf16 %v5711_v9, %v5705_v22  ;;  %v2890_v13 = vmul.f32 %v2326_v36, %v2326_v36  ;;  %v3068_v28 = vadd.f32 %v3067_v2, %v2889_v27  ;;  %v2578_v4 = vpack.c.bf16 %v2328_v21, %v2324_v34 }
 0x39b   : > { %2669 = vst [vmem:[#allocation3 + $0x150] sm:$0xff] %v2603_v61  ;;  %v2777_v40 = vadd.f32 %v2776_v58, %v2328_v21  ;;  %v2891_v33 = vmul.f32 %v2328_v21, %v2328_v21  ;;  %2643 = vst [vmem:[#allocation3 + $0x80] sm:$0xff] %v2577_v62 }
 0x39c   : > { %2670 = vst [vmem:[#allocation3 + $0x158] sm:$0xff] %v2604_v12  ;;  %v3000_v42 = vadd.f32 %v2999_v38, %v2890_v13  ;;  %2644 = vst [vmem:[#allocation3 + $0x88] sm:$0xff] %v2578_v4 }
 0x39d   : > { %v3069_v47 = vadd.f32 %v3068_v28, %v2891_v33 }
 0x3a0   : > { %v5715_v10 = vpop.f32.mrb[24].mxu1  ;;  %v2332_v43 = vpop.f32.mrb[36].mxu0 }
 0x3a1   : > { %v5717_v54 = vpop.f32.mrb[25].mxu1  ;;  %v2709_v51 = vadd.f32 %v2708_v60, %v2332_v43  ;;  %v2892_v20 = vmul.f32 %v2332_v43, %v2332_v43  ;;  %v2334_v25 = vpop.f32.mrb[37].mxu0 }
 0x3a2   : > { %v5719_v17 = vpop.f32.mrb[26].mxu1  ;;  %v2778_v53 = vadd.f32 %v2777_v40, %v2334_v25  ;;  %v2893_v19 = vmul.f32 %v2334_v25, %v2334_v25  ;;  %v2336_v45 = vpop.f32.mrb[38].mxu0 }
 0x3a3   : > { %v2605_v49 = vpack.c.bf16 %v5719_v17, %v5715_v10  ;;  %v5723_v23 = vpop.f32.mrb[27].mxu1  ;;  %v3001_v26 = vadd.f32 %v3000_v42, %v2892_v20  ;;  %v2579_v8 = vpack.c.bf16 %v2336_v45, %v2332_v43  ;;  %v2710_v3 = vadd.f32 %v2709_v51, %v2336_v45  ;;  %v2338_v6 = vpop.f32.mrb[39].mxu0 }
 0x3a4   : > { %v2606_v16 = vpack.c.bf16 %v5723_v23, %v5717_v54  ;;  %v2894_v5 = vmul.f32 %v2336_v45, %v2336_v45  ;;  %v3070_v56 = vadd.f32 %v3069_v47, %v2893_v19  ;;  %v2580_v2 = vpack.c.bf16 %v2338_v6, %v2334_v25 }
 0x3a5   : > { %2671 = vst [vmem:[#allocation3 + $0x160] sm:$0xff] %v2605_v49  ;;  %v2779_v63 = vadd.f32 %v2778_v53, %v2338_v6  ;;  %v2895_v61 = vmul.f32 %v2338_v6, %v2338_v6  ;;  %2645 = vst [vmem:[#allocation3 + $0x90] sm:$0xff] %v2579_v8 }
 0x3a6   : > { %2672 = vst [vmem:[#allocation3 + $0x168] sm:$0xff] %v2606_v16  ;;  %v3002_v37 = vadd.f32 %v3001_v26, %v2894_v5  ;;  %2646 = vst [vmem:[#allocation3 + $0x98] sm:$0xff] %v2580_v2 }
 0x3a7   : > { %v3071_v34 = vadd.f32 %v3070_v56, %v2895_v61 }
 0x3a8   : > { %v5727_v30 = vpop.f32.mrb[28].mxu1  ;;  %v2342_v27 = vpop.f32.mrb[40].mxu0 }
 0x3a9   : > { %v5729_v12 = vpop.f32.mrb[29].mxu1  ;;  %v2711_v62 = vadd.f32 %v2710_v3, %v2342_v27  ;;  %v2896_v60 = vmul.f32 %v2342_v27, %v2342_v27  ;;  %v2344_v13 = vpop.f32.mrb[41].mxu0 }
 0x3aa   : > { %v5731_v58 = vpop.f32.mrb[30].mxu1  ;;  %v2780_v28 = vadd.f32 %v2779_v63, %v2344_v13  ;;  %v2897_v4 = vmul.f32 %v2344_v13, %v2344_v13  ;;  %v2346_v40 = vpop.f32.mrb[42].mxu0 }
 0x3ab   : > { %v2607_v36 = vpack.c.bf16 %v5731_v58, %v5727_v30  ;;  %v5735_v38 = vpop.f32.mrb[31].mxu1  ;;  %v3003_v33 = vadd.f32 %v3002_v37, %v2896_v60  ;;  %v2581_v42 = vpack.c.bf16 %v2346_v40, %v2342_v27  ;;  %v2712_v47 = vadd.f32 %v2711_v62, %v2346_v40  ;;  %v2348_v49 = vpop.f32.mrb[43].mxu0 }
 0x3ac   : > { %v2608_v21 = vpack.c.bf16 %v5735_v38, %v5729_v12  ;;  %v2898_v43 = vmul.f32 %v2346_v40, %v2346_v40  ;;  %v3072_v51 = vadd.f32 %v3071_v34, %v2897_v4  ;;  %v2582_v20 = vpack.c.bf16 %v2348_v49, %v2344_v13 }
 0x3ad   : > { %2673 = vst [vmem:[#allocation3 + $0x170] sm:$0xff] %v2607_v36  ;;  %v2781_v25 = vadd.f32 %v2780_v28, %v2348_v49  ;;  %v2899_v16 = vmul.f32 %v2348_v49, %v2348_v49  ;;  %2647 = vst [vmem:[#allocation3 + $0xa0] sm:$0xff] %v2581_v42 }
 0x3ae   : > { %2674 = vst [vmem:[#allocation3 + $0x178] sm:$0xff] %v2608_v21  ;;  %v3004_v53 = vadd.f32 %v3003_v33, %v2898_v43  ;;  %2648 = vst [vmem:[#allocation3 + $0xa8] sm:$0xff] %v2582_v20 }
 0x3af   : > { %v3073_v45 = vadd.f32 %v3072_v51, %v2899_v16 }
 0x3b0   : > { %v5739_v19 = vpop.f32.mrb[32].mxu1 }
 0x3b1   : > { %v5741_v26 = vpop.f32.mrb[33].mxu1 }
 0x3b2   : > { %v5743_v8 = vpop.f32.mrb[34].mxu1 }
 0x3b3   : > { %v2352_v3 = vpop.f32.mrb[44].mxu0  ;;  %v2609_v5 = vpack.c.bf16 %v5743_v8, %v5739_v19  ;;  %v5747_v6 = vpop.f32.mrb[35].mxu1 }
 0x3b4   : > { %v2713_v56 = vadd.f32 %v2712_v47, %v2352_v3  ;;  %v2900_v2 = vmul.f32 %v2352_v3, %v2352_v3  ;;  %v2354_v63 = vpop.f32.mrb[45].mxu0  ;;  %v2610_v61 = vpack.c.bf16 %v5747_v6, %v5741_v26 }
 0x3b5   : > { %v2782_v37 = vadd.f32 %v2781_v25, %v2354_v63  ;;  %v2901_v34 = vmul.f32 %v2354_v63, %v2354_v63  ;;  %v2356_v27 = vpop.f32.mrb[46].mxu0  ;;  %2675 = vst [vmem:[#allocation3 + $0x180] sm:$0xff] %v2609_v5 }
 0x3b6   : > { %v3005_v36 = vadd.f32 %v3004_v53, %v2900_v2  ;;  %v2583_v62 = vpack.c.bf16 %v2356_v27, %v2352_v3  ;;  %v2714_v60 = vadd.f32 %v2713_v56, %v2356_v27  ;;  %v2902_v13 = vmul.f32 %v2356_v27, %v2356_v27  ;;  %v2358_v21 = vpop.f32.mrb[47].mxu0  ;;  %2676 = vst [vmem:[#allocation3 + $0x188] sm:$0xff] %v2610_v61 }
 0x3b7   : > { %v3074_v28 = vadd.f32 %v3073_v45, %v2901_v34  ;;  %v2584_v4 = vpack.c.bf16 %v2358_v21, %v2354_v63  ;;  %v2783_v40 = vadd.f32 %v2782_v37, %v2358_v21  ;;  %v2903_v33 = vmul.f32 %v2358_v21, %v2358_v21 }
 0x3b8   : > { %2649 = vst [vmem:[#allocation3 + $0xb0] sm:$0xff] %v2583_v62  ;;  %v3006_v42 = vadd.f32 %v3005_v36, %v2902_v13 }
 0x3b9   : > { %v5751_v47 = vpop.f32.mrb[36].mxu1  ;;  %2650 = vst [vmem:[#allocation3 + $0xb8] sm:$0xff] %v2584_v4  ;;  %v3075_v43 = vadd.f32 %v3074_v28, %v2903_v33 }
 0x3ba   : > { %v5753_v49 = vpop.f32.mrb[37].mxu1 }
 0x3bb   : > { %v5755_v51 = vpop.f32.mrb[38].mxu1 }
 0x3bc   : > { %v2362_v20 = vpop.f32.mrb[48].mxu0  ;;  %v2611_v25 = vpack.c.bf16 %v5755_v51, %v5751_v47  ;;  %v5759_v16 = vpop.f32.mrb[39].mxu1 }
 0x3bd   : > { %7164 = vst [vmem:[#allocation41_spill] sm:$0xff] %v5759_v16  ;;  %v2715_v53 = vadd.f32 %v2714_v60, %v2362_v20  ;;  %v2904_v45 = vmul.f32 %v2362_v20, %v2362_v20  ;;  %v2364_v3 = vpop.f32.mrb[49].mxu0  ;;  %v2612_v5 = vpack.c.bf16 %v5759_v16, %v5753_v49 }
 0x3be   : > { %v2784_v56 = vadd.f32 %v2783_v40, %v2364_v3  ;;  %v2905_v2 = vmul.f32 %v2364_v3, %v2364_v3  ;;  %v2366_v63 = vpop.f32.mrb[50].mxu0  ;;  %2677 = vst [vmem:[#allocation3 + $0x190] sm:$0xff] %v2611_v25 }
 0x3bf   : > { %v3007_v61 = vadd.f32 %v3006_v42, %v2904_v45  ;;  %v2585_v37 = vpack.c.bf16 %v2366_v63, %v2362_v20  ;;  %v2716_v34 = vadd.f32 %v2715_v53, %v2366_v63  ;;  %v2906_v27 = vmul.f32 %v2366_v63, %v2366_v63  ;;  %v2368_v36 = vpop.f32.mrb[51].mxu0  ;;  %2678 = vst [vmem:[#allocation3 + $0x198] sm:$0xff] %v2612_v5 }
 0x3c0   : > { %v3076_v62 = vadd.f32 %v3075_v43, %v2905_v2  ;;  %v2586_v13 = vpack.c.bf16 %v2368_v36, %v2364_v3  ;;  %v2785_v21 = vadd.f32 %v2784_v56, %v2368_v36  ;;  %v2907_v28 = vmul.f32 %v2368_v36, %v2368_v36 }
 0x3c1   : > { %2651 = vst [vmem:[#allocation3 + $0xc0] sm:$0xff] %v2585_v37  ;;  %v3008_v60 = vadd.f32 %v3007_v61, %v2906_v27 }
 0x3c2   : > { %v5763_v4 = vpop.f32.mrb[40].mxu1  ;;  %2652 = vst [vmem:[#allocation3 + $0xc8] sm:$0xff] %v2586_v13  ;;  %v3077_v33 = vadd.f32 %v3076_v62, %v2907_v28 }
 0x3c3   : > { %7165 = vst [vmem:[#allocation42_spill] sm:$0xff] %v5763_v4  ;;  %v5765_v40 = vpop.f32.mrb[41].mxu1 }
 0x3c4   : > { %7166 = vst [vmem:[#allocation43_spill] sm:$0xff] %v5765_v40  ;;  %v5767_v16 = vpop.f32.mrb[42].mxu1  ;;  %v2372_v42 = vpop.f32.mrb[52].mxu0 }
 0x3c5   : > { %7167 = vst [vmem:[#allocation44_spill] sm:$0xff] %v5767_v16  ;;  %v2613_v20 = vpack.c.bf16 %v5767_v16, %v5763_v4  ;;  %v5771_v25 = vpop.f32.mrb[43].mxu1  ;;  %v2717_v43 = vadd.f32 %v2716_v34, %v2372_v42  ;;  %v2908_v53 = vmul.f32 %v2372_v42, %v2372_v42  ;;  %v2374_v45 = vpop.f32.mrb[53].mxu0 }
 0x3c6   : > { %7168 = vst [vmem:[#allocation45_spill] sm:$0xff] %v5771_v25  ;;  %v2614_v3 = vpack.c.bf16 %v5771_v25, %v5765_v40  ;;  %v2786_v5 = vadd.f32 %v2785_v21, %v2374_v45  ;;  %v2909_v56 = vmul.f32 %v2374_v45, %v2374_v45  ;;  %v2376_v2 = vpop.f32.mrb[54].mxu0 }
 0x3c7   : > { %2679 = vst [vmem:[#allocation3 + $0x1a0] sm:$0xff] %v2613_v20  ;;  %v3009_v63 = vadd.f32 %v3008_v60, %v2908_v53  ;;  %v2587_v61 = vpack.c.bf16 %v2376_v2, %v2372_v42  ;;  %v2718_v37 = vadd.f32 %v2717_v43, %v2376_v2  ;;  %v2910_v27 = vmul.f32 %v2376_v2, %v2376_v2  ;;  %v2378_v36 = vpop.f32.mrb[55].mxu0 }
 0x3c8   : > { %2680 = vst [vmem:[#allocation3 + $0x1a8] sm:$0xff] %v2614_v3  ;;  %v3078_v62 = vadd.f32 %v3077_v33, %v2909_v56  ;;  %v2588_v13 = vpack.c.bf16 %v2378_v36, %v2374_v45  ;;  %v2787_v28 = vadd.f32 %v2786_v5, %v2378_v36  ;;  %v2911_v16 = vmul.f32 %v2378_v36, %v2378_v36 }
 0x3c9   : > { %2653 = vst [vmem:[#allocation3 + $0xd0] sm:$0xff] %v2587_v61  ;;  %v3010_v34 = vadd.f32 %v3009_v63, %v2910_v27 }
 0x3ca   : > { %v5775_v4 = vpop.f32.mrb[44].mxu1  ;;  %2654 = vst [vmem:[#allocation3 + $0xd8] sm:$0xff] %v2588_v13  ;;  %v3079_v25 = vadd.f32 %v3078_v62, %v2911_v16 }
 0x3cb   : > { %7169 = vst [vmem:[#allocation46_spill] sm:$0xff] %v5775_v4  ;;  %v5777_v21 = vpop.f32.mrb[45].mxu1 }
 0x3cc   : > { %7170 = vst [vmem:[#allocation47_spill] sm:$0xff] %v5777_v21  ;;  %v5779_v40 = vpop.f32.mrb[46].mxu1  ;;  %v2382_v60 = vpop.f32.mrb[56].mxu0 }
 0x3cd   : > { %7171 = vst [vmem:[#allocation48_spill] sm:$0xff] %v5779_v40  ;;  %v2615_v42 = vpack.c.bf16 %v5779_v40, %v5775_v4  ;;  %v5783_v20 = vpop.f32.mrb[47].mxu1  ;;  %v2719_v33 = vadd.f32 %v2718_v37, %v2382_v60  ;;  %v2912_v43 = vmul.f32 %v2382_v60, %v2382_v60  ;;  %v2384_v53 = vpop.f32.mrb[57].mxu0 }
 0x3ce   : > { %7172 = vst [vmem:[#allocation49_spill] sm:$0xff] %v5783_v20  ;;  %v2616_v45 = vpack.c.bf16 %v5783_v20, %v5777_v21  ;;  %v2788_v3 = vadd.f32 %v2787_v28, %v2384_v53  ;;  %v2913_v5 = vmul.f32 %v2384_v53, %v2384_v53  ;;  %v2386_v56 = vpop.f32.mrb[58].mxu0 }
 0x3cf   : > { %2681 = vst [vmem:[#allocation3 + $0x1b0] sm:$0xff] %v2615_v42  ;;  %v3011_v16 = vadd.f32 %v3010_v34, %v2912_v43  ;;  %v2589_v2 = vpack.c.bf16 %v2386_v56, %v2382_v60  ;;  %v2720_v63 = vadd.f32 %v2719_v33, %v2386_v56  ;;  %v2914_v61 = vmul.f32 %v2386_v56, %v2386_v56  ;;  %v2388_v27 = vpop.f32.mrb[59].mxu0 }
 0x3d0   : > { %2682 = vst [vmem:[#allocation3 + $0x1b8] sm:$0xff] %v2616_v45  ;;  %v3080_v36 = vadd.f32 %v3079_v25, %v2913_v5  ;;  %v2590_v62 = vpack.c.bf16 %v2388_v27, %v2384_v53  ;;  %v2789_v13 = vadd.f32 %v2788_v3, %v2388_v27  ;;  %v2915_v40 = vmul.f32 %v2388_v27, %v2388_v27 }
 0x3d1   : > { %2655 = vst [vmem:[#allocation3 + $0xe0] sm:$0xff] %v2589_v2  ;;  %v3012_v37 = vadd.f32 %v3011_v16, %v2914_v61 }
 0x3d2   : > { %v5787_v4 = vpop.f32.mrb[48].mxu1  ;;  %2656 = vst [vmem:[#allocation3 + $0xe8] sm:$0xff] %v2590_v62  ;;  %v3081_v20 = vadd.f32 %v3080_v36, %v2915_v40 }
 0x3d3   : > { %v5789_v28 = vpop.f32.mrb[49].mxu1 }
 0x3d4   : > { %7173 = vst [vmem:[#allocation50_spill] sm:$0xff] %v5789_v28  ;;  %v5791_v21 = vpop.f32.mrb[50].mxu1  ;;  %v2392_v34 = vpop.f32.mrb[60].mxu0 }
 0x3d5   : > { %7174 = vst [vmem:[#allocation51_spill] sm:$0xff] %v5791_v21  ;;  %v2617_v60 = vpack.c.bf16 %v5791_v21, %v5787_v4  ;;  %v5795_v42 = vpop.f32.mrb[51].mxu1  ;;  %v2721_v25 = vadd.f32 %v2720_v63, %v2392_v34  ;;  %v2916_v33 = vmul.f32 %v2392_v34, %v2392_v34  ;;  %v2394_v43 = vpop.f32.mrb[61].mxu0  ;;  %v2920_v63 = vmul.f32 %v5643_v52, %v5643_v52 }
 0x3d6   : > { %7175 = vst [vmem:[#allocation52_spill] sm:$0xff] %v5795_v42  ;;  %v2618_v53 = vpack.c.bf16 %v5795_v42, %v5789_v28  ;;  %v2790_v45 = vadd.f32 %v2789_v13, %v2394_v43  ;;  %v2917_v3 = vmul.f32 %v2394_v43, %v2394_v43  ;;  %v2396_v5 = vpop.f32.mrb[62].mxu0 }
 0x3d7   : > { %2683 = vst [vmem:[#allocation3 + $0x1c0] sm:$0xff] %v2617_v60  ;;  %v3013_v40 = vadd.f32 %v3012_v37, %v2916_v33  ;;  %v2591_v56 = vpack.c.bf16 %v2396_v5, %v2392_v34  ;;  %v2722_v16 = vadd.f32 %v2721_v25, %v2396_v5  ;;  %v2918_v2 = vmul.f32 %v2396_v5, %v2396_v5  ;;  %v2398_v61 = vpop.f32.mrb[63].mxu0 }
 0x3d8   : > { %2684 = vst [vmem:[#allocation3 + $0x1c8] sm:$0xff] %v2618_v53  ;;  %v3082_v27 = vadd.f32 %v3081_v20, %v2917_v3  ;;  %v2592_v36 = vpack.c.bf16 %v2398_v61, %v2394_v43  ;;  %v2791_v62 = vadd.f32 %v2790_v45, %v2398_v61  ;;  %v2919_v21 = vmul.f32 %v2398_v61, %v2398_v61 }
 0x3d9   : > { %2657 = vst [vmem:[#allocation3 + $0xf0] sm:$0xff] %v2591_v56  ;;  %v2723_v42 = vadd.f32 %v2722_v16, %v5643_v52  ;;  %v3014_v13 = vadd.f32 %v3013_v40, %v2918_v2  ;;  %v2921_v37 = vmul.f32 %v5645_v46, %v5645_v46  ;;  %v2922_v25 = vmul.f32 %v5647_v15, %v5647_v15 }
 0x3da   : > { %v5802_v28 = vpop.f32.mrb[52].mxu1  ;;  %2658 = vst [vmem:[#allocation3 + $0xf8] sm:$0xff] %v2592_v36  ;;  %v2792_v34 = vadd.f32 %v2791_v62, %v5645_v46  ;;  %v3083_v60 = vadd.f32 %v3082_v27, %v2919_v21  ;;  %v2923_v52 = vmul.f32 %v5651_v29, %v5651_v29  ;;  %v2924_v5 = vmul.f32 %v5655_v24, %v5655_v24 }
 0x3db   : > { %v5807_v20 = vpop.f32.mrb[53].mxu1  ;;  %v2724_v33 = vadd.f32 %v2723_v42, %v5647_v15  ;;  %v3015_v43 = vadd.f32 %v3014_v13, %v2920_v63  ;;  %v2925_v56 = vmul.f32 %v5657_v0, %v5657_v0  ;;  %v2926_v2 = vmul.f32 %v5659_v48, %v5659_v48 }
 0x3dc   : > { %v5812_v53 = vpop.f32.mrb[54].mxu1  ;;  %v2793_v45 = vadd.f32 %v2792_v34, %v5651_v29  ;;  %v3084_v3 = vadd.f32 %v3083_v60, %v2921_v37  ;;  %v2928_v63 = vmul.f32 %v5667_v31, %v5667_v31  ;;  %v2929_v34 = vmul.f32 %v5669_v55, %v5669_v55 }
 0x3dd   : > { %v2619_v46 = vpack.c.bf16 %v5812_v53, %v5802_v28  ;;  %v5819_v21 = vpop.f32.mrb[55].mxu1  ;;  %v2725_v40 = vadd.f32 %v2724_v33, %v5655_v24  ;;  %v3016_v15 = vadd.f32 %v3015_v43, %v2922_v25  ;;  %v2927_v24 = vmul.f32 %v5663_v44, %v5663_v44 }
 0x3de   : > { %v2620_v42 = vpack.c.bf16 %v5819_v21, %v5807_v20  ;;  %v2794_v29 = vadd.f32 %v2793_v45, %v5657_v0  ;;  %v3085_v16 = vadd.f32 %v3084_v3, %v2923_v52 }
 0x3df   : > { %2685 = vst [vmem:[#allocation3 + $0x1d0] sm:$0xff] %v2619_v46  ;;  %v2726_v61 = vadd.f32 %v2725_v40, %v5659_v48  ;;  %v3017_v27 = vadd.f32 %v3016_v15, %v2924_v5  ;;  %v2932_v5 = vmul.f32 %v5679_v14, %v5679_v14 }
 0x3e0   : > { %2686 = vst [vmem:[#allocation3 + $0x1d8] sm:$0xff] %v2620_v42  ;;  %v2795_v36 = vadd.f32 %v2794_v29, %v5663_v44  ;;  %v3086_v62 = vadd.f32 %v3085_v16, %v2925_v56  ;;  %v2930_v44 = vmul.f32 %v5671_v39, %v5671_v39  ;;  %v2933_v42 = vmul.f32 %v5681_v32, %v5681_v32 }
 0x3e1   : > { %v2727_v0 = vadd.f32 %v2726_v61, %v5667_v31  ;;  %v3018_v13 = vadd.f32 %v3017_v27, %v2926_v2  ;;  %v2931_v31 = vmul.f32 %v5675_v1, %v5675_v1  ;;  %v2934_v29 = vmul.f32 %v5683_v57, %v5683_v57 }
 0x3e2   : > { %v5838_v37 = vpop.f32.mrb[56].mxu1  ;;  %v2796_v48 = vadd.f32 %v2795_v36, %v5669_v55  ;;  %v3087_v60 = vadd.f32 %v3086_v62, %v2927_v24  ;;  %v2936_v24 = vmul.f32 %v5691_v50, %v5691_v50 }
 0x3e3   : > { %v5843_v25 = vpop.f32.mrb[57].mxu1  ;;  %v2728_v33 = vadd.f32 %v2727_v0, %v5671_v39  ;;  %v3019_v43 = vadd.f32 %v3018_v13, %v2928_v63  ;;  %v2937_v63 = vmul.f32 %v5693_v11, %v5693_v11 }
 0x3e4   : > { %v5848_v52 = vpop.f32.mrb[58].mxu1  ;;  %v2797_v45 = vadd.f32 %v2796_v48, %v5675_v1  ;;  %v3088_v3 = vadd.f32 %v3087_v60, %v2929_v34 }
 0x3e5   : > { %v2621_v55 = vpack.c.bf16 %v5848_v52, %v5838_v37  ;;  %v5855_v46 = vpop.f32.mrb[59].mxu1  ;;  %v2729_v40 = vadd.f32 %v2728_v33, %v5679_v14  ;;  %v3020_v39 = vadd.f32 %v3019_v43, %v2930_v44  ;;  %v2935_v14 = vmul.f32 %v5687_v59, %v5687_v59 }
 0x3e6   : > { %v2622_v15 = vpack.c.bf16 %v5855_v46, %v5843_v25  ;;  %v2798_v1 = vadd.f32 %v2797_v45, %v5681_v32  ;;  %v3089_v56 = vadd.f32 %v3088_v3, %v2931_v31  ;;  %v2940_v31 = vmul.f32 %v5703_v18, %v5703_v18 }
 0x3e7   : > { %2687 = vst [vmem:[#allocation3 + $0x1e0] sm:$0xff] %v2621_v55  ;;  %v2730_v16 = vadd.f32 %v2729_v40, %v5683_v57  ;;  %v3021_v2 = vadd.f32 %v3020_v39, %v2932_v5  ;;  %v2941_v55 = vmul.f32 %v5705_v22, %v5705_v22  ;;  %v2942_v40 = vmul.f32 %v5707_v41, %v5707_v41 }
 0x3e8   : > { %2688 = vst [vmem:[#allocation3 + $0x1e8] sm:$0xff] %v2622_v15  ;;  %v2799_v61 = vadd.f32 %v2798_v1, %v5687_v59  ;;  %v3090_v27 = vadd.f32 %v3089_v56, %v2933_v42  ;;  %v2938_v59 = vmul.f32 %v5695_v35, %v5695_v35  ;;  %v2944_v56 = vmul.f32 %v5715_v10, %v5715_v10 }
 0x3e9   : > { %v3022_v36 = vadd.f32 %v3021_v2, %v2934_v29  ;;  %v2731_v32 = vadd.f32 %v2730_v16, %v5691_v50  ;;  %v2939_v50 = vmul.f32 %v5699_v7, %v5699_v7  ;;  %v2945_v16 = vmul.f32 %v5717_v54, %v5717_v54 }
 0x3ea   : > { %v5874_v62 = vpop.f32.mrb[60].mxu1  ;;  %v3091_v57 = vadd.f32 %v3090_v27, %v2935_v14  ;;  %v2800_v0 = vadd.f32 %v2799_v61, %v5693_v11  ;;  %v2946_v14 = vmul.f32 %v5719_v17, %v5719_v17 }
 0x3eb   : > { %v5879_v13 = vpop.f32.mrb[61].mxu1  ;;  %v2732_v34 = vadd.f32 %v2731_v32, %v5695_v35  ;;  %v3023_v48 = vadd.f32 %v3022_v36, %v2936_v24 }
 0x3ec   : > { %v5884_v60 = vpop.f32.mrb[62].mxu1  ;;  %v2801_v44 = vadd.f32 %v2800_v0, %v5699_v7  ;;  %v3092_v33 = vadd.f32 %v3091_v57, %v2937_v63 }
 0x3ed   : > { %v2623_v43 = vpack.c.bf16 %v5884_v60, %v5874_v62  ;;  %v5891_v11 = vpop.f32.mrb[63].mxu1  ;;  %v2733_v45 = vadd.f32 %v2732_v34, %v5703_v18  ;;  %v3024_v35 = vadd.f32 %v3023_v48, %v2938_v59  ;;  %v2943_v18 = vmul.f32 %v5711_v9, %v5711_v9 }
 0x3ee   : > { %v2624_v3 = vpack.c.bf16 %v5891_v11, %v5879_v13  ;;  %v2802_v7 = vadd.f32 %v2801_v44, %v5705_v22  ;;  %v3093_v5 = vadd.f32 %v3092_v33, %v2939_v50  ;;  %v2952_v44 = vmul.f32 %v5739_v19, %v5739_v19 }
 0x3ef   : > { %2689 = vst [vmem:[#allocation3 + $0x1f0] sm:$0xff] %v2623_v43  ;;  %v2734_v39 = vadd.f32 %v2733_v45, %v5707_v41  ;;  %v3025_v15 = vadd.f32 %v3024_v35, %v2940_v31  ;;  %v2953_v43 = vmul.f32 %v5741_v26, %v5741_v26  ;;  %v2954_v35 = vmul.f32 %v5743_v8, %v5743_v8 }
 0x3f0   : > { %2690 = vst [vmem:[#allocation3 + $0x1f8] sm:$0xff] %v2624_v3  ;;  %v2803_v42 = vadd.f32 %v2802_v7, %v5711_v9  ;;  %v3094_v1 = vadd.f32 %v3093_v5, %v2941_v55  ;;  %v2947_v9 = vmul.f32 %v5723_v23, %v5723_v23  ;;  %v2955_v55 = vmul.f32 %v5747_v6, %v5747_v6 }
 0x3f1   : > { %v2735_v22 = vadd.f32 %v2734_v39, %v5715_v10  ;;  %v3026_v29 = vadd.f32 %v3025_v15, %v2942_v40  ;;  %v2948_v10 = vmul.f32 %v5727_v30, %v5727_v30  ;;  %v2956_v5 = vmul.f32 %v5751_v47, %v5751_v47 }
 0x3f2   : > { %v2804_v2 = vadd.f32 %v2803_v42, %v5717_v54  ;;  %v3095_v41 = vadd.f32 %v3094_v1, %v2943_v18  ;;  %v2949_v54 = vmul.f32 %v5729_v12, %v5729_v12  ;;  %v2957_v39 = vmul.f32 %v5753_v49, %v5753_v49 }
 0x3f3   : > { %v2736_v61 = vadd.f32 %v2735_v22, %v5719_v17  ;;  %v3027_v27 = vadd.f32 %v3026_v29, %v2944_v56  ;;  %v2950_v17 = vmul.f32 %v5731_v58, %v5731_v58  ;;  %v2958_v18 = vmul.f32 %v5755_v51, %v5755_v51 }
 0x3f4   : > { %v2805_v24 = vadd.f32 %v2804_v2, %v5723_v23  ;;  %v3096_v36 = vadd.f32 %v3095_v41, %v2945_v16  ;;  %v2951_v23 = vmul.f32 %v5735_v38, %v5735_v38 }
 0x3f5   : > { %v2737_v32 = vadd.f32 %v2736_v61, %v5727_v30  ;;  %v3028_v63 = vadd.f32 %v3027_v27, %v2946_v14 }
 0x3f6   : > { %v2806_v57 = vadd.f32 %v2805_v24, %v5729_v12  ;;  %v3097_v0 = vadd.f32 %v3096_v36, %v2947_v9  ;;  %v7180_v36 = vld [vmem:[#allocation45_spill] sm:$0xff] }
 0x3f7   : > { %v2738_v59 = vadd.f32 %v2737_v32, %v5731_v58  ;;  %v3029_v34 = vadd.f32 %v3028_v63, %v2948_v10  ;;  %v2963_v32 = vmul.f32 %v7180_v36, %v7180_v36 }
 0x3f8   : > { %v2807_v48 = vadd.f32 %v2806_v57, %v5735_v38  ;;  %v3098_v50 = vadd.f32 %v3097_v0, %v2949_v54  ;;  %v7181_v54 = vld [vmem:[#allocation46_spill] sm:$0xff] }
 0x3f9   : > { %v2739_v30 = vadd.f32 %v2738_v59, %v5739_v19  ;;  %v3030_v33 = vadd.f32 %v3029_v34, %v2950_v17  ;;  %v2964_v0 = vmul.f32 %v7181_v54, %v7181_v54  ;;  %v7182_v59 = vld [vmem:[#allocation47_spill] sm:$0xff] }
 0x3fa   : > { %v2808_v12 = vadd.f32 %v2807_v48, %v5741_v26  ;;  %v3099_v31 = vadd.f32 %v3098_v50, %v2951_v23  ;;  %v2965_v23 = vmul.f32 %v7182_v59, %v7182_v59  ;;  %v7183_v50 = vld [vmem:[#allocation48_spill] sm:$0xff] }
 0x3fb   : > { %v3031_v58 = vadd.f32 %v3030_v33, %v2952_v44  ;;  %v2740_v45 = vadd.f32 %v2739_v30, %v5743_v8  ;;  %v2966_v44 = vmul.f32 %v7183_v50, %v7183_v50 }
 0x3fc   : > { %v3100_v38 = vadd.f32 %v3099_v31, %v2953_v43  ;;  %v2809_v3 = vadd.f32 %v2808_v12, %v5747_v6  ;;  %v7176_v6 = vld [vmem:[#allocation41_spill] sm:$0xff] }
 0x3fd   : > { %v3032_v19 = vadd.f32 %v3031_v58, %v2954_v35  ;;  %v2741_v7 = vadd.f32 %v2740_v45, %v5751_v47  ;;  %v2959_v56 = vmul.f32 %v7176_v6, %v7176_v6  ;;  %v7177_v47 = vld [vmem:[#allocation42_spill] sm:$0xff]  ;;  %v7184_v12 = vld [vmem:[#allocation49_spill] sm:$0xff]  ;;  %v2968_v35 = vmul.f32 %v5787_v4, %v5787_v4 }
 0x3fe   : > { %v3101_v26 = vadd.f32 %v3100_v38, %v2955_v55  ;;  %v2810_v40 = vadd.f32 %v2809_v3, %v5753_v49  ;;  %v2960_v16 = vmul.f32 %v7177_v47, %v7177_v47  ;;  %v7178_v49 = vld [vmem:[#allocation43_spill] sm:$0xff]  ;;  %v2967_v31 = vmul.f32 %v7184_v12, %v7184_v12  ;;  %v7185_v3 = vld [vmem:[#allocation50_spill] sm:$0xff] }
 0x3ff   : > { %v3033_v15 = vadd.f32 %v3032_v19, %v2956_v5  ;;  %v2742_v8 = vadd.f32 %v2741_v7, %v5755_v51  ;;  %v2961_v14 = vmul.f32 %v7178_v49, %v7178_v49  ;;  %v7179_v51 = vld [vmem:[#allocation44_spill] sm:$0xff]  ;;  %v2969_v19 = vmul.f32 %v7185_v3, %v7185_v3  ;;  %v7186_v5 = vld [vmem:[#allocation51_spill] sm:$0xff] }
 0x400   : > { %v3102_v42 = vadd.f32 %v3101_v26, %v2957_v39  ;;  %v2811_v1 = vadd.f32 %v2810_v40, %v7176_v6  ;;  %v2962_v9 = vmul.f32 %v7179_v51, %v7179_v51  ;;  %v2970_v40 = vmul.f32 %v7186_v5, %v7186_v5 }
 0x401   : > { %v3034_v22 = vadd.f32 %v3033_v15, %v2958_v18  ;;  %v2743_v29 = vadd.f32 %v2742_v8, %v7177_v47  ;;  %v7187_v15 = vld [vmem:[#allocation52_spill] sm:$0xff]  ;;  %v2972_v6 = vmul.f32 %v5802_v28, %v5802_v28 }
 0x402   : > { %v3103_v2 = vadd.f32 %v3102_v42, %v2959_v56  ;;  %v2812_v41 = vadd.f32 %v2811_v1, %v7178_v49  ;;  %v2971_v18 = vmul.f32 %v7187_v15, %v7187_v15 }
 0x403   : > { %v3035_v61 = vadd.f32 %v3034_v22, %v2960_v16  ;;  %v2744_v27 = vadd.f32 %v2743_v29, %v7179_v51  ;;  %v2973_v22 = vmul.f32 %v5807_v20, %v5807_v20  ;;  %v2974_v16 = vmul.f32 %v5812_v53, %v5812_v53 }
 0x404   : > { %v3104_v24 = vadd.f32 %v3103_v2, %v2961_v14  ;;  %v2813_v10 = vadd.f32 %v2812_v41, %v7180_v36  ;;  %v2975_v41 = vmul.f32 %v5819_v21, %v5819_v21 }
 0x405   : > { %v3036_v63 = vadd.f32 %v3035_v61, %v2962_v9  ;;  %v2745_v57 = vadd.f32 %v2744_v27, %v7181_v54  ;;  %v2976_v61 = vmul.f32 %v5838_v37, %v5838_v37  ;;  %v2977_v27 = vmul.f32 %v5843_v25, %v5843_v25 }
 0x406   : > { %v3105_v17 = vadd.f32 %v3104_v24, %v2963_v32  ;;  %v2814_v34 = vadd.f32 %v2813_v10, %v7182_v59  ;;  %v2978_v24 = vmul.f32 %v5848_v52, %v5848_v52  ;;  %v2981_v32 = vmul.f32 %v5879_v13, %v5879_v13 }
 0x407   : > { %v3037_v48 = vadd.f32 %v3036_v63, %v2964_v0  ;;  %v2746_v30 = vadd.f32 %v2745_v57, %v7183_v50 }
 0x408   : > { %v3106_v33 = vadd.f32 %v3105_v17, %v2965_v23  ;;  %v2815_v43 = vadd.f32 %v2814_v34, %v7184_v12  ;;  %v2982_v17 = vmul.f32 %v5884_v60, %v5884_v60 }
 0x409   : > { %v3038_v58 = vadd.f32 %v3037_v48, %v2966_v44  ;;  %v2747_v45 = vadd.f32 %v2746_v30, %v5787_v4 }
 0x40a   : > { %v3107_v38 = vadd.f32 %v3106_v33, %v2967_v31  ;;  %v2816_v55 = vadd.f32 %v2815_v43, %v7185_v3 }
 0x40b   : > { %v3039_v7 = vadd.f32 %v3038_v58, %v2968_v35  ;;  %v2748_v26 = vadd.f32 %v2747_v45, %v7186_v5 }
 0x40c   : > { %v3108_v39 = vadd.f32 %v3107_v38, %v2969_v19  ;;  %v2817_v8 = vadd.f32 %v2816_v55, %v7187_v15 }
 0x40d   : > { %v3040_v42 = vadd.f32 %v3039_v7, %v2970_v40  ;;  %v2749_v4 = vadd.f32 %v2748_v26, %v5802_v28 }
 0x40e   : > { %v3109_v1 = vadd.f32 %v3108_v39, %v2971_v18  ;;  %v2818_v56 = vadd.f32 %v2817_v8, %v5807_v20  ;;  %v7188_v18 = vld [vmem:[#allocation39_spill] sm:$0xff] }
 0x40f   : > { %v3041_v47 = vadd.f32 %v3040_v42, %v2972_v6  ;;  %v2750_v29 = vadd.f32 %v2749_v4, %v5812_v53  ;;  %v2691_v6 = vld [vmem:[#allocation5] ss:$2 sm:$0x3] }
 0x410   : > { %v3110_v2 = vadd.f32 %v3109_v1, %v2973_v22  ;;  %v2819_v49 = vadd.f32 %v2818_v56, %v5819_v21  ;;  %v2980_v21 = vmul.f32 %v5874_v62, %v5874_v62  ;;  %v2855_v22 = vld [vmem:[#allocation5 + $0x1] ss:$2 sm:$0x3] }
 0x411   : > { %v3042_v14 = vadd.f32 %v3041_v47, %v2974_v16  ;;  %v2751_v28 = vadd.f32 %v2750_v29, %v5838_v37  ;;  %v2979_v37 = vmul.f32 %v5855_v46, %v5855_v46 }
 0x412   : > { %v3111_v51 = vadd.f32 %v3110_v2, %v2975_v41  ;;  %v2820_v20 = vadd.f32 %v2819_v49, %v5843_v25 }
 0x413   : > { %v3043_v9 = vadd.f32 %v3042_v14, %v2976_v61  ;;  %v2752_v53 = vadd.f32 %v2751_v28, %v5848_v52 }
 0x414   : > { %v3112_v36 = vadd.f32 %v3111_v51, %v2977_v27  ;;  %v2821_v10 = vadd.f32 %v2820_v20, %v5855_v46  ;;  %v2983_v46 = vmul.f32 %v5891_v11, %v5891_v11 }
 0x415   : > { %v3044_v63 = vadd.f32 %v3043_v9, %v2978_v24  ;;  %v2753_v25 = vadd.f32 %v2752_v53, %v5874_v62 }
 0x416   : > { %v3113_v54 = vadd.f32 %v3112_v36, %v2979_v37  ;;  %v2822_v57 = vadd.f32 %v2821_v10, %v5879_v13 }
 0x417   : > { %v3045_v0 = vadd.f32 %v3044_v63, %v2980_v21  ;;  %v2754_v52 = vadd.f32 %v2753_v25, %v5884_v60 }
 0x418   : > { %v3114_v59 = vadd.f32 %v3113_v54, %v2981_v32  ;;  %v2823_v34 = vadd.f32 %v2822_v57, %v5891_v11 }
 0x419   : > { %v2755_v23 = vrot.slane %v2754_v52, 4  ;;  %v3046_v48 = vadd.f32 %v3045_v0, %v2982_v17 }
 0x41a   : > { %v2824_v50 = vrot.slane %v2823_v34, 4  ;;  %v3115_v30 = vadd.f32 %v3114_v59, %v2983_v46 }
 0x41b   : > { %v2756_v62 = vadd.f32 %v2755_v23, %v2754_v52  ;;  %v3047_v44 = vrot.slane %v3046_v48, 4 }
 0x41c   : > { %v2825_v33 = vadd.f32 %v2824_v50, %v2823_v34  ;;  %v3116_v13 = vrot.slane %v3115_v30, 4 }
 0x41d   : > { %v2757_v12 = vrot.slane %v2756_v62, 2  ;;  %v3048_v43 = vadd.f32 %v3047_v44, %v3046_v48 }
 0x41e   : > { %v2826_v31 = vrot.slane %v2825_v33, 2  ;;  %v3117_v58 = vadd.f32 %v3116_v13, %v3115_v30 }
 0x41f   : > { %v2758_v45 = vadd.f32 %v2757_v12, %v2756_v62  ;;  %v3049_v60 = vrot.slane %v3048_v43, 2 }
 0x420   : > { %v2827_v35 = vadd.f32 %v2826_v31, %v2825_v33  ;;  %v3118_v38 = vrot.slane %v3117_v58, 2 }
 0x421   : > { %v2759_v3 = vrot.slane %v2758_v45, 1  ;;  %v3050_v55 = vadd.f32 %v3049_v60, %v3048_v43 }
 0x422   : > { %v2828_v19 = vrot.slane %v2827_v35, 1  ;;  %v3119_v11 = vadd.f32 %v3118_v38, %v3117_v58 }
 0x423   : > { %v2760_v7 = vadd.f32 %v2759_v3, %v2758_v45  ;;  %v3051_v5 = vrot.slane %v3050_v55, 1 }
 0x424   : > { %v2829_v26 = vadd.f32 %v2828_v19, %v2827_v35  ;;  %v3120_v40 = vrot.slane %v3119_v11, 1 }
 0x425   : > { %v3052_v39 = vadd.f32 %v3051_v5, %v3050_v55 }
 0x426   : > { %v2832_v15 = vcombine.low %v2760_v7, %v2829_v26  ;;  %v3121_v8 = vadd.f32 %v3120_v40, %v3119_v11 }
 0x428   : > { %v2839_v42 = vrot.slane %v2832_v15, %v7188_v18  ;;  %v3124_v4 = vcombine.low %v3052_v39, %v3121_v8 }
 0x42a   : > { %v2846_v1 = vrot.slane %v2839_v42, %v7188_v18  ;;  %v3131_v56 = vrot.slane %v3124_v4, %v7188_v18 }
 0x42c   : > { %v2848_v47 = vadd.f32 %v2846_v1, %v2691_v6  ;;  %v3138_v29 = vrot.slane %v3131_v56, %v7188_v18 }
 0x42e   : > { %2853 = vst.msk [vmem:[#allocation5] ss:$2 sm:$0x3] %vm4945_vm1, %v2848_v47  ;;  %v3140_v2 = vadd.f32 %v3138_v29, %v2855_v22 }
 0x430   : > { %3141 = vst.msk [vmem:[#allocation5 + $0x1] ss:$2 sm:$0x3] %vm4945_vm1, %v3140_v2 }
 0x431 PF: > { %p4067_p10 = scmp.ne.s32.totalorder %s4341_s18, 2 }
 0x433   : > { %3145 = sbr.rel (%p4067_p10) target bundleno = 1250 (0x4e2), region = 72 }
 0x43a   : > { %v3150_v49 = vld [vmem:[#allocation5] sm:$0xf]  ;;  %v3169_v41 = vlaneseq  ;;  %v4362_v28 = vmov 1966171168   ;;  %v6040_v20 = vld [vmem:[#allocation3 + $0x8] sm:$0xff]  ;;  %v6042_v27 = vld [vmem:[#allocation3 + $0x10] sm:$0xff] }
 0x43b   : > { %v6036_v14 = vmul.f32 0.001953125, %v3150_v49  ;;  %v3167_v61 = vunpack.c.l.s4 %v4362_v28  ;;  %v6038_v51 = vld [vmem:[#allocation3] sm:$0xff]  ;;  %v6049_v21 = vld [vmem:[#allocation3 + $0x18] sm:$0xff]  ;;  %v6057_v25 = vld [vmem:[#allocation3 + $0x28] sm:$0xff] }
 0x43c   : > { %v6045_v9 = vshrl.u32 %v3169_v41, 7  ;;  %v6055_v63 = vld [vmem:[#allocation3 + $0x20] sm:$0xff]  ;;  %v6063_v17 = vld [vmem:[#allocation3 + $0x30] sm:$0xff]  ;;  %v6065_v59 = vld [vmem:[#allocation3 + $0x38] sm:$0xff]  ;;  %vm6161_vm2 = vcmp.lt.s32.totalorder %v3169_v41, 256 }
 0x43d   : > { %v3153_v36 = vmul.f32 %v6036_v14, %v6036_v14  ;;  %v3168_v10 = vunpack.c.0.s8 %v3167_v61  ;;  %v6072_v50 = vld [vmem:[#allocation3 + $0x40] sm:$0xff]  ;;  %v6074_v30 = vld [vmem:[#allocation3 + $0x48] sm:$0xff]  ;;  %v6080_v12 = vld [vmem:[#allocation3 + $0x50] sm:$0xff] }
 0x43e   : > { %v6082_v43 = vld [vmem:[#allocation3 + $0x58] sm:$0xff]  ;;  %v6088_v35 = vld [vmem:[#allocation3 + $0x60] sm:$0xff]  ;;  %v6090_v38 = vld [vmem:[#allocation3 + $0x68] sm:$0xff] }
 0x43f   : > { %v3155_v34 = vrot.slane %v3153_v36, 7  ;;  %v6068_v46 = vsub.s32 %v3168_v10, %v6045_v9  ;;  %v6096_v7 = vld [vmem:[#allocation3 + $0x70] sm:$0xff]  ;;  %v6101_v15 = vld [vmem:[#allocation3 + $0x78] sm:$0xff]  ;;  %v6103_v8 = vld [vmem:[#allocation3 + $0x80] sm:$0xff] }
 0x440   : > { %v6109_v1 = vld [vmem:[#allocation3 + $0x88] sm:$0xff]  ;;  %v6111_v56 = vld [vmem:[#allocation3 + $0x90] sm:$0xff]  ;;  %v6116_v16 = vld [vmem:[#allocation3 + $0x98] sm:$0xff] }
 0x441   : > { %v3157_v31 = vsub.f32 %v6036_v14, %v3155_v34  ;;  %v6118_v2 = vld [vmem:[#allocation3 + $0xa0] sm:$0xff]  ;;  %v6124_v10 = vld [vmem:[#allocation3 + $0xa8] sm:$0xff]  ;;  %v6126_v34 = vld [vmem:[#allocation3 + $0xb0] sm:$0xff] }
 0x442   : > { %v6132_v22 = vld [vmem:[#allocation3 + $0xb8] sm:$0xff]  ;;  %v6134_v49 = vld [vmem:[#allocation3 + $0xc0] sm:$0xff]  ;;  %v6140_v4 = vld [vmem:[#allocation3 + $0xc8] sm:$0xff] }
 0x443   : > { %v3158_v5 = vadd.f32 1e-05, %v3157_v31  ;;  %v6142_v31 = vld [vmem:[#allocation3 + $0xd0] sm:$0xff]  ;;  %v6148_v18 = vld [vmem:[#allocation3 + $0xd8] sm:$0xff]  ;;  %v6150_v61 = vld [vmem:[#allocation3 + $0xe0] sm:$0xff] }
 0x444   : > { %v6156_v40 = vld [vmem:[#allocation3 + $0xe8] sm:$0xff]  ;;  %v6158_v29 = vld [vmem:[#allocation3 + $0xf0] sm:$0xff]  ;;  %v6169_v36 = vld [vmem:[#allocation3 + $0xf8] sm:$0xff] }
 0x445   : > { %4203 = vrsqrt.f32 %v3158_v5  ;;  %7190 = vst [vmem:[#allocation53_spill] sm:$0xff] %v6158_v29  ;;  %7193 = vst [vmem:[#allocation54_spill] sm:$0xff] %v6169_v36  ;;  %v6171_v39 = vld [vmem:[#allocation3 + $0x100] sm:$0xff]  ;;  %v6177_v55 = vld [vmem:[#allocation3 + $0x108] sm:$0xff] }
 0x446   : > { %7194 = vst [vmem:[#allocation55_spill] sm:$0xff] %v6171_v39  ;;  %7195 = vst [vmem:[#allocation56_spill] sm:$0xff] %v6177_v55  ;;  %v6179_v42 = vld [vmem:[#allocation3 + $0x110] sm:$0xff]  ;;  %v6185_v60 = vld [vmem:[#allocation3 + $0x118] sm:$0xff] }
 0x447   : > { %7196 = vst [vmem:[#allocation57_spill] sm:$0xff] %v6179_v42  ;;  %7197 = vst [vmem:[#allocation58_spill] sm:$0xff] %v6185_v60  ;;  %v6191_v45 = vld [vmem:[#allocation3 + $0x120] sm:$0xff]  ;;  %v6193_v58 = vld [vmem:[#allocation3 + $0x128] sm:$0xff] }
 0x448   : > { %7198 = vst [vmem:[#allocation59_spill] sm:$0xff] %v6191_v45  ;;  %7199 = vst [vmem:[#allocation60_spill] sm:$0xff] %v6193_v58  ;;  %v3151_v47 = vld [vmem:[%s6900_s4] sm:$0xf]  ;;  %v6202_v19 = vld [vmem:[#allocation3 + $0x130] sm:$0xff] }
 0x449   : > { %7200 = vst [vmem:[#allocation61_spill] sm:$0xff] %v6202_v19  ;;  %v6204_v26 = vld [vmem:[#allocation3 + $0x138] sm:$0xff]  ;;  %v6209_v48 = vld [vmem:[#allocation3 + $0x140] sm:$0xff]  ;;  %v6211_v3 = vld [vmem:[#allocation3 + $0x148] sm:$0xff] }
 0x44a   : > { %7201 = vst [vmem:[#allocation62_spill] sm:$0xff] %v6204_v26  ;;  %7202 = vst [vmem:[#allocation63_spill] sm:$0xff] %v6209_v48  ;;  %v6217_v52 = vld [vmem:[#allocation3 + $0x150] sm:$0xff]  ;;  %v6222_v0 = vld [vmem:[#allocation3 + $0x158] sm:$0xff] }
 0x44b   : > { %7203 = vst [vmem:[#allocation64_spill] sm:$0xff] %v6211_v3  ;;  %7204 = vst [vmem:[#allocation65_spill] sm:$0xff] %v6217_v52  ;;  %v6224_v32 = vld [vmem:[#allocation3 + $0x160] sm:$0xff]  ;;  %v6230_v37 = vld [vmem:[#allocation3 + $0x168] sm:$0xff] }
 0x44c   : > { %7205 = vst [vmem:[#allocation66_spill] sm:$0xff] %v6222_v0  ;;  %7206 = vst [vmem:[#allocation67_spill] sm:$0xff] %v6224_v32  ;;  %v6236_v24 = vld [vmem:[#allocation3 + $0x170] sm:$0xff]  ;;  %v6238_v53 = vld [vmem:[#allocation3 + $0x178] sm:$0xff] }
 0x44d   : > { %7207 = vst [vmem:[#allocation68_spill] sm:$0xff] %v6230_v37  ;;  %7208 = vst [vmem:[#allocation69_spill] sm:$0xff] %v6236_v24  ;;  %v6244_v57 = vld [vmem:[#allocation3 + $0x180] sm:$0xff]  ;;  %v6246_v54 = vld [vmem:[#allocation3 + $0x188] sm:$0xff]  ;;  %v7225_v37 = vsub.s32 1, %v6045_v9 }
 0x44e   : > { %7209 = vst [vmem:[#allocation70_spill] sm:$0xff] %v6238_v53  ;;  %7210 = vst [vmem:[#allocation71_spill] sm:$0xff] %v6244_v57  ;;  %v6253_v62 = vld [vmem:[#allocation3 + $0x190] sm:$0xff]  ;;  %v6255_v41 = vld [vmem:[#allocation3 + $0x198] sm:$0xff]  ;;  %v7229_v53 = vunpack.c.h.bf16 %v6040_v20 }
 0x44f   : > { %v4204_v28 = vpop.eup %4203  ;;  %7211 = vst [vmem:[#allocation72_spill] sm:$0xff] %v6246_v54  ;;  %7212 = vst [vmem:[#allocation73_spill] sm:$0xff] %v6253_v62  ;;  %v6268_v32 = vld [vmem:[#allocation3 + $0x1b0] sm:$0xff]  ;;  %v6270_v6 = vld [vmem:[#allocation3 + $0x1b8] sm:$0xff] }
 0x450   : > { %v4068_v13 = vrot.slane %v4204_v28, 9  ;;  %7213 = vst [vmem:[#allocation74_spill] sm:$0xff] %v6255_v41  ;;  %7216 = vst [vmem:[#allocation77_spill] sm:$0xff] %v6268_v32  ;;  %v6276_v24 = vld [vmem:[#allocation3 + $0x1c0] sm:$0xff]  ;;  %v6282_v33 = vld [vmem:[#allocation3 + $0x1c8] sm:$0xff]  ;;  %v7243_v32 = vunpack.c.l.bf16 %v6074_v30 }
 0x451   : > { %7217 = vst [vmem:[#allocation78_spill] sm:$0xff] %v6270_v6  ;;  %7218 = vst [vmem:[#allocation79_spill] sm:$0xff] %v6276_v24  ;;  %v6284_v57 = vld [vmem:[#allocation3 + $0x1d0] sm:$0xff]  ;;  %v6290_v62 = vld [vmem:[#allocation3 + $0x1d8] sm:$0xff]  ;;  %v7231_v6 = vunpack.c.l.bf16 %v6049_v21  ;;  %v7240_v24 = vunpack.c.h.bf16 %v6063_v17 }
 0x452   : > { %v3164_v28 = vmul.f32 %v4068_v13, %v3151_v47  ;;  %7219 = vst [vmem:[#allocation80_spill] sm:$0xff] %v6282_v33  ;;  %7220 = vst [vmem:[#allocation81_spill] sm:$0xff] %v6284_v57  ;;  %v6297_v41 = vld [vmem:[#allocation3 + $0x1e8] sm:$0xff]  ;;  %v7226_v33 = vunpack.c.l.bf16 %v6038_v51  ;;  %v7239_v57 = vunpack.c.l.bf16 %v6065_v59 }
 0x453   : > { %7221 = vst [vmem:[#allocation82_spill] sm:$0xff] %v6290_v62  ;;  %7223 = vst [vmem:[#allocation84_spill] sm:$0xff] %v6297_v41  ;;  %v7232_v41 = vunpack.c.h.bf16 %v6042_v27  ;;  %v7236_v62 = vunpack.c.h.bf16 %v6055_v63 }
 0x454   : > { %v3172_v13 = vrot.slane %v3164_v28, %v6068_v46  ;;  %v3179_v44 = vmul.f32 %v3164_v28, %v6036_v14 }
 0x456   : > { %3178 = vst.msk [vmem:[#allocation7] ss:$2 sm:$0x3] %vm6161_vm2, %v3172_v13  ;;  %v3181_v14 = vrot.slane %v3179_v44, 7  ;;  %v6261_v13 = vld [vmem:[#allocation3 + $0x1a0] sm:$0xff]  ;;  %v6263_v44 = vld [vmem:[#allocation3 + $0x1a8] sm:$0xff] }
 0x457   : > { %7214 = vst [vmem:[#allocation75_spill] sm:$0xff] %v6261_v13  ;;  %7215 = vst [vmem:[#allocation76_spill] sm:$0xff] %v6263_v44  ;;  %v7230_v44 = vunpack.c.l.bf16 %v6042_v27  ;;  %v7237_v27 = vunpack.c.h.bf16 %v6057_v25  ;;  %v7244_v13 = vunpack.c.h.bf16 %v6072_v50 }
 0x458   : > { %v3183_v28 = vsub.f32 %v3151_v47, %v3181_v14  ;;  %v6295_v14 = vld [vmem:[#allocation3 + $0x1e0] sm:$0xff] }
 0x459   : > { %7222 = vst [vmem:[#allocation83_spill] sm:$0xff] %v6295_v14  ;;  %v7235_v14 = vunpack.c.l.bf16 %v6057_v25  ;;  %v7242_v25 = vunpack.c.l.bf16 %v6072_v50 }
 0x45a   : > { %v3191_v47 = vrot.slane %v3183_v28, %v6068_v46 }
 0x45c   : > { %v3192_v46 = vcombine.high %v3191_v47, %v3191_v47  ;;  %v7224_v47 = vsub.s32 0, %v6045_v9 }
 0x45d   : > { %v3391_v0 = vld [vmem:[#allocation7] ss:$2 sm:$0x3] }
 0x45e   : > { %v6305_v28 = vrot.slane %v3391_v0, %v7224_v47  ;;  %v6309_v11 = vrot.slane %v3391_v0, %v7225_v37  ;;  %3195 = vst.msk [vmem:[#allocation7 + $0x1] ss:$2 sm:$0x3] %vm6161_vm2, %v3192_v46  ;;  %v7227_v0 = vunpack.c.l.bf16 %v6040_v20  ;;  %v7228_v46 = vunpack.c.h.bf16 %v6038_v51 }
 0x45f   : > { %v7233_v51 = vunpack.c.h.bf16 %v6049_v21  ;;  %v7234_v20 = vunpack.c.l.bf16 %v6055_v63  ;;  %v7238_v21 = vunpack.c.l.bf16 %v6063_v17  ;;  %v7241_v63 = vunpack.c.h.bf16 %v6065_v59 }
 0x460   : > { %v3403_v37 = vmul.f32 %v6305_v28, %v7226_v33  ;;  %v3404_v5 = vmul.f32 %v6309_v11, %v7227_v0  ;;  %v3405_v52 = vmul.f32 %v6305_v28, %v7228_v46  ;;  %v3406_v23 = vmul.f32 %v6309_v11, %v7229_v53 }
 0x461   : > { %v3407_v47 = vmul.f32 %v6305_v28, %v7230_v44  ;;  %v3408_v33 = vmul.f32 %v6309_v11, %v7231_v6  ;;  %v3409_v0 = vmul.f32 %v6305_v28, %v7232_v41  ;;  %v3410_v46 = vmul.f32 %v6309_v11, %v7233_v51 }
 0x462   : > { %v3411_v53 = vmul.f32 %v6305_v28, %v7234_v20  ;;  %v3412_v44 = vmul.f32 %v6309_v11, %v7235_v14  ;;  %v3413_v6 = vmul.f32 %v6305_v28, %v7236_v62  ;;  %v3414_v41 = vmul.f32 %v6309_v11, %v7237_v27 }
 0x463   : > { %v3415_v51 = vmul.f32 %v6305_v28, %v7238_v21  ;;  %v3416_v20 = vmul.f32 %v6309_v11, %v7239_v57  ;;  %v3417_v14 = vmul.f32 %v6305_v28, %v7240_v24  ;;  %v3418_v62 = vmul.f32 %v6309_v11, %v7241_v63 }
 0x464   : > { %v3419_v27 = vmul.f32 %v6305_v28, %v7242_v25  ;;  %v3420_v21 = vmul.f32 %v6309_v11, %v7243_v32  ;;  %v3421_v57 = vmul.f32 %v6305_v28, %v7244_v13  ;;  %v7245_v17 = vunpack.c.h.bf16 %v6074_v30 }
 0x465   : > { %v3532_v54 = vld [vmem:[#allocation7 + $0x1] ss:$2 sm:$0x3]  ;;  %v7246_v59 = vunpack.c.l.bf16 %v6080_v12  ;;  %v7247_v25 = vunpack.c.l.bf16 %v6082_v43  ;;  %v7248_v32 = vunpack.c.h.bf16 %v6080_v12  ;;  %v7249_v30 = vunpack.c.h.bf16 %v6082_v43 }
 0x466   : > { %v3422_v24 = vmul.f32 %v6309_v11, %v7245_v17  ;;  %v7250_v17 = vsub.s32 0, %v6045_v9 }
 0x467   : > { %v6382_v63 = vmul.f32 %v6305_v28, %v7246_v59  ;;  %v6387_v3 = vmul.f32 %v6309_v11, %v7247_v25  ;;  %v6392_v50 = vmul.f32 %v6305_v28, %v7248_v32  ;;  %v6397_v13 = vmul.f32 %v6309_v11, %v7249_v30 }
 0x468   : > { %v6401_v48 = vrot.slane %v3532_v54, %v7250_v17  ;;  %v7251_v59 = vsub.s32 1, %v6045_v9  ;;  %v7252_v25 = vunpack.c.l.bf16 %v6088_v35  ;;  %v7253_v32 = vunpack.c.l.bf16 %v6090_v38 }
 0x469   : > { %v7254_v30 = vunpack.c.h.bf16 %v6088_v35  ;;  %v7255_v17 = vunpack.c.h.bf16 %v6090_v38 }
 0x46a   : > { %v6405_v26 = vrot.slane %v3532_v54, %v7251_v59  ;;  %v6410_v12 = vmul.f32 %v6305_v28, %v7252_v25  ;;  %v6415_v43 = vmul.f32 %v6309_v11, %v7253_v32  ;;  %v7256_v54 = vunpack.c.l.bf16 %v6096_v7 }
 0x46b   : > { %v6420_v19 = vmul.f32 %v6305_v28, %v7254_v30  ;;  %v6425_v9 = vmul.f32 %v6309_v11, %v7255_v17  ;;  %v7257_v25 = vunpack.c.l.bf16 %v6101_v15  ;;  %v3544_v35 = vadd.f32 %v6401_v48, %v3403_v37 }
 0x46c   : > { %v6430_v59 = vmul.f32 %v6305_v28, %v7256_v54  ;;  %v3545_v30 = vadd.f32 %v6405_v26, %v3404_v5  ;;  %v3546_v58 = vadd.f32 %v6401_v48, %v3405_v52  ;;  %v3547_v38 = vadd.f32 %v6405_v26, %v3406_v23 }
 0x46d   : > { %v6435_v32 = vmul.f32 %v6309_v11, %v7257_v25  ;;  %v3548_v17 = vadd.f32 %v6401_v48, %v3407_v47  ;;  %v3549_v45 = vadd.f32 %v6405_v26, %v3408_v33  ;;  %v3550_v54 = vadd.f32 %v6401_v48, %v3409_v0 }
 0x46e   : > { %v3551_v60 = vadd.f32 %v6405_v26, %v3410_v46  ;;  %v3672_v42 = vmax.f32 %v3544_v35, 0.0  ;;  %v3673_v55 = vmax.f32 %v3545_v30, 0.0  ;;  %v3674_v25 = vmax.f32 %v3546_v58, 0.0 }
 0x46f   : > { %v3675_v39 = vmax.f32 %v3547_v38, 0.0  ;;  %v3676_v36 = vmax.f32 %v3548_v17, 0.0  ;;  %v3677_v37 = vmax.f32 %v3549_v45, 0.0  ;;  %v3678_v29 = vmax.f32 %v3550_v54, 0.0 }
 0x470   : > { %v3679_v5 = vmax.f32 %v3551_v60, 0.0  ;;  %3800 = vst [vmem:[#allocation14] sm:$0xff] %v3672_v42  ;;  %3801 = vst [vmem:[#allocation14 + $0x8] sm:$0xff] %v3673_v55  ;;  %v3552_v52 = vadd.f32 %v6401_v48, %v3411_v53  ;;  %v3553_v23 = vadd.f32 %v6405_v26, %v3412_v44  ;;  %v3554_v47 = vadd.f32 %v6401_v48, %v3413_v6 }
 0x471   : > { %3802 = vst [vmem:[#allocation14 + $0x10] sm:$0xff] %v3674_v25  ;;  %3803 = vst [vmem:[#allocation14 + $0x18] sm:$0xff] %v3675_v39  ;;  %v3555_v33 = vadd.f32 %v6405_v26, %v3414_v41  ;;  %v3556_v58 = vadd.f32 %v6401_v48, %v3415_v51  ;;  %v3557_v45 = vadd.f32 %v6405_v26, %v3416_v20 }
 0x472   : > { %3804 = vst [vmem:[#allocation14 + $0x20] sm:$0xff] %v3676_v36  ;;  %3805 = vst [vmem:[#allocation14 + $0x28] sm:$0xff] %v3677_v37  ;;  %v3558_v60 = vadd.f32 %v6401_v48, %v3417_v14  ;;  %v3559_v55 = vadd.f32 %v6405_v26, %v3418_v62  ;;  %v3680_v39 = vmax.f32 %v3552_v52, 0.0  ;;  %v3681_v42 = vmax.f32 %v3553_v23, 0.0 }
 0x473   : > { %3806 = vst [vmem:[#allocation14 + $0x30] sm:$0xff] %v3678_v29  ;;  %3807 = vst [vmem:[#allocation14 + $0x38] sm:$0xff] %v3679_v5  ;;  %v3682_v0 = vmax.f32 %v3554_v47, 0.0  ;;  %v3683_v46 = vmax.f32 %v3555_v33, 0.0  ;;  %v3684_v53 = vmax.f32 %v3556_v58, 0.0  ;;  %v3685_v44 = vmax.f32 %v3557_v45, 0.0 }
 0x474   : > { %v3686_v6 = vmax.f32 %v3558_v60, 0.0  ;;  %v3687_v41 = vmax.f32 %v3559_v55, 0.0  ;;  %3808 = vst [vmem:[#allocation14 + $0x40] sm:$0xff] %v3680_v39  ;;  %3809 = vst [vmem:[#allocation14 + $0x48] sm:$0xff] %v3681_v42  ;;  %v3560_v29 = vadd.f32 %v6401_v48, %v3419_v27  ;;  %v3561_v36 = vadd.f32 %v6405_v26, %v3420_v21 }
 0x475   : > { %3810 = vst [vmem:[#allocation14 + $0x50] sm:$0xff] %v3682_v0  ;;  %3811 = vst [vmem:[#allocation14 + $0x58] sm:$0xff] %v3683_v46  ;;  %v3562_v51 = vadd.f32 %v6401_v48, %v3421_v57  ;;  %v3563_v20 = vadd.f32 %v6405_v26, %v3422_v24  ;;  %v3564_v14 = vadd.f32 %v6401_v48, %v6382_v63  ;;  %v7259_v52 = vunpack.c.h.bf16 %v6101_v15 }
 0x476   : > { %3812 = vst [vmem:[#allocation14 + $0x60] sm:$0xff] %v3684_v53  ;;  %3813 = vst [vmem:[#allocation14 + $0x68] sm:$0xff] %v3685_v44  ;;  %v3565_v62 = vadd.f32 %v6405_v26, %v6387_v3  ;;  %v3566_v35 = vadd.f32 %v6401_v48, %v6392_v50  ;;  %v3567_v27 = vadd.f32 %v6405_v26, %v6397_v13  ;;  %v3688_v21 = vmax.f32 %v3560_v29, 0.0 }
 0x477   : > { %3814 = vst [vmem:[#allocation14 + $0x70] sm:$0xff] %v3686_v6  ;;  %3815 = vst [vmem:[#allocation14 + $0x78] sm:$0xff] %v3687_v41  ;;  %v3689_v57 = vmax.f32 %v3561_v36, 0.0  ;;  %v3690_v30 = vmax.f32 %v3562_v51, 0.0  ;;  %v3691_v24 = vmax.f32 %v3563_v20, 0.0  ;;  %v3692_v38 = vmax.f32 %v3564_v14, 0.0 }
 0x478   : > { %v3693_v17 = vmax.f32 %v3565_v62, 0.0  ;;  %v3694_v54 = vmax.f32 %v3566_v35, 0.0  ;;  %v3695_v25 = vmax.f32 %v3567_v27, 0.0  ;;  %3816 = vst [vmem:[#allocation14 + $0x80] sm:$0xff] %v3688_v21  ;;  %v3568_v3 = vadd.f32 %v6401_v48, %v6410_v12 }
 0x479   : > { %3817 = vst [vmem:[#allocation14 + $0x88] sm:$0xff] %v3689_v57  ;;  %3818 = vst [vmem:[#allocation14 + $0x90] sm:$0xff] %v3690_v30  ;;  %v3569_v63 = vadd.f32 %v6405_v26, %v6415_v43  ;;  %v3570_v50 = vadd.f32 %v6401_v48, %v6420_v19  ;;  %v3571_v13 = vadd.f32 %v6405_v26, %v6425_v9  ;;  %v7258_v12 = vunpack.c.h.bf16 %v6096_v7 }
 0x47a   : > { %3819 = vst [vmem:[#allocation14 + $0x98] sm:$0xff] %v3691_v24  ;;  %3820 = vst [vmem:[#allocation14 + $0xa0] sm:$0xff] %v3692_v38  ;;  %v3572_v37 = vadd.f32 %v6401_v48, %v6430_v59  ;;  %v3573_v5 = vadd.f32 %v6405_v26, %v6435_v32  ;;  %v3434_v19 = vmul.f32 %v6309_v11, %v7259_v52  ;;  %v3696_v23 = vmax.f32 %v3568_v3, 0.0 }
 0x47b   : > { %3821 = vst [vmem:[#allocation14 + $0xa8] sm:$0xff] %v3693_v17  ;;  %3822 = vst [vmem:[#allocation14 + $0xb0] sm:$0xff] %v3694_v54  ;;  %v3433_v43 = vmul.f32 %v6305_v28, %v7258_v12  ;;  %v3697_v9 = vmax.f32 %v3569_v63, 0.0  ;;  %v3698_v47 = vmax.f32 %v3570_v50, 0.0  ;;  %v3699_v33 = vmax.f32 %v3571_v13, 0.0 }
 0x47c   : > { %3823 = vst [vmem:[#allocation14 + $0xb8] sm:$0xff] %v3695_v25  ;;  %v3700_v58 = vmax.f32 %v3572_v37, 0.0  ;;  %v3701_v45 = vmax.f32 %v3573_v5, 0.0  ;;  %v3575_v59 = vadd.f32 %v6405_v26, %v3434_v19  ;;  %3824 = vst [vmem:[#allocation14 + $0xc0] sm:$0xff] %v3696_v23  ;;  %v7260_v7 = vunpack.c.l.bf16 %v6103_v8 }
 0x47d   : > { %v3574_v60 = vadd.f32 %v6401_v48, %v3433_v43  ;;  %3825 = vst [vmem:[#allocation14 + $0xc8] sm:$0xff] %v3697_v9  ;;  %3826 = vst [vmem:[#allocation14 + $0xd0] sm:$0xff] %v3698_v47  ;;  %v7261_v32 = vunpack.c.l.bf16 %v6109_v1  ;;  %v7262_v39 = vunpack.c.h.bf16 %v6103_v8  ;;  %v7263_v0 = vunpack.c.h.bf16 %v6109_v1 }
 0x47e   : > { %3827 = vst [vmem:[#allocation14 + $0xd8] sm:$0xff] %v3699_v33  ;;  %v3435_v15 = vmul.f32 %v6305_v28, %v7260_v7  ;;  %3828 = vst [vmem:[#allocation14 + $0xe0] sm:$0xff] %v3700_v58  ;;  %v3703_v44 = vmax.f32 %v3575_v59, 0.0  ;;  %v7264_v6 = vunpack.c.l.bf16 %v6111_v56  ;;  %v7265_v29 = vunpack.c.l.bf16 %v6116_v16 }
 0x47f   : > { %v3436_v55 = vmul.f32 %v6309_v11, %v7261_v32  ;;  %v3437_v42 = vmul.f32 %v6305_v28, %v7262_v39  ;;  %v3438_v46 = vmul.f32 %v6309_v11, %v7263_v0  ;;  %3829 = vst [vmem:[#allocation14 + $0xe8] sm:$0xff] %v3701_v45  ;;  %v3702_v53 = vmax.f32 %v3574_v60, 0.0 }
 0x480   : > { %v3439_v41 = vmul.f32 %v6305_v28, %v7264_v6  ;;  %v3440_v36 = vmul.f32 %v6309_v11, %v7265_v29  ;;  %v3576_v8 = vadd.f32 %v6401_v48, %v3435_v15  ;;  %3831 = vst [vmem:[#allocation14 + $0xf8] sm:$0xff] %v3703_v44  ;;  %v7266_v35 = vunpack.c.h.bf16 %v6111_v56 }
 0x481   : > { %v3577_v51 = vadd.f32 %v6405_v26, %v3436_v55  ;;  %v3578_v1 = vadd.f32 %v6401_v48, %v3437_v42  ;;  %v3579_v20 = vadd.f32 %v6405_v26, %v3438_v46  ;;  %3830 = vst [vmem:[#allocation14 + $0xf0] sm:$0xff] %v3702_v53  ;;  %v7267_v21 = vunpack.c.h.bf16 %v6116_v16 }
 0x482   : > { %v3580_v14 = vadd.f32 %v6401_v48, %v3439_v41  ;;  %v3581_v62 = vadd.f32 %v6405_v26, %v3440_v36  ;;  %v3441_v27 = vmul.f32 %v6305_v28, %v7266_v35  ;;  %v3704_v30 = vmax.f32 %v3576_v8, 0.0 }
 0x483   : > { %v3442_v57 = vmul.f32 %v6309_v11, %v7267_v21  ;;  %v3705_v24 = vmax.f32 %v3577_v51, 0.0  ;;  %v3706_v38 = vmax.f32 %v3578_v1, 0.0  ;;  %v3707_v17 = vmax.f32 %v3579_v20, 0.0 }
 0x484   : > { %v3708_v54 = vmax.f32 %v3580_v14, 0.0  ;;  %v3709_v25 = vmax.f32 %v3581_v62, 0.0  ;;  %v3582_v3 = vadd.f32 %v6401_v48, %v3441_v27  ;;  %3832 = vst [vmem:[#allocation14 + $0x100] sm:$0xff] %v3704_v30  ;;  %v7268_v56 = vunpack.c.l.bf16 %v6118_v2 }
 0x485   : > { %v3583_v63 = vadd.f32 %v6405_v26, %v3442_v57  ;;  %3833 = vst [vmem:[#allocation14 + $0x108] sm:$0xff] %v3705_v24  ;;  %3834 = vst [vmem:[#allocation14 + $0x110] sm:$0xff] %v3706_v38  ;;  %v7269_v50 = vunpack.c.l.bf16 %v6124_v10  ;;  %v7270_v37 = vunpack.c.h.bf16 %v6118_v2  ;;  %v7271_v12 = vunpack.c.h.bf16 %v6124_v10 }
 0x486   : > { %3835 = vst [vmem:[#allocation14 + $0x118] sm:$0xff] %v3707_v17  ;;  %v3443_v16 = vmul.f32 %v6305_v28, %v7268_v56  ;;  %3836 = vst [vmem:[#allocation14 + $0x120] sm:$0xff] %v3708_v54  ;;  %v3710_v52 = vmax.f32 %v3582_v3, 0.0  ;;  %v7272_v23 = vunpack.c.l.bf16 %v6126_v34  ;;  %v7273_v47 = vunpack.c.l.bf16 %v6132_v22 }
 0x487   : > { %v3444_v13 = vmul.f32 %v6309_v11, %v7269_v50  ;;  %v3445_v5 = vmul.f32 %v6305_v28, %v7270_v37  ;;  %v3446_v43 = vmul.f32 %v6309_v11, %v7271_v12  ;;  %3837 = vst [vmem:[#allocation14 + $0x128] sm:$0xff] %v3709_v25  ;;  %v3711_v19 = vmax.f32 %v3583_v63, 0.0 }
 0x488   : > { %v3447_v9 = vmul.f32 %v6305_v28, %v7272_v23  ;;  %v3448_v33 = vmul.f32 %v6309_v11, %v7273_v47  ;;  %v3584_v2 = vadd.f32 %v6401_v48, %v3443_v16  ;;  %3838 = vst [vmem:[#allocation14 + $0x130] sm:$0xff] %v3710_v52  ;;  %v7274_v7 = vunpack.c.h.bf16 %v6126_v34 }
 0x489   : > { %v3585_v58 = vadd.f32 %v6405_v26, %v3444_v13  ;;  %v3586_v10 = vadd.f32 %v6401_v48, %v3445_v5  ;;  %v3587_v45 = vadd.f32 %v6405_v26, %v3446_v43  ;;  %3839 = vst [vmem:[#allocation14 + $0x138] sm:$0xff] %v3711_v19  ;;  %v7275_v32 = vunpack.c.h.bf16 %v6132_v22 }
 0x48a   : > { %v3588_v60 = vadd.f32 %v6401_v48, %v3447_v9  ;;  %v3589_v59 = vadd.f32 %v6405_v26, %v3448_v33  ;;  %v3449_v15 = vmul.f32 %v6305_v28, %v7274_v7  ;;  %v3712_v39 = vmax.f32 %v3584_v2, 0.0 }
 0x48b   : > { %v3450_v55 = vmul.f32 %v6309_v11, %v7275_v32  ;;  %v3713_v42 = vmax.f32 %v3585_v58, 0.0  ;;  %v3714_v0 = vmax.f32 %v3586_v10, 0.0  ;;  %v3715_v46 = vmax.f32 %v3587_v45, 0.0  ;;  %v7288_v10 = vld [vmem:[#allocation53_spill] sm:$0xff] }
 0x48c   : > { %v3716_v53 = vmax.f32 %v3588_v60, 0.0  ;;  %v3717_v44 = vmax.f32 %v3589_v59, 0.0  ;;  %v3590_v6 = vadd.f32 %v6401_v48, %v3449_v15  ;;  %3840 = vst [vmem:[#allocation14 + $0x140] sm:$0xff] %v3712_v39  ;;  %v7276_v34 = vunpack.c.l.bf16 %v6134_v49  ;;  %v7290_v59 = vld [vmem:[#allocation54_spill] sm:$0xff] }
 0x48d   : > { %v3591_v41 = vadd.f32 %v6405_v26, %v3450_v55  ;;  %3841 = vst [vmem:[#allocation14 + $0x148] sm:$0xff] %v3713_v42  ;;  %3842 = vst [vmem:[#allocation14 + $0x150] sm:$0xff] %v3714_v0  ;;  %v7277_v29 = vunpack.c.l.bf16 %v6140_v4  ;;  %v7278_v8 = vunpack.c.h.bf16 %v6134_v49  ;;  %v7279_v1 = vunpack.c.h.bf16 %v6140_v4 }
 0x48e   : > { %3843 = vst [vmem:[#allocation14 + $0x158] sm:$0xff] %v3715_v46  ;;  %v3451_v22 = vmul.f32 %v6305_v28, %v7276_v34  ;;  %3844 = vst [vmem:[#allocation14 + $0x160] sm:$0xff] %v3716_v53  ;;  %v3718_v14 = vmax.f32 %v3590_v6, 0.0  ;;  %v7280_v35 = vunpack.c.l.bf16 %v6142_v31  ;;  %v7281_v21 = vunpack.c.l.bf16 %v6148_v18 }
 0x48f   : > { %v3452_v36 = vmul.f32 %v6309_v11, %v7277_v29  ;;  %v3453_v51 = vmul.f32 %v6305_v28, %v7278_v8  ;;  %v3454_v20 = vmul.f32 %v6309_v11, %v7279_v1  ;;  %3845 = vst [vmem:[#allocation14 + $0x168] sm:$0xff] %v3717_v44  ;;  %v3719_v62 = vmax.f32 %v3591_v41, 0.0  ;;  %v7294_v1 = vld [vmem:[#allocation55_spill] sm:$0xff] }
 0x490   : > { %v3455_v27 = vmul.f32 %v6305_v28, %v7280_v35  ;;  %v3456_v57 = vmul.f32 %v6309_v11, %v7281_v21  ;;  %v3592_v49 = vadd.f32 %v6401_v48, %v3451_v22  ;;  %3846 = vst [vmem:[#allocation14 + $0x170] sm:$0xff] %v3718_v14  ;;  %v7282_v54 = vunpack.c.h.bf16 %v6142_v31 }
 0x491   : > { %v3593_v30 = vadd.f32 %v6405_v26, %v3452_v36  ;;  %v3594_v4 = vadd.f32 %v6401_v48, %v3453_v51  ;;  %v3595_v24 = vadd.f32 %v6405_v26, %v3454_v20  ;;  %3847 = vst [vmem:[#allocation14 + $0x178] sm:$0xff] %v3719_v62  ;;  %v7283_v3 = vunpack.c.h.bf16 %v6148_v18  ;;  %v7296_v62 = vld [vmem:[#allocation56_spill] sm:$0xff] }
 0x492   : > { %v3596_v38 = vadd.f32 %v6401_v48, %v3455_v27  ;;  %v3597_v17 = vadd.f32 %v6405_v26, %v3456_v57  ;;  %v3457_v25 = vmul.f32 %v6305_v28, %v7282_v54  ;;  %v3720_v56 = vmax.f32 %v3592_v49, 0.0 }
 0x493   : > { %v3458_v63 = vmul.f32 %v6309_v11, %v7283_v3  ;;  %v3721_v16 = vmax.f32 %v3593_v30, 0.0  ;;  %v3722_v50 = vmax.f32 %v3594_v4, 0.0  ;;  %v3723_v13 = vmax.f32 %v3595_v24, 0.0 }
 0x494   : > { %v3724_v37 = vmax.f32 %v3596_v38, 0.0  ;;  %v3725_v5 = vmax.f32 %v3597_v17, 0.0  ;;  %v3598_v12 = vadd.f32 %v6401_v48, %v3457_v25  ;;  %3848 = vst [vmem:[#allocation14 + $0x180] sm:$0xff] %v3720_v56  ;;  %v7284_v31 = vunpack.c.l.bf16 %v6150_v61  ;;  %v7300_v38 = vld [vmem:[#allocation57_spill] sm:$0xff]  ;;  %v7302_v25 = vld [vmem:[#allocation58_spill] sm:$0xff] }
 0x495   : > { %v3599_v43 = vadd.f32 %v6405_v26, %v3458_v63  ;;  %3849 = vst [vmem:[#allocation14 + $0x188] sm:$0xff] %v3721_v16  ;;  %3850 = vst [vmem:[#allocation14 + $0x190] sm:$0xff] %v3722_v50  ;;  %v7285_v52 = vunpack.c.l.bf16 %v6156_v40  ;;  %v7286_v23 = vunpack.c.h.bf16 %v6150_v61  ;;  %v7287_v47 = vunpack.c.h.bf16 %v6156_v40 }
 0x496   : > { %3851 = vst [vmem:[#allocation14 + $0x198] sm:$0xff] %v3723_v13  ;;  %v3459_v18 = vmul.f32 %v6305_v28, %v7284_v31  ;;  %3852 = vst [vmem:[#allocation14 + $0x1a0] sm:$0xff] %v3724_v37  ;;  %v3726_v2 = vmax.f32 %v3598_v12, 0.0  ;;  %v7289_v45 = vunpack.c.l.bf16 %v7288_v10  ;;  %v7291_v7 = vunpack.c.l.bf16 %v7290_v59 }
 0x497   : > { %v3460_v19 = vmul.f32 %v6309_v11, %v7285_v52  ;;  %v3461_v9 = vmul.f32 %v6305_v28, %v7286_v23  ;;  %v3462_v33 = vmul.f32 %v6309_v11, %v7287_v47  ;;  %3853 = vst [vmem:[#allocation14 + $0x1a8] sm:$0xff] %v3725_v5  ;;  %v3727_v58 = vmax.f32 %v3599_v43, 0.0 }
 0x498   : > { %v3463_v60 = vmul.f32 %v6305_v28, %v7289_v45  ;;  %v3464_v15 = vmul.f32 %v6309_v11, %v7291_v7  ;;  %v3600_v61 = vadd.f32 %v6401_v48, %v3459_v18  ;;  %3854 = vst [vmem:[#allocation14 + $0x1b0] sm:$0xff] %v3726_v2  ;;  %v7292_v0 = vunpack.c.h.bf16 %v7288_v10  ;;  %v7306_v10 = vld [vmem:[#allocation59_spill] sm:$0xff] }
 0x499   : > { %v3601_v32 = vadd.f32 %v6405_v26, %v3460_v19  ;;  %v3602_v40 = vadd.f32 %v6401_v48, %v3461_v9  ;;  %v3603_v55 = vadd.f32 %v6405_v26, %v3462_v33  ;;  %3855 = vst [vmem:[#allocation14 + $0x1b8] sm:$0xff] %v3727_v58  ;;  %v7293_v53 = vunpack.c.h.bf16 %v7290_v59  ;;  %v7308_v59 = vld [vmem:[#allocation60_spill] sm:$0xff] }
 0x49a   : > { %v3604_v39 = vadd.f32 %v6401_v48, %v3463_v60  ;;  %v3605_v42 = vadd.f32 %v6405_v26, %v3464_v15  ;;  %v3465_v46 = vmul.f32 %v6305_v28, %v7292_v0  ;;  %v3728_v6 = vmax.f32 %v3600_v61, 0.0  ;;  %v7312_v0 = vld [vmem:[#allocation61_spill] sm:$0xff] }
 0x49b   : > { %v3466_v44 = vmul.f32 %v6309_v11, %v7293_v53  ;;  %v3729_v41 = vmax.f32 %v3601_v32, 0.0  ;;  %v3730_v34 = vmax.f32 %v3602_v40, 0.0  ;;  %v3731_v22 = vmax.f32 %v3603_v55, 0.0 }
 0x49c   : > { %v3732_v29 = vmax.f32 %v3604_v39, 0.0  ;;  %v3733_v36 = vmax.f32 %v3605_v42, 0.0  ;;  %v3606_v8 = vadd.f32 %v6401_v48, %v3465_v46  ;;  %3856 = vst [vmem:[#allocation14 + $0x1c0] sm:$0xff] %v3728_v6  ;;  %v7295_v20 = vunpack.c.l.bf16 %v7294_v1 }
 0x49d   : > { %v3607_v51 = vadd.f32 %v6405_v26, %v3466_v44  ;;  %3857 = vst [vmem:[#allocation14 + $0x1c8] sm:$0xff] %v3729_v41  ;;  %3858 = vst [vmem:[#allocation14 + $0x1d0] sm:$0xff] %v3730_v34  ;;  %v7297_v35 = vunpack.c.l.bf16 %v7296_v62  ;;  %v7298_v21 = vunpack.c.h.bf16 %v7294_v1  ;;  %v7299_v49 = vunpack.c.h.bf16 %v7296_v62  ;;  %v7314_v44 = vld [vmem:[#allocation62_spill] sm:$0xff] }
 0x49e   : > { %3859 = vst [vmem:[#allocation14 + $0x1d8] sm:$0xff] %v3731_v22  ;;  %v3467_v14 = vmul.f32 %v6305_v28, %v7295_v20  ;;  %3860 = vst [vmem:[#allocation14 + $0x1e0] sm:$0xff] %v3732_v29  ;;  %v3734_v4 = vmax.f32 %v3606_v8, 0.0  ;;  %v7301_v17 = vunpack.c.l.bf16 %v7300_v38  ;;  %v7303_v3 = vunpack.c.l.bf16 %v7302_v25 }
 0x49f   : > { %v3468_v27 = vmul.f32 %v6309_v11, %v7297_v35  ;;  %v3469_v57 = vmul.f32 %v6305_v28, %v7298_v21  ;;  %v3470_v30 = vmul.f32 %v6309_v11, %v7299_v49  ;;  %3861 = vst [vmem:[#allocation14 + $0x1e8] sm:$0xff] %v3733_v36  ;;  %v3735_v24 = vmax.f32 %v3607_v51, 0.0 }
 0x4a0   : > { %v3471_v54 = vmul.f32 %v6305_v28, %v7301_v17  ;;  %v3472_v63 = vmul.f32 %v6309_v11, %v7303_v3  ;;  %v3608_v56 = vadd.f32 %v6401_v48, %v3467_v14  ;;  %3862 = vst [vmem:[#allocation14 + $0x1f0] sm:$0xff] %v3734_v4  ;;  %v7304_v12 = vunpack.c.h.bf16 %v7300_v38  ;;  %v7318_v38 = vld [vmem:[#allocation63_spill] sm:$0xff] }
 0x4a1   : > { %v3609_v16 = vadd.f32 %v6405_v26, %v3468_v27  ;;  %v3610_v50 = vadd.f32 %v6401_v48, %v3469_v57  ;;  %v3611_v13 = vadd.f32 %v6405_v26, %v3470_v30  ;;  %3863 = vst [vmem:[#allocation14 + $0x1f8] sm:$0xff] %v3735_v24  ;;  %v7305_v31 = vunpack.c.h.bf16 %v7302_v25  ;;  %v7320_v25 = vld [vmem:[#allocation64_spill] sm:$0xff] }
 0x4a2   : > { %v3612_v37 = vadd.f32 %v6401_v48, %v3471_v54  ;;  %v3613_v5 = vadd.f32 %v6405_v26, %v3472_v63  ;;  %v3473_v43 = vmul.f32 %v6305_v28, %v7304_v12  ;;  %v3736_v52 = vmax.f32 %v3608_v56, 0.0  ;;  %v7324_v12 = vld [vmem:[#allocation65_spill] sm:$0xff] }
 0x4a3   : > { %v3474_v18 = vmul.f32 %v6309_v11, %v7305_v31  ;;  %v3737_v19 = vmax.f32 %v3609_v16, 0.0  ;;  %v3738_v23 = vmax.f32 %v3610_v50, 0.0  ;;  %v3739_v9 = vmax.f32 %v3611_v13, 0.0 }
 0x4a4   : > { %v3740_v47 = vmax.f32 %v3612_v37, 0.0  ;;  %v3741_v33 = vmax.f32 %v3613_v5, 0.0  ;;  %v3614_v2 = vadd.f32 %v6401_v48, %v3473_v43  ;;  %3864 = vst [vmem:[#allocation14 + $0x200] sm:$0xff] %v3736_v52  ;;  %v7307_v45 = vunpack.c.l.bf16 %v7306_v10 }
 0x4a5   : > { %v3615_v58 = vadd.f32 %v6405_v26, %v3474_v18  ;;  %3865 = vst [vmem:[#allocation14 + $0x208] sm:$0xff] %v3737_v19  ;;  %3866 = vst [vmem:[#allocation14 + $0x210] sm:$0xff] %v3738_v23  ;;  %v7309_v7 = vunpack.c.l.bf16 %v7308_v59  ;;  %v7310_v61 = vunpack.c.h.bf16 %v7306_v10  ;;  %v7311_v40 = vunpack.c.h.bf16 %v7308_v59  ;;  %v7326_v18 = vld [vmem:[#allocation66_spill] sm:$0xff] }
 0x4a6   : > { %3867 = vst [vmem:[#allocation14 + $0x218] sm:$0xff] %v3739_v9  ;;  %v3475_v60 = vmul.f32 %v6305_v28, %v7307_v45  ;;  %3868 = vst [vmem:[#allocation14 + $0x220] sm:$0xff] %v3740_v47  ;;  %v3742_v39 = vmax.f32 %v3614_v2, 0.0  ;;  %v7313_v46 = vunpack.c.l.bf16 %v7312_v0  ;;  %v7315_v6 = vunpack.c.l.bf16 %v7314_v44 }
 0x4a7   : > { %v3476_v15 = vmul.f32 %v6309_v11, %v7309_v7  ;;  %v3477_v32 = vmul.f32 %v6305_v28, %v7310_v61  ;;  %v3478_v55 = vmul.f32 %v6309_v11, %v7311_v40  ;;  %3869 = vst [vmem:[#allocation14 + $0x228] sm:$0xff] %v3741_v33  ;;  %v3743_v42 = vmax.f32 %v3615_v58, 0.0 }
 0x4a8   : > { %v3479_v53 = vmul.f32 %v6305_v28, %v7313_v46  ;;  %v3480_v41 = vmul.f32 %v6309_v11, %v7315_v6  ;;  %v3616_v34 = vadd.f32 %v6401_v48, %v3475_v60  ;;  %3870 = vst [vmem:[#allocation14 + $0x230] sm:$0xff] %v3742_v39  ;;  %v7316_v1 = vunpack.c.h.bf16 %v7312_v0  ;;  %v7330_v0 = vld [vmem:[#allocation67_spill] sm:$0xff] }
 0x4a9   : > { %v3617_v22 = vadd.f32 %v6405_v26, %v3476_v15  ;;  %v3618_v29 = vadd.f32 %v6401_v48, %v3477_v32  ;;  %v3619_v36 = vadd.f32 %v6405_v26, %v3478_v55  ;;  %3871 = vst [vmem:[#allocation14 + $0x238] sm:$0xff] %v3743_v42  ;;  %v7317_v14 = vunpack.c.h.bf16 %v7314_v44  ;;  %v7332_v44 = vld [vmem:[#allocation68_spill] sm:$0xff] }
 0x4aa   : > { %v3620_v8 = vadd.f32 %v6401_v48, %v3479_v53  ;;  %v3621_v51 = vadd.f32 %v6405_v26, %v3480_v41  ;;  %v3481_v20 = vmul.f32 %v6305_v28, %v7316_v1  ;;  %v3744_v35 = vmax.f32 %v3616_v34, 0.0  ;;  %v7336_v1 = vld [vmem:[#allocation69_spill] sm:$0xff] }
 0x4ab   : > { %v3482_v62 = vmul.f32 %v6309_v11, %v7317_v14  ;;  %v3745_v27 = vmax.f32 %v3617_v22, 0.0  ;;  %v3746_v21 = vmax.f32 %v3618_v29, 0.0  ;;  %v3747_v57 = vmax.f32 %v3619_v36, 0.0 }
 0x4ac   : > { %v3748_v49 = vmax.f32 %v3620_v8, 0.0  ;;  %v3749_v30 = vmax.f32 %v3621_v51, 0.0  ;;  %v3622_v4 = vadd.f32 %v6401_v48, %v3481_v20  ;;  %3872 = vst [vmem:[#allocation14 + $0x240] sm:$0xff] %v3744_v35  ;;  %v7319_v17 = vunpack.c.l.bf16 %v7318_v38 }
 0x4ad   : > { %v3623_v24 = vadd.f32 %v6405_v26, %v3482_v62  ;;  %3873 = vst [vmem:[#allocation14 + $0x248] sm:$0xff] %v3745_v27  ;;  %3874 = vst [vmem:[#allocation14 + $0x250] sm:$0xff] %v3746_v21  ;;  %v7321_v3 = vunpack.c.l.bf16 %v7320_v25  ;;  %v7322_v56 = vunpack.c.h.bf16 %v7318_v38  ;;  %v7323_v50 = vunpack.c.h.bf16 %v7320_v25  ;;  %v7338_v62 = vld [vmem:[#allocation70_spill] sm:$0xff] }
 0x4ae   : > { %3875 = vst [vmem:[#allocation14 + $0x258] sm:$0xff] %v3747_v57  ;;  %v3483_v54 = vmul.f32 %v6305_v28, %v7319_v17  ;;  %3876 = vst [vmem:[#allocation14 + $0x260] sm:$0xff] %v3748_v49  ;;  %v3750_v37 = vmax.f32 %v3622_v4, 0.0  ;;  %v7325_v43 = vunpack.c.l.bf16 %v7324_v12  ;;  %v7327_v52 = vunpack.c.l.bf16 %v7326_v18 }
 0x4af   : > { %v3484_v63 = vmul.f32 %v6309_v11, %v7321_v3  ;;  %v3485_v16 = vmul.f32 %v6305_v28, %v7322_v56  ;;  %v3486_v13 = vmul.f32 %v6309_v11, %v7323_v50  ;;  %3877 = vst [vmem:[#allocation14 + $0x268] sm:$0xff] %v3749_v30  ;;  %v3751_v5 = vmax.f32 %v3623_v24, 0.0 }
 0x4b0   : > { %v3487_v31 = vmul.f32 %v6305_v28, %v7325_v43  ;;  %v3488_v19 = vmul.f32 %v6309_v11, %v7327_v52  ;;  %v3624_v23 = vadd.f32 %v6401_v48, %v3483_v54  ;;  %3878 = vst [vmem:[#allocation14 + $0x270] sm:$0xff] %v3750_v37  ;;  %v7328_v10 = vunpack.c.h.bf16 %v7324_v12  ;;  %v7342_v12 = vld [vmem:[#allocation71_spill] sm:$0xff] }
 0x4b1   : > { %v3625_v9 = vadd.f32 %v6405_v26, %v3484_v63  ;;  %v3626_v47 = vadd.f32 %v6401_v48, %v3485_v16  ;;  %v3627_v33 = vadd.f32 %v6405_v26, %v3486_v13  ;;  %3879 = vst [vmem:[#allocation14 + $0x278] sm:$0xff] %v3751_v5  ;;  %v7329_v60 = vunpack.c.h.bf16 %v7326_v18  ;;  %v7344_v18 = vld [vmem:[#allocation72_spill] sm:$0xff] }
 0x4b2   : > { %v3628_v2 = vadd.f32 %v6401_v48, %v3487_v31  ;;  %v3629_v58 = vadd.f32 %v6405_v26, %v3488_v19  ;;  %v3489_v45 = vmul.f32 %v6305_v28, %v7328_v10  ;;  %v3752_v7 = vmax.f32 %v3624_v23, 0.0  ;;  %v7348_v10 = vld [vmem:[#allocation73_spill] sm:$0xff] }
 0x4b3   : > { %v3490_v59 = vmul.f32 %v6309_v11, %v7329_v60  ;;  %v3753_v15 = vmax.f32 %v3625_v9, 0.0  ;;  %v3754_v61 = vmax.f32 %v3626_v47, 0.0  ;;  %v3755_v32 = vmax.f32 %v3627_v33, 0.0 }
 0x4b4   : > { %v3756_v40 = vmax.f32 %v3628_v2, 0.0  ;;  %v3757_v55 = vmax.f32 %v3629_v58, 0.0  ;;  %v3630_v39 = vadd.f32 %v6401_v48, %v3489_v45  ;;  %3880 = vst [vmem:[#allocation14 + $0x280] sm:$0xff] %v3752_v7  ;;  %v7331_v46 = vunpack.c.l.bf16 %v7330_v0 }
 0x4b5   : > { %v3631_v42 = vadd.f32 %v6405_v26, %v3490_v59  ;;  %3881 = vst [vmem:[#allocation14 + $0x288] sm:$0xff] %v3753_v15  ;;  %3882 = vst [vmem:[#allocation14 + $0x290] sm:$0xff] %v3754_v61  ;;  %v7333_v6 = vunpack.c.l.bf16 %v7332_v44  ;;  %v7334_v34 = vunpack.c.h.bf16 %v7330_v0  ;;  %v7335_v29 = vunpack.c.h.bf16 %v7332_v44  ;;  %v7350_v59 = vld [vmem:[#allocation74_spill] sm:$0xff] }
 0x4b6   : > { %3883 = vst [vmem:[#allocation14 + $0x298] sm:$0xff] %v3755_v32  ;;  %v3491_v53 = vmul.f32 %v6305_v28, %v7331_v46  ;;  %3884 = vst [vmem:[#allocation14 + $0x2a0] sm:$0xff] %v3756_v40  ;;  %v3758_v8 = vmax.f32 %v3630_v39, 0.0  ;;  %v7337_v20 = vunpack.c.l.bf16 %v7336_v1  ;;  %v7339_v35 = vunpack.c.l.bf16 %v7338_v62 }
 0x4b7   : > { %v3492_v41 = vmul.f32 %v6309_v11, %v7333_v6  ;;  %v3493_v22 = vmul.f32 %v6305_v28, %v7334_v34  ;;  %v3494_v36 = vmul.f32 %v6309_v11, %v7335_v29  ;;  %3885 = vst [vmem:[#allocation14 + $0x2a8] sm:$0xff] %v3757_v55  ;;  %v3759_v51 = vmax.f32 %v3631_v42, 0.0 }
 0x4b8   : > { %v3495_v14 = vmul.f32 %v6305_v28, %v7337_v20  ;;  %v3496_v27 = vmul.f32 %v6309_v11, %v7339_v35  ;;  %v3632_v21 = vadd.f32 %v6401_v48, %v3491_v53  ;;  %3886 = vst [vmem:[#allocation14 + $0x2b0] sm:$0xff] %v3758_v8  ;;  %v7340_v38 = vunpack.c.h.bf16 %v7336_v1  ;;  %v7354_v1 = vld [vmem:[#allocation75_spill] sm:$0xff] }
 0x4b9   : > { %v3633_v57 = vadd.f32 %v6405_v26, %v3492_v41  ;;  %v3634_v49 = vadd.f32 %v6401_v48, %v3493_v22  ;;  %v3635_v30 = vadd.f32 %v6405_v26, %v3494_v36  ;;  %3887 = vst [vmem:[#allocation14 + $0x2b8] sm:$0xff] %v3759_v51  ;;  %v7341_v54 = vunpack.c.h.bf16 %v7338_v62  ;;  %v7356_v62 = vld [vmem:[#allocation76_spill] sm:$0xff] }
 0x4ba   : > { %v3636_v4 = vadd.f32 %v6401_v48, %v3495_v14  ;;  %v3637_v24 = vadd.f32 %v6405_v26, %v3496_v27  ;;  %v3497_v17 = vmul.f32 %v6305_v28, %v7340_v38  ;;  %v3760_v3 = vmax.f32 %v3632_v21, 0.0  ;;  %v7360_v38 = vld [vmem:[#allocation77_spill] sm:$0xff] }
 0x4bb   : > { %v3498_v25 = vmul.f32 %v6309_v11, %v7341_v54  ;;  %v3761_v63 = vmax.f32 %v3633_v57, 0.0  ;;  %v3762_v56 = vmax.f32 %v3634_v49, 0.0  ;;  %v3763_v16 = vmax.f32 %v3635_v30, 0.0 }
 0x4bc   : > { %v3764_v50 = vmax.f32 %v3636_v4, 0.0  ;;  %v3765_v13 = vmax.f32 %v3637_v24, 0.0  ;;  %v3638_v37 = vadd.f32 %v6401_v48, %v3497_v17  ;;  %3888 = vst [vmem:[#allocation14 + $0x2c0] sm:$0xff] %v3760_v3  ;;  %v7343_v43 = vunpack.c.l.bf16 %v7342_v12 }
 0x4bd   : > { %v3639_v5 = vadd.f32 %v6405_v26, %v3498_v25  ;;  %3889 = vst [vmem:[#allocation14 + $0x2c8] sm:$0xff] %v3761_v63  ;;  %3890 = vst [vmem:[#allocation14 + $0x2d0] sm:$0xff] %v3762_v56  ;;  %v7345_v52 = vunpack.c.l.bf16 %v7344_v18  ;;  %v7346_v23 = vunpack.c.h.bf16 %v7342_v12  ;;  %v7347_v47 = vunpack.c.h.bf16 %v7344_v18  ;;  %v7362_v25 = vld [vmem:[#allocation78_spill] sm:$0xff] }
 0x4be   : > { %3891 = vst [vmem:[#allocation14 + $0x2d8] sm:$0xff] %v3763_v16  ;;  %v3499_v31 = vmul.f32 %v6305_v28, %v7343_v43  ;;  %3892 = vst [vmem:[#allocation14 + $0x2e0] sm:$0xff] %v3764_v50  ;;  %v3766_v2 = vmax.f32 %v3638_v37, 0.0  ;;  %v7349_v45 = vunpack.c.l.bf16 %v7348_v10  ;;  %v7351_v7 = vunpack.c.l.bf16 %v7350_v59 }
 0x4bf   : > { %v3500_v19 = vmul.f32 %v6309_v11, %v7345_v52  ;;  %v3501_v9 = vmul.f32 %v6305_v28, %v7346_v23  ;;  %v3502_v33 = vmul.f32 %v6309_v11, %v7347_v47  ;;  %3893 = vst [vmem:[#allocation14 + $0x2e8] sm:$0xff] %v3765_v13  ;;  %v3767_v58 = vmax.f32 %v3639_v5, 0.0 }
 0x4c0   : > { %v3503_v60 = vmul.f32 %v6305_v28, %v7349_v45  ;;  %v3504_v15 = vmul.f32 %v6309_v11, %v7351_v7  ;;  %v3640_v61 = vadd.f32 %v6401_v48, %v3499_v31  ;;  %3894 = vst [vmem:[#allocation14 + $0x2f0] sm:$0xff] %v3766_v2  ;;  %v7352_v0 = vunpack.c.h.bf16 %v7348_v10  ;;  %v7366_v10 = vld [vmem:[#allocation79_spill] sm:$0xff] }
 0x4c1   : > { %v3641_v32 = vadd.f32 %v6405_v26, %v3500_v19  ;;  %v3642_v40 = vadd.f32 %v6401_v48, %v3501_v9  ;;  %v3643_v55 = vadd.f32 %v6405_v26, %v3502_v33  ;;  %3895 = vst [vmem:[#allocation14 + $0x2f8] sm:$0xff] %v3767_v58  ;;  %v7353_v53 = vunpack.c.h.bf16 %v7350_v59  ;;  %v7368_v59 = vld [vmem:[#allocation80_spill] sm:$0xff] }
 0x4c2   : > { %v3644_v39 = vadd.f32 %v6401_v48, %v3503_v60  ;;  %v3645_v42 = vadd.f32 %v6405_v26, %v3504_v15  ;;  %v3505_v46 = vmul.f32 %v6305_v28, %v7352_v0  ;;  %v3768_v6 = vmax.f32 %v3640_v61, 0.0  ;;  %v7372_v0 = vld [vmem:[#allocation81_spill] sm:$0xff] }
 0x4c3   : > { %v3506_v44 = vmul.f32 %v6309_v11, %v7353_v53  ;;  %v3769_v41 = vmax.f32 %v3641_v32, 0.0  ;;  %v3770_v34 = vmax.f32 %v3642_v40, 0.0  ;;  %v3771_v22 = vmax.f32 %v3643_v55, 0.0 }
 0x4c4   : > { %v3772_v29 = vmax.f32 %v3644_v39, 0.0  ;;  %v3773_v36 = vmax.f32 %v3645_v42, 0.0  ;;  %v3646_v8 = vadd.f32 %v6401_v48, %v3505_v46  ;;  %3896 = vst [vmem:[#allocation14 + $0x300] sm:$0xff] %v3768_v6  ;;  %v7355_v20 = vunpack.c.l.bf16 %v7354_v1 }
 0x4c5   : > { %v3647_v51 = vadd.f32 %v6405_v26, %v3506_v44  ;;  %3897 = vst [vmem:[#allocation14 + $0x308] sm:$0xff] %v3769_v41  ;;  %3898 = vst [vmem:[#allocation14 + $0x310] sm:$0xff] %v3770_v34  ;;  %v7357_v35 = vunpack.c.l.bf16 %v7356_v62  ;;  %v7358_v21 = vunpack.c.h.bf16 %v7354_v1  ;;  %v7359_v49 = vunpack.c.h.bf16 %v7356_v62  ;;  %v7374_v44 = vld [vmem:[#allocation82_spill] sm:$0xff] }
 0x4c6   : > { %3899 = vst [vmem:[#allocation14 + $0x318] sm:$0xff] %v3771_v22  ;;  %v3507_v14 = vmul.f32 %v6305_v28, %v7355_v20  ;;  %3900 = vst [vmem:[#allocation14 + $0x320] sm:$0xff] %v3772_v29  ;;  %v3774_v4 = vmax.f32 %v3646_v8, 0.0  ;;  %v7361_v17 = vunpack.c.l.bf16 %v7360_v38  ;;  %v7363_v3 = vunpack.c.l.bf16 %v7362_v25 }
 0x4c7   : > { %v3508_v27 = vmul.f32 %v6309_v11, %v7357_v35  ;;  %v3509_v57 = vmul.f32 %v6305_v28, %v7358_v21  ;;  %v3510_v30 = vmul.f32 %v6309_v11, %v7359_v49  ;;  %3901 = vst [vmem:[#allocation14 + $0x328] sm:$0xff] %v3773_v36  ;;  %v3775_v24 = vmax.f32 %v3647_v51, 0.0  ;;  %v3261_v49 = vld [vmem:[#allocation3 + $0x1f0] sm:$0xff] }
 0x4c8   : > { %v3511_v54 = vmul.f32 %v6305_v28, %v7361_v17  ;;  %v3512_v63 = vmul.f32 %v6309_v11, %v7363_v3  ;;  %v3648_v56 = vadd.f32 %v6401_v48, %v3507_v14  ;;  %3902 = vst [vmem:[#allocation14 + $0x330] sm:$0xff] %v3774_v4  ;;  %v7364_v12 = vunpack.c.h.bf16 %v7360_v38 }
 0x4c9   : > { %v3649_v16 = vadd.f32 %v6405_v26, %v3508_v27  ;;  %v3650_v50 = vadd.f32 %v6401_v48, %v3509_v57  ;;  %v3651_v13 = vadd.f32 %v6405_v26, %v3510_v30  ;;  %3903 = vst [vmem:[#allocation14 + $0x338] sm:$0xff] %v3775_v24  ;;  %v7365_v31 = vunpack.c.h.bf16 %v7362_v25  ;;  %v3262_v30 = vld [vmem:[#allocation3 + $0x1f8] sm:$0xff] }
 0x4ca   : > { %v3652_v37 = vadd.f32 %v6401_v48, %v3511_v54  ;;  %v3653_v5 = vadd.f32 %v6405_v26, %v3512_v63  ;;  %v3513_v43 = vmul.f32 %v6305_v28, %v7364_v12  ;;  %v3776_v52 = vmax.f32 %v3648_v56, 0.0  ;;  %v7378_v54 = vld [vmem:[#allocation83_spill] sm:$0xff]  ;;  %v7380_v63 = vld [vmem:[#allocation84_spill] sm:$0xff] }
 0x4cb   : > { %v3514_v18 = vmul.f32 %v6309_v11, %v7365_v31  ;;  %v3777_v19 = vmax.f32 %v3649_v16, 0.0  ;;  %v3778_v23 = vmax.f32 %v3650_v50, 0.0  ;;  %v3779_v9 = vmax.f32 %v3651_v13, 0.0 }
 0x4cc   : > { %v3780_v47 = vmax.f32 %v3652_v37, 0.0  ;;  %v3781_v33 = vmax.f32 %v3653_v5, 0.0  ;;  %v3654_v2 = vadd.f32 %v6401_v48, %v3513_v43  ;;  %3904 = vst [vmem:[#allocation14 + $0x340] sm:$0xff] %v3776_v52  ;;  %v7367_v45 = vunpack.c.l.bf16 %v7366_v10 }
 0x4cd   : > { %v3655_v58 = vadd.f32 %v6405_v26, %v3514_v18  ;;  %3905 = vst [vmem:[#allocation14 + $0x348] sm:$0xff] %v3777_v19  ;;  %3906 = vst [vmem:[#allocation14 + $0x350] sm:$0xff] %v3778_v23  ;;  %v7369_v7 = vunpack.c.l.bf16 %v7368_v59  ;;  %v7370_v61 = vunpack.c.h.bf16 %v7366_v10  ;;  %v7371_v40 = vunpack.c.h.bf16 %v7368_v59 }
 0x4ce   : > { %3907 = vst [vmem:[#allocation14 + $0x358] sm:$0xff] %v3779_v9  ;;  %v3515_v60 = vmul.f32 %v6305_v28, %v7367_v45  ;;  %3908 = vst [vmem:[#allocation14 + $0x360] sm:$0xff] %v3780_v47  ;;  %v3782_v39 = vmax.f32 %v3654_v2, 0.0  ;;  %v7373_v46 = vunpack.c.l.bf16 %v7372_v0  ;;  %v7375_v6 = vunpack.c.l.bf16 %v7374_v44 }
 0x4cf   : > { %v3516_v15 = vmul.f32 %v6309_v11, %v7369_v7  ;;  %v3517_v32 = vmul.f32 %v6305_v28, %v7370_v61  ;;  %v3518_v55 = vmul.f32 %v6309_v11, %v7371_v40  ;;  %3909 = vst [vmem:[#allocation14 + $0x368] sm:$0xff] %v3781_v33  ;;  %v3783_v42 = vmax.f32 %v3655_v58, 0.0 }
 0x4d0   : > { %v3519_v53 = vmul.f32 %v6305_v28, %v7373_v46  ;;  %v3520_v41 = vmul.f32 %v6309_v11, %v7375_v6  ;;  %v3656_v34 = vadd.f32 %v6401_v48, %v3515_v60  ;;  %3910 = vst [vmem:[#allocation14 + $0x370] sm:$0xff] %v3782_v39  ;;  %v7376_v1 = vunpack.c.h.bf16 %v7372_v0 }
 0x4d1   : > { %v3657_v22 = vadd.f32 %v6405_v26, %v3516_v15  ;;  %v3658_v29 = vadd.f32 %v6401_v48, %v3517_v32  ;;  %v3659_v36 = vadd.f32 %v6405_v26, %v3518_v55  ;;  %3911 = vst [vmem:[#allocation14 + $0x378] sm:$0xff] %v3783_v42  ;;  %v7377_v14 = vunpack.c.h.bf16 %v7374_v44 }
 0x4d2   : > { %v3660_v8 = vadd.f32 %v6401_v48, %v3519_v53  ;;  %v3661_v51 = vadd.f32 %v6405_v26, %v3520_v41  ;;  %v3521_v20 = vmul.f32 %v6305_v28, %v7376_v1  ;;  %v3784_v35 = vmax.f32 %v3656_v34, 0.0 }
 0x4d3   : > { %v3522_v62 = vmul.f32 %v6309_v11, %v7377_v14  ;;  %v3785_v27 = vmax.f32 %v3657_v22, 0.0  ;;  %v3786_v21 = vmax.f32 %v3658_v29, 0.0  ;;  %v3787_v57 = vmax.f32 %v3659_v36, 0.0 }
 0x4d4   : > { %v3788_v4 = vmax.f32 %v3660_v8, 0.0  ;;  %v3789_v24 = vmax.f32 %v3661_v51, 0.0  ;;  %v3662_v38 = vadd.f32 %v6401_v48, %v3521_v20  ;;  %3912 = vst [vmem:[#allocation14 + $0x380] sm:$0xff] %v3784_v35  ;;  %v7379_v25 = vunpack.c.l.bf16 %v7378_v54 }
 0x4d5   : > { %v3663_v17 = vadd.f32 %v6405_v26, %v3522_v62  ;;  %3913 = vst [vmem:[#allocation14 + $0x388] sm:$0xff] %v3785_v27  ;;  %3914 = vst [vmem:[#allocation14 + $0x390] sm:$0xff] %v3786_v21  ;;  %v7381_v56 = vunpack.c.l.bf16 %v7380_v63  ;;  %v7382_v50 = vunpack.c.h.bf16 %v7378_v54  ;;  %v3386_v37 = vunpack.c.h.bf16 %v7380_v63 }
 0x4d6   : > { %3915 = vst [vmem:[#allocation14 + $0x398] sm:$0xff] %v3787_v57  ;;  %v3523_v3 = vmul.f32 %v6305_v28, %v7379_v25  ;;  %3916 = vst [vmem:[#allocation14 + $0x3a0] sm:$0xff] %v3788_v4  ;;  %v3790_v5 = vmax.f32 %v3662_v38, 0.0  ;;  %v3387_v43 = vunpack.c.l.bf16 %v3261_v49  ;;  %v3388_v31 = vunpack.c.l.bf16 %v3262_v30 }
 0x4d7   : > { %v3524_v16 = vmul.f32 %v6309_v11, %v7381_v56  ;;  %v3525_v13 = vmul.f32 %v6305_v28, %v7382_v50  ;;  %3917 = vst [vmem:[#allocation14 + $0x3a8] sm:$0xff] %v3789_v24  ;;  %v3791_v12 = vmax.f32 %v3663_v17, 0.0  ;;  %v3526_v23 = vmul.f32 %v6309_v11, %v3386_v37 }
 0x4d8   : > { %v3664_v18 = vadd.f32 %v6401_v48, %v3523_v3  ;;  %3918 = vst [vmem:[#allocation14 + $0x3b0] sm:$0xff] %v3790_v5  ;;  %v3527_v9 = vmul.f32 %v6305_v28, %v3387_v43  ;;  %v3528_v47 = vmul.f32 %v6309_v11, %v3388_v31  ;;  %v3389_v33 = vunpack.c.h.bf16 %v3261_v49 }
 0x4d9   : > { %v3665_v52 = vadd.f32 %v6405_v26, %v3524_v16  ;;  %v3666_v19 = vadd.f32 %v6401_v48, %v3525_v13  ;;  %3919 = vst [vmem:[#allocation14 + $0x3b8] sm:$0xff] %v3791_v12  ;;  %v3390_v2 = vunpack.c.h.bf16 %v3262_v30  ;;  %v3667_v60 = vadd.f32 %v6405_v26, %v3526_v23 }
 0x4da   : > { %v3792_v58 = vmax.f32 %v3664_v18, 0.0  ;;  %v3668_v59 = vadd.f32 %v6401_v48, %v3527_v9  ;;  %v3669_v7 = vadd.f32 %v6405_v26, %v3528_v47  ;;  %v3529_v15 = vmul.f32 %v6305_v28, %v3389_v33 }
 0x4db   : > { %v3793_v10 = vmax.f32 %v3665_v52, 0.0  ;;  %v3794_v45 = vmax.f32 %v3666_v19, 0.0  ;;  %v3530_v61 = vmul.f32 %v6309_v11, %v3390_v2  ;;  %v3795_v32 = vmax.f32 %v3667_v60, 0.0 }
 0x4dc   : > { %3920 = vst [vmem:[#allocation14 + $0x3c0] sm:$0xff] %v3792_v58  ;;  %v3796_v40 = vmax.f32 %v3668_v59, 0.0  ;;  %v3797_v55 = vmax.f32 %v3669_v7, 0.0  ;;  %v3670_v39 = vadd.f32 %v6401_v48, %v3529_v15 }
 0x4dd   : > { %3921 = vst [vmem:[#allocation14 + $0x3c8] sm:$0xff] %v3793_v10  ;;  %3922 = vst [vmem:[#allocation14 + $0x3d0] sm:$0xff] %v3794_v45  ;;  %v3671_v42 = vadd.f32 %v6405_v26, %v3530_v61 }
 0x4de   : > { %3923 = vst [vmem:[#allocation14 + $0x3d8] sm:$0xff] %v3795_v32  ;;  %3924 = vst [vmem:[#allocation14 + $0x3e0] sm:$0xff] %v3796_v40  ;;  %v3798_v0 = vmax.f32 %v3670_v39, 0.0 }
 0x4df   : > { %3925 = vst [vmem:[#allocation14 + $0x3e8] sm:$0xff] %v3797_v55  ;;  %v3799_v46 = vmax.f32 %v3671_v42, 0.0 }
 0x4e0   : > { %3926 = vst [vmem:[#allocation14 + $0x3f0] sm:$0xff] %v3798_v0 }
 0x4e1   : > { %3927 = vst [vmem:[#allocation14 + $0x3f8] sm:$0xff] %v3799_v46 }
 0x4e2 PF: > { %p6862_p11 = scmp.eq.s32.totalorder %s4053_s21, 2  ;;  %s4363_s16 = smov [#allocation14]  }
 0x4e3   : > { %s3945_s17 = sshll.u32 %s4363_s16, 4  ;;  %s3946_s17 = int_to_ptr.vmem [resolvable:$true] %s3945_s17 }
 0x4e4   : > { %s4289_s26 = scalar_lea.vmem %s3946_s17, 16384  ;;  %s4295_s29 = scalar_lea.vmem %s3946_s17, 32768 }
 0x4e5   : > { %p4290_p12 = scmp.ne.s32.totalorder %s3946_s17, %s4289_s26  ;;  %p4296_p1 = scmp.lt.s32.totalorder %s3946_s17, %s3946_s17 }
 0x4e6   : > { %p4297_p2 = scmp.lt.s32.totalorder %s4295_s29, %s4289_s26 }
 0x4e7   : > { %p4291_p13 = pnand %p4290_p12, %p6862_p11 }
 0x4e8   : > { %p4298_p5 = por %p4297_p2, %p4296_p1 }
 0x4e9   : > { %p4292_p0 = pneg %p4291_p13 }
 0x4eb   : > { %p4299_p3 = pnand %p4298_p5, %p4292_p0 }
 0x4ed   : > { %4302 = shalt.err (!%p4299_p3)
}
 0x4ee   : > { %s4303_s6 = scalar_lea.hbm %s6901_s5, 16384 }
 0x4ef   : > { %p4304_p4 = scmp.ne.s32.totalorder %s6901_s5, %s4303_s6  ;;  %p4309_p8 = scmp.lt.u32.totalorder %s4303_s6, %s6901_s5 }
 0x4f1   : > { %p4305_p9 = pnand %p4304_p4, %p6862_p11 }
 0x4f3   : > { %p4306_p6 = pneg %p4305_p9 }
 0x4f5   : > { %p4311_p7 = pnand %p4309_p8, %p4306_p6 }
 0x4f7   : > { %4314 = shalt.err (!%p4311_p7)
}
 0x4f8   : > { %s4364_s8 = smov 256   ;;  %s4365_s9 = smov 16  }
 0x4f9   : > { %4134 = dma.vmem_to_hbm [thread:$0]  (%p6862_p11), %s3946_s17, 16384, %s6901_s5, [#allocation10], %s4364_s8, %s4364_s8, %s4365_s9  }
 0x4fa PF: > { %p4160_p10 = scmp.ge.s32.totalorder %s4349_s20, 2  ;;  %p4161_p12 = scmp.eq.s32.totalorder %s4054_s22, 2 }
 0x4fc   : > { %p4149_p13 = pnand %p4161_p12, %p4160_p10 }
 0x4fe   : > { %4336 = dma.done.wait (!%p4149_p13), [#allocation10], 16384  }
 0x4ff   : > { %4338 = vsyncadd (!%p4149_p13), [#allocation10], 4294950912  ;;  %s22_s20 = sadd.s32 1, %s4349_s20   ;;  %s7384_s18 = smov %s4345_s19 }
 0x500   : > { %p19_p0 = scmp.ge.s32.totalorder %s22_s20, 5   ;;  %s7385_s19 = smov %s7387_s23 }
 0x502   :  { %21 = sbr.rel (!%p19_p0) target bundleno = 6 (0x6), region = 127 }
 0x509   :  { %3966 = vsyncpa [#allocation9], 1 }
 0x50a   :  { %3968 = vsyncpa [#allocation9 + $0x1], 1 }
 0x50b   :  { %3969 = vsyncpa [#allocation12], 1 }
 0x50c   :  { %3970 = vsyncpa [#allocation10], 1 }
 0x50d   :  { %3972 = vsyncpa [#allocation10 + $0x1], 1 }

</bundles_post_ra>
